<compile_context>
chip_gen: v7x
topology: tpu7x:2x2x1
jax: 0.10.0
libtpu: 0.0.40
codegen_flags: <defaults>
</compile_context>

<pallas_src>
import functools

import jax
import jax.numpy as jnp
from jax import lax
from jax.experimental import pallas as pl
from jax.experimental.pallas import tpu as pltpu


def _c3_kernel(x_ref, xt_ref, xb_ref,
               w12_ref, b12_ref, wm1_ref, bm1_ref,
               wm2_ref, bm2_ref, w3_ref, b3_ref,
               o_ref, tp_ref, *, TH, W, C1, Ch, C2, nh):
    f32, bf16 = jnp.float32, jnp.bfloat16
    i = pl.program_id(1)

    def silu(v):                      # f32 elementwise (v5e-friendly)
        return v * jax.nn.sigmoid(v)

    # ---- fused cv1+cv2 pointwise stage (one MXU pass), then m.cv1 ----
    x = x_ref[...].reshape(TH * W, C1)                                   # bf16
    y12 = silu(jnp.dot(x, w12_ref[...], preferred_element_type=f32)
               + b12_ref[...])                                           # (M, 2Ch) f32
    y12 = y12.astype(bf16)            # only needed as a matmul operand from here on
    y1 = y12[:, :Ch]                  # cv1 branch feeds the bottleneck
    t = silu(jnp.dot(y1, wm1_ref[...], preferred_element_type=f32)
             + bm1_ref[...])                                             # (M, Ch) f32

    # ---- padded activation scratch: zero only the borders that are read ----
    tp_ref[:, 0:1, :] = jnp.zeros((TH + 2, 1, Ch), bf16)
    tp_ref[:, W + 1:W + 2, :] = jnp.zeros((TH + 2, 1, Ch), bf16)

    @pl.when(i == 0)                  # top of image: halo row stays zero
    def _():
        tp_ref[0:1, :, :] = jnp.zeros((1, W + 2, Ch), bf16)

    @pl.when(i == nh - 1)             # bottom of image: halo row stays zero
    def _():
        tp_ref[TH + 1:TH + 2, :, :] = jnp.zeros((1, W + 2, Ch), bf16)

    tp_ref[1:TH + 1, 1:W + 1, :] = t.astype(bf16).reshape(TH, W, Ch)

    if nh > 1:
        # Halo rows above/below the tile: recompute the pointwise chain on 2 rows.
        xh = jnp.concatenate([xt_ref[...].reshape(W, C1),
                              xb_ref[...].reshape(W, C1)], axis=0)       # (2W, C1)
        yh = silu(jnp.dot(xh, w12_ref[...], preferred_element_type=f32)
                  + b12_ref[...])
        th = silu(jnp.dot(yh[:, :Ch].astype(bf16), wm1_ref[...],
                          preferred_element_type=f32) + bm1_ref[...]).astype(bf16)

        @pl.when(i > 0)
        def _():
            tp_ref[0:1, 1:W + 1, :] = th[:W].reshape(1, W, Ch)

        @pl.when(i < nh - 1)
        def _():
            tp_ref[TH + 1:TH + 2, 1:W + 1, :] = th[W:2 * W].reshape(1, W, Ch)

    # ---- 3x3 conv: 9 accumulating matmuls on padded-scratch views (no concat) ----
    acc = jnp.zeros((TH * W, Ch), f32)
    for di in range(3):
        rows = tp_ref[di:di + TH]                                        # (TH, W+2, Ch)
        for dj in range(3):
            patch = rows[:, dj:dj + W, :].reshape(TH * W, Ch)
            acc = acc + jnp.dot(patch, wm2_ref[di * 3 + dj],
                                preferred_element_type=f32)
    c = silu(acc + bm2_ref[...]).astype(bf16)                            # conv branch

    # ---- cv3 over cat(m_out, y2); shortcut + concat folded into the MXU:
    #      cat(y1 + c, y2) @ W3 == y12 @ W3 + c @ W3[:Ch]
    w3 = w3_ref[...]
    out = silu(jnp.dot(y12, w3, preferred_element_type=f32)
               + jnp.dot(c, w3[:Ch], preferred_element_type=f32)
               + b3_ref[...])
    o_ref[...] = out.astype(o_ref.dtype).reshape(1, TH, W, C2)


def c3_forward(x_nchw, params, *, tile_h=None, out_dtype=jnp.float32,
               vmem_budget_bytes=40 * 1024 * 1024):
    bf16, f32 = jnp.bfloat16, jnp.float32
    x = jnp.transpose(x_nchw, (0, 2, 3, 1)).astype(bf16)                 # NCHW -> NHWC
    N, H, W, C1 = x.shape
    Ch = params["w_cv1"].shape[1]
    C2 = params["w_cv3"].shape[1]
    out_bytes = jnp.dtype(out_dtype).itemsize

    def footprint(th):
        # 2x for double-buffered pipelined blocks; weights counted twice as margin.
        blk_in = th * W * C1 * 2
        halo = W * C1 * 2
        blk_out = th * W * C2 * out_bytes
        scratch = (th + 2) * (W + 2) * Ch * 2
        weights = (C1 * 2 * Ch + Ch * Ch + 9 * Ch * Ch + 2 * Ch * C2) * 2 \
                  + (4 * Ch + C2) * 4
        live = th * W * (2 * Ch * 2 + 2 * Ch * 4 + C2 * 4)               # y12/acc/out
        return 2 * (blk_in + 2 * halo + blk_out) + 2 * weights + scratch + live

    if tile_h is None:
        # Largest row tile that fits the VMEM budget (maximizes M = TH*W per matmul
        # and amortizes per-step pipeline overhead and the halo DMAs).
        tile_h = 1
        for th in range(1, H + 1):
            if H % th == 0 and footprint(th) <= vmem_budget_bytes:
                tile_h = th
    TH = tile_h
    assert H % TH == 0, "H must be divisible by the row tile"
    nh = H // TH

    # vmem limit: generous vs. the estimated footprint but never v7x's full 64 MiB.
    vmem_limit = int(min(48 * 1024 * 1024,
                         max(32 * 1024 * 1024, 2 * footprint(TH))))

    # ---- weight prep (bf16 MXU operands, f32 biases) ----
    w12 = jnp.concatenate([params["w_cv1"], params["w_cv2"]], axis=1).astype(bf16)
    b12 = jnp.concatenate([params["b_cv1"], params["b_cv2"]], axis=1).astype(f32)
    wm1 = params["w_m1"].astype(bf16)
    bm1 = params["b_m1"].astype(f32)
    wm2 = params["w_m2"].reshape(9, Ch, Ch).astype(bf16)    # HWIO (3,3,Ch,Ch) -> (9,Ch,Ch)
    bm2 = params["b_m2"].astype(f32)
    w3 = params["w_cv3"].astype(bf16)                       # (2Ch, C2), rows [m | cv2]
    b3 = params["b_cv3"].astype(f32)

    def rep(a):                       # weights stay VMEM-resident across grid steps
        nd = a.ndim
        return pl.BlockSpec(a.shape, lambda n, i, _nd=nd: (0,) * _nd)

    x_spec = pl.BlockSpec((1, TH, W, C1), lambda n, i: (n, i, 0, 0))
    xt_spec = pl.BlockSpec((1, 1, W, C1),
                           lambda n, i: (n, jnp.maximum(i * TH - 1, 0), 0, 0))
    xb_spec = pl.BlockSpec((1, 1, W, C1),
                           lambda n, i: (n, jnp.minimum(i * TH + TH, H - 1), 0, 0))
    o_spec = pl.BlockSpec((1, TH, W, C2), lambda n, i: (n, i, 0, 0))

    kernel = functools.partial(_c3_kernel, TH=TH, W=W, C1=C1, Ch=Ch, C2=C2, nh=nh)

    out = pl.pallas_call(
        kernel,
        out_shape=jax.ShapeDtypeStruct((N, H, W, C2), out_dtype),
        grid_spec=pltpu.PrefetchScalarGridSpec(
            num_scalar_prefetch=0,
            grid=(N, nh),
            in_specs=[x_spec, xt_spec, xb_spec,
                      rep(w12), rep(b12), rep(wm1), rep(bm1),
                      rep(wm2), rep(bm2), rep(w3), rep(b3)],
            out_specs=o_spec,
            scratch_shapes=[pltpu.VMEM((TH + 2, W + 2, Ch), bf16)]),
        compiler_params=pltpu.CompilerParams(
            dimension_semantics=("parallel", "parallel"),
            vmem_limit_bytes=vmem_limit),
    )(x, x, x, w12, b12, wm1, bm1, wm2, bm2, w3, b3)
    return jnp.transpose(out, (0, 3, 1, 2))                 # NHWC -> NCHW


def fold_conv_bn(key, cin, cout, k):
    """Deterministic Conv2d(no bias) + BatchNorm2d params, folded. Returns HWIO w, bias."""
    k1, k2, k3, k4, k5 = jax.random.split(key, 5)
    w = jax.random.normal(k1, (cout, cin, k, k), jnp.float32) * 0.1
    gamma = 1.0 + 0.1 * jax.random.normal(k2, (cout,), jnp.float32)
    beta = 0.1 * jax.random.normal(k3, (cout,), jnp.float32)
    mean = 0.1 * jax.random.normal(k4, (cout,), jnp.float32)
    var = jnp.abs(jax.random.normal(k5, (cout,), jnp.float32)) + 0.5
    eps = 1e-3
    scale = gamma / jnp.sqrt(var + eps)
    w_f = w * scale[:, None, None, None]
    b_f = beta - mean * scale
    w_hwio = jnp.transpose(w_f, (2, 3, 1, 0))  # (k, k, Cin, Cout)
    return w_hwio, b_f


def make_params(key, c1, c2, e=0.5):
    ch = int(c2 * e)
    ks = jax.random.split(key, 5)
    w1, b1 = fold_conv_bn(ks[0], c1, ch, 1)
    w2, b2 = fold_conv_bn(ks[1], c1, ch, 1)
    wm1, bm1 = fold_conv_bn(ks[2], ch, ch, 1)
    wm2, bm2 = fold_conv_bn(ks[3], ch, ch, 3)
    w3, b3 = fold_conv_bn(ks[4], 2 * ch, c2, 1)
    return {
        "w_cv1": w1[0, 0], "b_cv1": b1.reshape(1, -1),
        "w_cv2": w2[0, 0], "b_cv2": b2.reshape(1, -1),
        "w_m1": wm1[0, 0], "b_m1": bm1.reshape(1, -1),
        "w_m2": wm2,       "b_m2": bm2.reshape(1, -1),
        "w_cv3": w3[0, 0], "b_cv3": b3.reshape(1, -1),
    }


def c3_reference(x_nchw, params):
    """Pure-JAX f32 reference (independent of the kernel's tiling/halo/fusion tricks)."""
    def silu(v):
        return v * jax.nn.sigmoid(v)

    x = jnp.transpose(x_nchw, (0, 2, 3, 1)).astype(jnp.float32)

    def conv1x1(h, w, b):
        return silu(jnp.einsum('nhwc,cd->nhwd', h, w) + b.reshape(-1))

    y1 = conv1x1(x, params["w_cv1"], params["b_cv1"])
    y2 = conv1x1(x, params["w_cv2"], params["b_cv2"])
    t = conv1x1(y1, params["w_m1"], params["b_m1"])
    t2 = lax.conv_general_dilated(t, params["w_m2"], (1, 1), 'SAME',
                                  dimension_numbers=('NHWC', 'HWIO', 'NHWC'))
    m_out = y1 + silu(t2 + params["b_m2"].reshape(-1))
    cat = jnp.concatenate([m_out, y2], axis=-1)
    out = conv1x1(cat, params["w_cv3"], params["b_cv3"])
    return jnp.transpose(out, (0, 3, 1, 2))


if __name__ == "__main__":
    key = jax.random.PRNGKey(0)
    kx, kp = jax.random.split(key)
    N, C1, H, W = 2, 4, 16, 16
    C2 = 8                                   # hidden channels c_ = int(C2 * 0.5) = 4
    x = jax.random.normal(kx, (N, C1, H, W), jnp.float32)
    params = make_params(kp, C1, C2)

    ref = jax.block_until_ready(c3_reference(x, params))

    # Auto-tiled run (whole image fits -> single row tile, nh == 1 path).
    out = jax.block_until_ready(jax.jit(c3_forward)(x, params))
    assert out.shape == (N, C2, H, W)
    err1 = jnp.max(jnp.abs(out.astype(jnp.float32) - ref))
    assert jnp.allclose(out.astype(jnp.float32), ref, atol=3e-2, rtol=3e-2), \
        f"max abs err (nh=1) {err1}"

    # Multi-tile run exercising the halo recompute and pl.when border paths (nh == 4).
    out4 = jax.block_until_ready(
        jax.jit(functools.partial(c3_forward, tile_h=4))(x, params))
    err4 = jnp.max(jnp.abs(out4.astype(jnp.float32) - ref))
    assert jnp.allclose(out4.astype(jnp.float32), ref, atol=3e-2, rtol=3e-2), \
        f"max abs err (nh=4) {err4}"

    print("KERNEL_OK")
</pallas_src>

<mosaic_0001>
module attributes {stable_mosaic.version = 11 : i64} {
  func.func @_c3_kernel(%arg0: i32, %arg1: i32, %arg2: memref<1x16x16x4xbf16, #tpu.memory_space<vmem>>, %arg3: memref<1x1x16x4xbf16, #tpu.memory_space<vmem>>, %arg4: memref<1x1x16x4xbf16, #tpu.memory_space<vmem>>, %arg5: memref<4x8xbf16, #tpu.memory_space<vmem>>, %arg6: memref<1x8xf32, #tpu.memory_space<vmem>>, %arg7: memref<4x4xbf16, #tpu.memory_space<vmem>>, %arg8: memref<1x4xf32, #tpu.memory_space<vmem>>, %arg9: memref<9x4x4xbf16, #tpu.memory_space<vmem>>, %arg10: memref<1x4xf32, #tpu.memory_space<vmem>>, %arg11: memref<8x8xbf16, #tpu.memory_space<vmem>>, %arg12: memref<1x8xf32, #tpu.memory_space<vmem>>, %arg13: memref<1x16x16x8xf32, #tpu.memory_space<vmem>>, %arg14: memref<18x18x4xbf16, #tpu.memory_space<vmem>>) attributes {dimension_semantics = [#tpu.dimension_semantics<parallel>, #tpu.dimension_semantics<parallel>], iteration_bounds = array<i64: 2, 1>, scalar_prefetch = 0 : i64, scratch_operands = 1 : i64, tpu.core_type = #tpu.core_type<tc>, window_params = [{transform_indices = @transform_0, window_bounds = array<i64: 1, 16, 16, 4>}, {transform_indices = @transform_1, window_bounds = array<i64: 1, 1, 16, 4>}, {transform_indices = @transform_2, window_bounds = array<i64: 1, 1, 16, 4>}, {pipeline_mode = #tpu.pipeline_mode<synchronous>, transform_indices = @transform_3, window_bounds = array<i64: 4, 8>}, {pipeline_mode = #tpu.pipeline_mode<synchronous>, transform_indices = @transform_4, window_bounds = array<i64: 1, 8>}, {pipeline_mode = #tpu.pipeline_mode<synchronous>, transform_indices = @transform_5, window_bounds = array<i64: 4, 4>}, {pipeline_mode = #tpu.pipeline_mode<synchronous>, transform_indices = @transform_6, window_bounds = array<i64: 1, 4>}, {pipeline_mode = #tpu.pipeline_mode<synchronous>, transform_indices = @transform_7, window_bounds = array<i64: 9, 4, 4>}, {pipeline_mode = #tpu.pipeline_mode<synchronous>, transform_indices = @transform_8, window_bounds = array<i64: 1, 4>}, {pipeline_mode = #tpu.pipeline_mode<synchronous>, transform_indices = @transform_9, window_bounds = array<i64: 8, 8>}, {pipeline_mode = #tpu.pipeline_mode<synchronous>, transform_indices = @transform_10, window_bounds = array<i64: 1, 8>}, {transform_indices = @transform_11, window_bounds = array<i64: 1, 16, 16, 8>}]} {
    %c0 = arith.constant 0 : index
    %c0_0 = arith.constant 0 : index
    %c0_1 = arith.constant 0 : index
    %c0_2 = arith.constant 0 : index
    %0 = vector.load %arg2[%c0, %c0_0, %c0_1, %c0_2] : memref<1x16x16x4xbf16, #tpu.memory_space<vmem>>, vector<1x16x16x4xbf16>
    %1 = vector.shape_cast %0 : vector<1x16x16x4xbf16> to vector<256x4xbf16>
    %c0_3 = arith.constant 0 : index
    %c0_4 = arith.constant 0 : index
    %2 = vector.load %arg5[%c0_3, %c0_4] : memref<4x8xbf16, #tpu.memory_space<vmem>>, vector<4x8xbf16>
    %cst = arith.constant dense<0.000000e+00> : vector<256x8xf32>
    %3 = tpu.matmul %1, %2, %cst {dimension_numbers = #tpu.dot_dimension_numbers<[1], [0], [0], [1], [0, 0, 1, 1], [], []>} : vector<256x4xbf16>, vector<4x8xbf16>, vector<256x8xf32> -> vector<256x8xf32>
    %c0_5 = arith.constant 0 : index
    %c0_6 = arith.constant 0 : index
    %4 = vector.load %arg6[%c0_5, %c0_6] : memref<1x8xf32, #tpu.memory_space<vmem>>, vector<1x8xf32>
    %5 = vector.broadcast %4 : vector<1x8xf32> to vector<256x8xf32>
    %6 = arith.addf %3, %5 : vector<256x8xf32>
    %7 = arith.negf %6 : vector<256x8xf32>
    %8 = math.exp %7 : vector<256x8xf32>
    %cst_7 = arith.constant 1.000000e+00 : f32
    %9 = vector.broadcast %cst_7 : f32 to vector<256x8xf32>
    %10 = arith.addf %9, %8 : vector<256x8xf32>
    %11 = arith.divf %9, %10 : vector<256x8xf32>
    %12 = arith.mulf %6, %11 : vector<256x8xf32>
    %13 = arith.truncf %12 : vector<256x8xf32> to vector<256x8xbf16>
    %14 = vector.extract_strided_slice %13 {offsets = [0, 0], sizes = [256, 4], strides = [1, 1]} : vector<256x8xbf16> to vector<256x4xbf16>
    %c0_8 = arith.constant 0 : index
    %c0_9 = arith.constant 0 : index
    %15 = vector.load %arg7[%c0_8, %c0_9] : memref<4x4xbf16, #tpu.memory_space<vmem>>, vector<4x4xbf16>
    %cst_10 = arith.constant dense<0.000000e+00> : vector<256x4xf32>
    %16 = tpu.matmul %14, %15, %cst_10 {dimension_numbers = #tpu.dot_dimension_numbers<[1], [0], [0], [1], [0, 0, 1, 1], [], []>} : vector<256x4xbf16>, vector<4x4xbf16>, vector<256x4xf32> -> vector<256x4xf32>
    %c0_11 = arith.constant 0 : index
    %c0_12 = arith.constant 0 : index
    %17 = vector.load %arg8[%c0_11, %c0_12] : memref<1x4xf32, #tpu.memory_space<vmem>>, vector<1x4xf32>
    %18 = vector.broadcast %17 : vector<1x4xf32> to vector<256x4xf32>
    %19 = arith.addf %16, %18 : vector<256x4xf32>
    %20 = arith.negf %19 : vector<256x4xf32>
    %21 = math.exp %20 : vector<256x4xf32>
    %cst_13 = arith.constant 1.000000e+00 : f32
    %22 = vector.broadcast %cst_13 : f32 to vector<256x4xf32>
    %23 = arith.addf %22, %21 : vector<256x4xf32>
    %24 = arith.divf %22, %23 : vector<256x4xf32>
    %25 = arith.mulf %19, %24 : vector<256x4xf32>
    %cst_14 = arith.constant 0.000000e+00 : bf16
    %26 = vector.broadcast %cst_14 : bf16 to vector<18x1x4xbf16>
    %c0_15 = arith.constant 0 : index
    %c0_16 = arith.constant 0 : index
    %c0_17 = arith.constant 0 : index
    %27 = vector.load %arg14[%c0_15, %c0_16, %c0_17] : memref<18x18x4xbf16, #tpu.memory_space<vmem>>, vector<18x1x4xbf16>
    tpu.vector_store %arg14[%c0_15, %c0_16, %c0_17], %26 {strides = array<i32>} : memref<18x18x4xbf16, #tpu.memory_space<vmem>>, vector<18x1x4xbf16>,
    %cst_18 = arith.constant 0.000000e+00 : bf16
    %28 = vector.broadcast %cst_18 : bf16 to vector<18x1x4xbf16>
    %c0_19 = arith.constant 0 : index
    %c17 = arith.constant 17 : index
    %c0_20 = arith.constant 0 : index
    %29 = vector.load %arg14[%c0_19, %c17, %c0_20] : memref<18x18x4xbf16, #tpu.memory_space<vmem>>, vector<18x1x4xbf16>
    tpu.vector_store %arg14[%c0_19, %c17, %c0_20], %28 {strides = array<i32>} : memref<18x18x4xbf16, #tpu.memory_space<vmem>>, vector<18x1x4xbf16>,
    %c0_i32 = arith.constant 0 : i32
    %30 = arith.cmpi eq, %arg1, %c0_i32 : i32
    %31 = arith.extui %30 : i1 to i32
    %c0_i32_21 = arith.constant 0 : i32
    %32 = arith.cmpi ne, %31, %c0_i32_21 : i32
    scf.if %32 {
      %cst_79 = arith.constant 0.000000e+00 : bf16
      %123 = vector.broadcast %cst_79 : bf16 to vector<1x18x4xbf16>
      %c0_80 = arith.constant 0 : index
      %c0_81 = arith.constant 0 : index
      %c0_82 = arith.constant 0 : index
      %124 = vector.load %arg14[%c0_80, %c0_81, %c0_82] : memref<18x18x4xbf16, #tpu.memory_space<vmem>>, vector<1x18x4xbf16>
      tpu.vector_store %arg14[%c0_80, %c0_81, %c0_82], %123 {strides = array<i32>} : memref<18x18x4xbf16, #tpu.memory_space<vmem>>, vector<1x18x4xbf16>,
    } else {
    }
    %c0_i32_22 = arith.constant 0 : i32
    %33 = arith.cmpi eq, %arg1, %c0_i32_22 : i32
    %34 = arith.extui %33 : i1 to i32
    %c0_i32_23 = arith.constant 0 : i32
    %35 = arith.cmpi ne, %34, %c0_i32_23 : i32
    scf.if %35 {
      %cst_79 = arith.constant 0.000000e+00 : bf16
      %123 = vector.broadcast %cst_79 : bf16 to vector<1x18x4xbf16>
      %c17_80 = arith.constant 17 : index
      %c0_81 = arith.constant 0 : index
      %c0_82 = arith.constant 0 : index
      %124 = vector.load %arg14[%c17_80, %c0_81, %c0_82] : memref<18x18x4xbf16, #tpu.memory_space<vmem>>, vector<1x18x4xbf16>
      tpu.vector_store %arg14[%c17_80, %c0_81, %c0_82], %123 {strides = array<i32>} : memref<18x18x4xbf16, #tpu.memory_space<vmem>>, vector<1x18x4xbf16>,
    } else {
    }
    %36 = arith.truncf %25 : vector<256x4xf32> to vector<256x4xbf16>
    %37 = vector.shape_cast %36 : vector<256x4xbf16> to vector<16x16x4xbf16>
    %c1 = arith.constant 1 : index
    %c1_24 = arith.constant 1 : index
    %c0_25 = arith.constant 0 : index
    %38 = vector.load %arg14[%c1, %c1_24, %c0_25] : memref<18x18x4xbf16, #tpu.memory_space<vmem>>, vector<16x16x4xbf16>
    tpu.vector_store %arg14[%c1, %c1_24, %c0_25], %37 {strides = array<i32>} : memref<18x18x4xbf16, #tpu.memory_space<vmem>>, vector<16x16x4xbf16>,
    %cst_26 = arith.constant 0.000000e+00 : f32
    %39 = vector.broadcast %cst_26 : f32 to vector<256x4xf32>
    %c0_27 = arith.constant 0 : index
    %c0_28 = arith.constant 0 : index
    %c0_29 = arith.constant 0 : index
    %40 = vector.load %arg14[%c0_27, %c0_28, %c0_29] : memref<18x18x4xbf16, #tpu.memory_space<vmem>>, vector<16x18x4xbf16>
    %41 = vector.extract_strided_slice %40 {offsets = [0, 0, 0], sizes = [16, 16, 4], strides = [1, 1, 1]} : vector<16x18x4xbf16> to vector<16x16x4xbf16>
    %42 = vector.shape_cast %41 : vector<16x16x4xbf16> to vector<256x4xbf16>
    %c0_30 = arith.constant 0 : index
    %c0_31 = arith.constant 0 : index
    %c0_32 = arith.constant 0 : index
    %43 = vector.load %arg9[%c0_30, %c0_31, %c0_32] : memref<9x4x4xbf16, #tpu.memory_space<vmem>>, vector<1x4x4xbf16>
    %44 = vector.shape_cast %43 : vector<1x4x4xbf16> to vector<4x4xbf16>
    %cst_33 = arith.constant dense<0.000000e+00> : vector<256x4xf32>
    %45 = tpu.matmul %42, %44, %cst_33 {dimension_numbers = #tpu.dot_dimension_numbers<[1], [0], [0], [1], [0, 0, 1, 1], [], []>} : vector<256x4xbf16>, vector<4x4xbf16>, vector<256x4xf32> -> vector<256x4xf32>
    %46 = arith.addf %39, %45 : vector<256x4xf32>
    %47 = vector.extract_strided_slice %40 {offsets = [0, 1, 0], sizes = [16, 16, 4], strides = [1, 1, 1]} : vector<16x18x4xbf16> to vector<16x16x4xbf16>
    %48 = vector.shape_cast %47 : vector<16x16x4xbf16> to vector<256x4xbf16>
    %c1_34 = arith.constant 1 : index
    %c0_35 = arith.constant 0 : index
    %c0_36 = arith.constant 0 : index
    %49 = vector.load %arg9[%c1_34, %c0_35, %c0_36] : memref<9x4x4xbf16, #tpu.memory_space<vmem>>, vector<1x4x4xbf16>
    %50 = vector.shape_cast %49 : vector<1x4x4xbf16> to vector<4x4xbf16>
    %cst_37 = arith.constant dense<0.000000e+00> : vector<256x4xf32>
    %51 = tpu.matmul %48, %50, %cst_37 {dimension_numbers = #tpu.dot_dimension_numbers<[1], [0], [0], [1], [0, 0, 1, 1], [], []>} : vector<256x4xbf16>, vector<4x4xbf16>, vector<256x4xf32> -> vector<256x4xf32>
    %52 = arith.addf %46, %51 : vector<256x4xf32>
    %53 = vector.extract_strided_slice %40 {offsets = [0, 2, 0], sizes = [16, 16, 4], strides = [1, 1, 1]} : vector<16x18x4xbf16> to vector<16x16x4xbf16>
    %54 = vector.shape_cast %53 : vector<16x16x4xbf16> to vector<256x4xbf16>
    %c2 = arith.constant 2 : index
    %c0_38 = arith.constant 0 : index
    %c0_39 = arith.constant 0 : index
    %55 = vector.load %arg9[%c2, %c0_38, %c0_39] : memref<9x4x4xbf16, #tpu.memory_space<vmem>>, vector<1x4x4xbf16>
    %56 = vector.shape_cast %55 : vector<1x4x4xbf16> to vector<4x4xbf16>
    %cst_40 = arith.constant dense<0.000000e+00> : vector<256x4xf32>
    %57 = tpu.matmul %54, %56, %cst_40 {dimension_numbers = #tpu.dot_dimension_numbers<[1], [0], [0], [1], [0, 0, 1, 1], [], []>} : vector<256x4xbf16>, vector<4x4xbf16>, vector<256x4xf32> -> vector<256x4xf32>
    %58 = arith.addf %52, %57 : vector<256x4xf32>
    %c1_41 = arith.constant 1 : index
    %c0_42 = arith.constant 0 : index
    %c0_43 = arith.constant 0 : index
    %59 = vector.load %arg14[%c1_41, %c0_42, %c0_43] : memref<18x18x4xbf16, #tpu.memory_space<vmem>>, vector<16x18x4xbf16>
    %60 = vector.extract_strided_slice %59 {offsets = [0, 0, 0], sizes = [16, 16, 4], strides = [1, 1, 1]} : vector<16x18x4xbf16> to vector<16x16x4xbf16>
    %61 = vector.shape_cast %60 : vector<16x16x4xbf16> to vector<256x4xbf16>
    %c3 = arith.constant 3 : index
    %c0_44 = arith.constant 0 : index
    %c0_45 = arith.constant 0 : index
    %62 = vector.load %arg9[%c3, %c0_44, %c0_45] : memref<9x4x4xbf16, #tpu.memory_space<vmem>>, vector<1x4x4xbf16>
    %63 = vector.shape_cast %62 : vector<1x4x4xbf16> to vector<4x4xbf16>
    %cst_46 = arith.constant dense<0.000000e+00> : vector<256x4xf32>
    %64 = tpu.matmul %61, %63, %cst_46 {dimension_numbers = #tpu.dot_dimension_numbers<[1], [0], [0], [1], [0, 0, 1, 1], [], []>} : vector<256x4xbf16>, vector<4x4xbf16>, vector<256x4xf32> -> vector<256x4xf32>
    %65 = arith.addf %58, %64 : vector<256x4xf32>
    %66 = vector.extract_strided_slice %59 {offsets = [0, 1, 0], sizes = [16, 16, 4], strides = [1, 1, 1]} : vector<16x18x4xbf16> to vector<16x16x4xbf16>
    %67 = vector.shape_cast %66 : vector<16x16x4xbf16> to vector<256x4xbf16>
    %c4 = arith.constant 4 : index
    %c0_47 = arith.constant 0 : index
    %c0_48 = arith.constant 0 : index
    %68 = vector.load %arg9[%c4, %c0_47, %c0_48] : memref<9x4x4xbf16, #tpu.memory_space<vmem>>, vector<1x4x4xbf16>
    %69 = vector.shape_cast %68 : vector<1x4x4xbf16> to vector<4x4xbf16>
    %cst_49 = arith.constant dense<0.000000e+00> : vector<256x4xf32>
    %70 = tpu.matmul %67, %69, %cst_49 {dimension_numbers = #tpu.dot_dimension_numbers<[1], [0], [0], [1], [0, 0, 1, 1], [], []>} : vector<256x4xbf16>, vector<4x4xbf16>, vector<256x4xf32> -> vector<256x4xf32>
    %71 = arith.addf %65, %70 : vector<256x4xf32>
    %72 = vector.extract_strided_slice %59 {offsets = [0, 2, 0], sizes = [16, 16, 4], strides = [1, 1, 1]} : vector<16x18x4xbf16> to vector<16x16x4xbf16>
    %73 = vector.shape_cast %72 : vector<16x16x4xbf16> to vector<256x4xbf16>
    %c5 = arith.constant 5 : index
    %c0_50 = arith.constant 0 : index
    %c0_51 = arith.constant 0 : index
    %74 = vector.load %arg9[%c5, %c0_50, %c0_51] : memref<9x4x4xbf16, #tpu.memory_space<vmem>>, vector<1x4x4xbf16>
    %75 = vector.shape_cast %74 : vector<1x4x4xbf16> to vector<4x4xbf16>
    %cst_52 = arith.constant dense<0.000000e+00> : vector<256x4xf32>
    %76 = tpu.matmul %73, %75, %cst_52 {dimension_numbers = #tpu.dot_dimension_numbers<[1], [0], [0], [1], [0, 0, 1, 1], [], []>} : vector<256x4xbf16>, vector<4x4xbf16>, vector<256x4xf32> -> vector<256x4xf32>
    %77 = arith.addf %71, %76 : vector<256x4xf32>
    %c2_53 = arith.constant 2 : index
    %c0_54 = arith.constant 0 : index
    %c0_55 = arith.constant 0 : index
    %78 = vector.load %arg14[%c2_53, %c0_54, %c0_55] : memref<18x18x4xbf16, #tpu.memory_space<vmem>>, vector<16x18x4xbf16>
    %79 = vector.extract_strided_slice %78 {offsets = [0, 0, 0], sizes = [16, 16, 4], strides = [1, 1, 1]} : vector<16x18x4xbf16> to vector<16x16x4xbf16>
    %80 = vector.shape_cast %79 : vector<16x16x4xbf16> to vector<256x4xbf16>
    %c6 = arith.constant 6 : index
    %c0_56 = arith.constant 0 : index
    %c0_57 = arith.constant 0 : index
    %81 = vector.load %arg9[%c6, %c0_56, %c0_57] : memref<9x4x4xbf16, #tpu.memory_space<vmem>>, vector<1x4x4xbf16>
    %82 = vector.shape_cast %81 : vector<1x4x4xbf16> to vector<4x4xbf16>
    %cst_58 = arith.constant dense<0.000000e+00> : vector<256x4xf32>
    %83 = tpu.matmul %80, %82, %cst_58 {dimension_numbers = #tpu.dot_dimension_numbers<[1], [0], [0], [1], [0, 0, 1, 1], [], []>} : vector<256x4xbf16>, vector<4x4xbf16>, vector<256x4xf32> -> vector<256x4xf32>
    %84 = arith.addf %77, %83 : vector<256x4xf32>
    %85 = vector.extract_strided_slice %78 {offsets = [0, 1, 0], sizes = [16, 16, 4], strides = [1, 1, 1]} : vector<16x18x4xbf16> to vector<16x16x4xbf16>
    %86 = vector.shape_cast %85 : vector<16x16x4xbf16> to vector<256x4xbf16>
    %c7 = arith.constant 7 : index
    %c0_59 = arith.constant 0 : index
    %c0_60 = arith.constant 0 : index
    %87 = vector.load %arg9[%c7, %c0_59, %c0_60] : memref<9x4x4xbf16, #tpu.memory_space<vmem>>, vector<1x4x4xbf16>
    %88 = vector.shape_cast %87 : vector<1x4x4xbf16> to vector<4x4xbf16>
    %cst_61 = arith.constant dense<0.000000e+00> : vector<256x4xf32>
    %89 = tpu.matmul %86, %88, %cst_61 {dimension_numbers = #tpu.dot_dimension_numbers<[1], [0], [0], [1], [0, 0, 1, 1], [], []>} : vector<256x4xbf16>, vector<4x4xbf16>, vector<256x4xf32> -> vector<256x4xf32>
    %90 = arith.addf %84, %89 : vector<256x4xf32>
    %91 = vector.extract_strided_slice %78 {offsets = [0, 2, 0], sizes = [16, 16, 4], strides = [1, 1, 1]} : vector<16x18x4xbf16> to vector<16x16x4xbf16>
    %92 = vector.shape_cast %91 : vector<16x16x4xbf16> to vector<256x4xbf16>
    %c8 = arith.constant 8 : index
    %c0_62 = arith.constant 0 : index
    %c0_63 = arith.constant 0 : index
    %93 = vector.load %arg9[%c8, %c0_62, %c0_63] : memref<9x4x4xbf16, #tpu.memory_space<vmem>>, vector<1x4x4xbf16>
    %94 = vector.shape_cast %93 : vector<1x4x4xbf16> to vector<4x4xbf16>
    %cst_64 = arith.constant dense<0.000000e+00> : vector<256x4xf32>
    %95 = tpu.matmul %92, %94, %cst_64 {dimension_numbers = #tpu.dot_dimension_numbers<[1], [0], [0], [1], [0, 0, 1, 1], [], []>} : vector<256x4xbf16>, vector<4x4xbf16>, vector<256x4xf32> -> vector<256x4xf32>
    %96 = arith.addf %90, %95 : vector<256x4xf32>
    %c0_65 = arith.constant 0 : index
    %c0_66 = arith.constant 0 : index
    %97 = vector.load %arg10[%c0_65, %c0_66] : memref<1x4xf32, #tpu.memory_space<vmem>>, vector<1x4xf32>
    %98 = vector.broadcast %97 : vector<1x4xf32> to vector<256x4xf32>
    %99 = arith.addf %96, %98 : vector<256x4xf32>
    %100 = arith.negf %99 : vector<256x4xf32>
    %101 = math.exp %100 : vector<256x4xf32>
    %cst_67 = arith.constant 1.000000e+00 : f32
    %102 = vector.broadcast %cst_67 : f32 to vector<256x4xf32>
    %103 = arith.addf %102, %101 : vector<256x4xf32>
    %104 = arith.divf %102, %103 : vector<256x4xf32>
    %105 = arith.mulf %99, %104 : vector<256x4xf32>
    %106 = arith.truncf %105 : vector<256x4xf32> to vector<256x4xbf16>
    %c0_68 = arith.constant 0 : index
    %c0_69 = arith.constant 0 : index
    %107 = vector.load %arg11[%c0_68, %c0_69] : memref<8x8xbf16, #tpu.memory_space<vmem>>, vector<8x8xbf16>
    %cst_70 = arith.constant dense<0.000000e+00> : vector<256x8xf32>
    %108 = tpu.matmul %13, %107, %cst_70 {dimension_numbers = #tpu.dot_dimension_numbers<[1], [0], [0], [1], [0, 0, 1, 1], [], []>} : vector<256x8xbf16>, vector<8x8xbf16>, vector<256x8xf32> -> vector<256x8xf32>
    %109 = vector.extract_strided_slice %107 {offsets = [0, 0], sizes = [4, 8], strides = [1, 1]} : vector<8x8xbf16> to vector<4x8xbf16>
    %cst_71 = arith.constant dense<0.000000e+00> : vector<256x8xf32>
    %110 = tpu.matmul %106, %109, %cst_71 {dimension_numbers = #tpu.dot_dimension_numbers<[1], [0], [0], [1], [0, 0, 1, 1], [], []>} : vector<256x4xbf16>, vector<4x8xbf16>, vector<256x8xf32> -> vector<256x8xf32>
    %111 = arith.addf %108, %110 : vector<256x8xf32>
    %c0_72 = arith.constant 0 : index
    %c0_73 = arith.constant 0 : index
    %112 = vector.load %arg12[%c0_72, %c0_73] : memref<1x8xf32, #tpu.memory_space<vmem>>, vector<1x8xf32>
    %113 = vector.broadcast %112 : vector<1x8xf32> to vector<256x8xf32>
    %114 = arith.addf %111, %113 : vector<256x8xf32>
    %115 = arith.negf %114 : vector<256x8xf32>
    %116 = math.exp %115 : vector<256x8xf32>
    %cst_74 = arith.constant 1.000000e+00 : f32
    %117 = vector.broadcast %cst_74 : f32 to vector<256x8xf32>
    %118 = arith.addf %117, %116 : vector<256x8xf32>
    %119 = arith.divf %117, %118 : vector<256x8xf32>
    %120 = arith.mulf %114, %119 : vector<256x8xf32>
    %121 = vector.shape_cast %120 : vector<256x8xf32> to vector<1x16x16x8xf32>
    %c0_75 = arith.constant 0 : index
    %c0_76 = arith.constant 0 : index
    %c0_77 = arith.constant 0 : index
    %c0_78 = arith.constant 0 : index
    %122 = vector.load %arg13[%c0_75, %c0_76, %c0_77, %c0_78] : memref<1x16x16x8xf32, #tpu.memory_space<vmem>>, vector<1x16x16x8xf32>
    tpu.vector_store %arg13[%c0_75, %c0_76, %c0_77, %c0_78], %121 {strides = array<i32>} : memref<1x16x16x8xf32, #tpu.memory_space<vmem>>, vector<1x16x16x8xf32>,
    return
  }
  func.func @transform_0(%arg0: i32, %arg1: i32) -> (i32, i32, i32, i32) {
    %c0_i32 = arith.constant 0 : i32
    %c0_i32_0 = arith.constant 0 : i32
    %c0_i32_1 = arith.constant 0 : i32
    return %arg0, %arg1, %c0_i32, %c0_i32_0 : i32, i32, i32, i32
  }
  func.func @transform_1(%arg0: i32, %arg1: i32) -> (i32, i32, i32, i32) {
    %c16_i32 = arith.constant 16 : i32
    %0 = arith.muli %arg1, %c16_i32 : i32
    %c1_i32 = arith.constant 1 : i32
    %1 = arith.subi %0, %c1_i32 : i32
    %c0_i32 = arith.constant 0 : i32
    %2 = arith.maxsi %1, %c0_i32 : i32
    %c0_i32_0 = arith.constant 0 : i32
    %c0_i32_1 = arith.constant 0 : i32
    %c0_i32_2 = arith.constant 0 : i32
    return %arg0, %2, %c0_i32_0, %c0_i32_1 : i32, i32, i32, i32
  }
  func.func @transform_2(%arg0: i32, %arg1: i32) -> (i32, i32, i32, i32) {
    %c16_i32 = arith.constant 16 : i32
    %0 = arith.muli %arg1, %c16_i32 : i32
    %c16_i32_0 = arith.constant 16 : i32
    %1 = arith.addi %0, %c16_i32_0 : i32
    %c15_i32 = arith.constant 15 : i32
    %2 = arith.minsi %1, %c15_i32 : i32
    %c0_i32 = arith.constant 0 : i32
    %c0_i32_1 = arith.constant 0 : i32
    %c0_i32_2 = arith.constant 0 : i32
    return %arg0, %2, %c0_i32, %c0_i32_1 : i32, i32, i32, i32
  }
  func.func @transform_3(%arg0: i32, %arg1: i32) -> (i32, i32) {
    %c0_i32 = arith.constant 0 : i32
    %c0_i32_0 = arith.constant 0 : i32
    %c0_i32_1 = arith.constant 0 : i32
    return %c0_i32, %c0_i32_0 : i32, i32
  }
  func.func @transform_4(%arg0: i32, %arg1: i32) -> (i32, i32) {
    %c0_i32 = arith.constant 0 : i32
    %c0_i32_0 = arith.constant 0 : i32
    %c0_i32_1 = arith.constant 0 : i32
    return %c0_i32, %c0_i32_0 : i32, i32
  }
  func.func @transform_5(%arg0: i32, %arg1: i32) -> (i32, i32) {
    %c0_i32 = arith.constant 0 : i32
    %c0_i32_0 = arith.constant 0 : i32
    %c0_i32_1 = arith.constant 0 : i32
    return %c0_i32, %c0_i32_0 : i32, i32
  }
  func.func @transform_6(%arg0: i32, %arg1: i32) -> (i32, i32) {
    %c0_i32 = arith.constant 0 : i32
    %c0_i32_0 = arith.constant 0 : i32
    %c0_i32_1 = arith.constant 0 : i32
    return %c0_i32, %c0_i32_0 : i32, i32
  }
  func.func @transform_7(%arg0: i32, %arg1: i32) -> (i32, i32, i32) {
    %c0_i32 = arith.constant 0 : i32
    %c0_i32_0 = arith.constant 0 : i32
    %c0_i32_1 = arith.constant 0 : i32
    %c0_i32_2 = arith.constant 0 : i32
    return %c0_i32, %c0_i32_0, %c0_i32_1 : i32, i32, i32
  }
  func.func @transform_8(%arg0: i32, %arg1: i32) -> (i32, i32) {
    %c0_i32 = arith.constant 0 : i32
    %c0_i32_0 = arith.constant 0 : i32
    %c0_i32_1 = arith.constant 0 : i32
    return %c0_i32, %c0_i32_0 : i32, i32
  }
  func.func @transform_9(%arg0: i32, %arg1: i32) -> (i32, i32) {
    %c0_i32 = arith.constant 0 : i32
    %c0_i32_0 = arith.constant 0 : i32
    %c0_i32_1 = arith.constant 0 : i32
    return %c0_i32, %c0_i32_0 : i32, i32
  }
  func.func @transform_10(%arg0: i32, %arg1: i32) -> (i32, i32) {
    %c0_i32 = arith.constant 0 : i32
    %c0_i32_0 = arith.constant 0 : i32
    %c0_i32_1 = arith.constant 0 : i32
    return %c0_i32, %c0_i32_0 : i32, i32
  }
  func.func @transform_11(%arg0: i32, %arg1: i32) -> (i32, i32, i32, i32) {
    %c0_i32 = arith.constant 0 : i32
    %c0_i32_0 = arith.constant 0 : i32
    %c0_i32_1 = arith.constant 0 : i32
    return %arg0, %arg1, %c0_i32, %c0_i32_0 : i32, i32, i32, i32
  }
}

</mosaic_0001>

<bundles_post_ra>
// kernel: c3_forward.1
= control target key start
LH: loop header
LB: loop body
LE: loop exit
PB: predicated region body
PF: predicated region fallthrough
CT: control target
= control target key end

     0   :  { %s10042_s15 = smov 0   ;;  %s10044_s16 = smov 0   ;;  %s12967_s0 = inlined_call_operand.vmem [shape: bf16[2,16,16,4], index: 0, kind: input, shape index: {}, may-alias: {0,1,2}]   ;;  %s12968_s1 = inlined_call_operand.vmem [shape: bf16[2,16,16,4], index: 1, kind: input, shape index: {}, may-alias: {0,1,2}]   ;;  %s12969_s2 = inlined_call_operand.vmem [shape: bf16[2,16,16,4], index: 2, kind: input, shape index: {}, may-alias: {0,1,2}]   ;;  %s12970_s3 = inlined_call_operand.vmem [shape: bf16[4,8], index: 3, kind: input, shape index: {}]   ;;  %s12971_s4 = inlined_call_operand.vmem [shape: f32[1,8], index: 4, kind: input, shape index: {}]   ;;  %s12972_s5 = inlined_call_operand.vmem [shape: bf16[4,4], index: 5, kind: input, shape index: {}]   ;;  %s12973_s6 = inlined_call_operand.vmem [shape: f32[1,4], index: 6, kind: input, shape index: {}]   ;;  %s12974_s7 = inlined_call_operand.vmem [shape: bf16[9,4,4], index: 7, kind: input, shape index: {}]   ;;  %s12975_s8 = inlined_call_operand.vmem [shape: f32[1,4], index: 8, kind: input, shape index: {}]   ;;  %s12976_s9 = inlined_call_operand.vmem [shape: bf16[8,8], index: 9, kind: input, shape index: {}]   ;;  %s12977_s10 = inlined_call_operand.vmem [shape: f32[1,8], index: 10, kind: input, shape index: {}]   ;;  %s12978_s11 = inlined_call_operand.vmem [shape: f32[2,16,16,8], index: 11, kind: output, shape index: {}]  }
   0x1   :  { %s10046_s17 = smov 0  }
   0x2 LB: > { %s33_s18 = sadd.s32 1, %s9975_s16  ;;  %p7724_p0 = scmp.ge.s32.totalorder %s9979_s17, 1  ;;  %s9979_s17 = sphi %s10046_s17, %s21_s17   ;;  %s9975_s16 = sphi %s10044_s16, %s13297_s16   ;;  %s9971_s15 = sphi %s10042_s15, %s13296_s15  }
   0x3   : > { %p35_p1 = scmp.ge.s32.totalorder %s33_s18, 2  ;;  %p423_p2 = scmp.lt.s32.totalorder %s9979_s17, 3 }
   0x5   : > { %s13299_s18 = smov (%p35_p1, %s33_s18), 0  ;;  %p424_p3 = pnand %p7724_p0, %p423_p2 }
   0x7   : > { %427 = sbr.rel (%p424_p3) target bundleno = 1598 (0x63e), region = 64 }
   0xe   : > { %v588_v0 = vld [vmem:[%s12970_s3] sm:$0x3]  ;;  %vm725_vm0 = vcmask 1041408   ;;  %p500_p4 = scmp.lt.s32.totalorder %s9971_s15, 1  ;;  %vm676_vm1 = vcmask 31744   ;;  %vm1574_vm2 = vcmask 24576  }
   0xf   : > { %9306 = vmatprep.subr.msk.bf16.mxu1 %vm725_vm0, %v588_v0  ;;  %v727_v1 = vsel %vm725_vm0, %v588_v0, 0  ;;  %v1130_v2 = vld [vmem:[%s12972_s5] sm:$0x3]  ;;  %vm1575_vm3 = vsmask.f32 256  ;;  %vm1691_vm7 = vcmask 27648  }
  0x10   : > { %8575 = vmatpush3.bf16.msra.mxu1 %v727_v1  ;;  %s13301_s15 = smov (!%p500_p4, %s9971_s15), 1  ;;  %v1187_v5 = vsel %vm725_vm0, %v1130_v2, 0  ;;  %v10113_v20 = vld [vmem:[%s12971_s4] ss:$0 sm:$0xff]  ;;  %vm10341_vm4 = vmand %vm1574_vm2, %vm1575_vm3  ;;  %vm1631_vm5 = vsmask.f32 7938 }
  0x11   : > { %9307 = vmatprep.subr.msk.bf16.mxu1 %vm725_vm0, %v1130_v2  ;;  %s8319_s23 = sshll.u32 %s13301_s15, 7  ;;  %vm10351_vm6 = vmand %vm1574_vm2, %vm1631_vm5  ;;  %vm3240_vm8 = vcmask 1042432   ;;  %vm3241_vm9 = vcmask 1046532   ;;  %vm2283_vm11 = vsmask.f32 3328  ;;  %s8320_s27 = sshll.u32 %s13301_s15, 8 }
  0x12   : > { %s10075_s26 = scalar_lea.vmem %s12967_s0, %s8319_s23  ;;  %vm10410_vm10 = vmor %vm3240_vm8, %vm3241_vm9  ;;  %vm2284_vm12 = vsmask.f32 7440  ;;  %vm1796_vm14 = vsmask.f32 4368  ;;  %s12790_s1 = scalar_lea.vmem %s12978_s11, %s8320_s27 }
  0x13   : > { %v9345_v3 = vld [vmem:[%s10075_s26] sm:$0xff]   ;;  %v9346_v4 = vld [vmem:[%s10075_s26 + $0x8] sm:$0xff]   ;;  %v9347_v6 = vld [vmem:[%s10075_s26 + $0x10] sm:$0xff]  }
  0x14   : > { %8576 = vmatprep.mubr.msk.bf16.mxu1 %vm676_vm1, %v9345_v3  ;;  %v9348_v7 = vld [vmem:[%s10075_s26 + $0x18] sm:$0xff]   ;;  %v9349_v8 = vld [vmem:[%s10075_s26 + $0x20] sm:$0xff]   ;;  %v9350_v9 = vld [vmem:[%s10075_s26 + $0x28] sm:$0xff]  }
  0x15   : > { %8577 = vmatmul.mubr.msk.bf16.vlgmr.msra.gmra.mrb[0].mxu1 %vm676_vm1, %v9346_v4  ;;  %v9351_v10 = vld [vmem:[%s10075_s26 + $0x30] sm:$0xff]   ;;  %v9352_v11 = vld [vmem:[%s10075_s26 + $0x38] sm:$0xff]   ;;  %v9353_v12 = vld [vmem:[%s10075_s26 + $0x40] sm:$0xff]  }
  0x16   : > { %8580 = vmatprep.mubr.msk.bf16.mxu1 %vm676_vm1, %v9347_v6  ;;  %8609 = vmatpush3.bf16.msra.mxu1 %v1187_v5  ;;  %v9354_v13 = vld [vmem:[%s10075_s26 + $0x48] sm:$0xff]   ;;  %v9355_v14 = vld [vmem:[%s10075_s26 + $0x50] sm:$0xff]   ;;  %v9356_v15 = vld [vmem:[%s10075_s26 + $0x58] sm:$0xff]  }
  0x17   : > { %v9357_v16 = vld [vmem:[%s10075_s26 + $0x60] sm:$0xff]   ;;  %v9358_v17 = vld [vmem:[%s10075_s26 + $0x68] sm:$0xff]   ;;  %v9359_v18 = vld [vmem:[%s10075_s26 + $0x70] sm:$0xff]  }
  0x18   : > { %v9360_v19 = vld [vmem:[%s10075_s26 + $0x78] sm:$0xff]   ;;  %vm10435_vm13 = vmor %vm2283_vm11, %vm2284_vm12 }
  0x19   : > { %vm10552_vm15 = vmand %vm1691_vm7, %vm1631_vm5 }
  0x1a   : > { %vm10563_vm5 = vmor %vm1575_vm3, %vm1796_vm14 }
  0x1d   : > { %8581 = vmatmul.mubr.msk.bf16.gmra.mrb[4].mxu1 %vm676_vm1, %v9348_v7 }
  0x1e   : > { %8584 = vmatprep.mubr.msk.bf16.mxu1 %vm676_vm1, %v9349_v8 }
  0x25   : > { %8585 = vmatmul.mubr.msk.bf16.gmra.mrb[8].mxu1 %vm676_vm1, %v9350_v9 }
  0x26   : > { %8588 = vmatprep.mubr.msk.bf16.mxu1 %vm676_vm1, %v9351_v10 }
  0x2d   : > { %8589 = vmatmul.mubr.msk.bf16.gmra.mrb[12].mxu1 %vm676_vm1, %v9352_v11 }
  0x2e   : > { %8592 = vmatprep.mubr.msk.bf16.mxu1 %vm676_vm1, %v9353_v12 }
  0x35   : > { %8593 = vmatmul.mubr.msk.bf16.gmra.mrb[16].mxu1 %vm676_vm1, %v9354_v13 }
  0x36   : > { %8596 = vmatprep.mubr.msk.bf16.mxu1 %vm676_vm1, %v9355_v14 }
  0x3d   : > { %8597 = vmatmul.mubr.msk.bf16.gmra.mrb[20].mxu1 %vm676_vm1, %v9356_v15 }
  0x3e   : > { %8600 = vmatprep.mubr.msk.bf16.mxu1 %vm676_vm1, %v9357_v16 }
  0x45   : > { %8601 = vmatmul.mubr.msk.bf16.gmra.mrb[24].mxu1 %vm676_vm1, %v9358_v17 }
  0x46   : > { %8604 = vmatprep.mubr.msk.bf16.mxu1 %vm676_vm1, %v9359_v18 }
  0x4d   : > { %8605 = vmatmul.mubr.msk.bf16.gmra.mrb[28].mxu1 %vm676_vm1, %v9360_v19 }
  0xe8   : > { %v8578_v21 = vpop.f32.mrb[0].mxu1 }
  0xe9   : > { %v10116_v22 = vadd.f32 %v8578_v21, %v10113_v20  ;;  %v763_v23 = vpop.f32.mrb[1].mxu1 }
  0xea   : > { %v10119_v24 = vadd.f32 %v10113_v20, %v763_v23  ;;  %v8579_v25 = vpop.f32.mrb[2].mxu1 }
  0xeb   : > { %v7764_v26 = vmul.f32 -1.442695, %v10116_v22  ;;  %v10123_v27 = vadd.f32 %v8579_v25, %v10113_v20  ;;  %v766_v28 = vpop.f32.mrb[3].mxu1 }
  0xec   : > { %v7762_v29 = vmul.f32 -1.442695, %v10119_v24  ;;  %v10127_v30 = vadd.f32 %v10113_v20, %v766_v28 }
  0xed   : > { %9407 = vpow2.f32 %v7764_v26  ;;  %v7765_v31 = vmul.f32 -1.442695, %v10123_v27 }
  0xee   : > { %9409 = vpow2.f32 %v7762_v29  ;;  %v7763_v32 = vmul.f32 -1.442695, %v10127_v30 }
  0xef   : > { %9411 = vpow2.f32 %v7765_v31 }
  0xf0   : > { %9413 = vpow2.f32 %v7763_v32  ;;  %v8582_v33 = vpop.f32.mrb[4].mxu1 }
  0xf1   : > { %v10132_v34 = vadd.f32 %v8582_v33, %v10113_v20  ;;  %v779_v35 = vpop.f32.mrb[5].mxu1 }
  0xf2   : > { %v10135_v36 = vadd.f32 %v10113_v20, %v779_v35  ;;  %v8583_v37 = vpop.f32.mrb[6].mxu1 }
  0xf3   : > { %v7768_v38 = vmul.f32 -1.442695, %v10132_v34  ;;  %v10139_v39 = vadd.f32 %v8583_v37, %v10113_v20  ;;  %v782_v40 = vpop.f32.mrb[7].mxu1 }
  0xf4   : > { %v7766_v41 = vmul.f32 -1.442695, %v10135_v36  ;;  %v10143_v42 = vadd.f32 %v10113_v20, %v782_v40 }
  0xf5   : > { %9415 = vpow2.f32 %v7768_v38  ;;  %v7769_v43 = vmul.f32 -1.442695, %v10139_v39 }
  0xf6   : > { %9417 = vpow2.f32 %v7766_v41  ;;  %v7767_v44 = vmul.f32 -1.442695, %v10143_v42 }
  0xf7   : > { %v9408_v45 = vpop.eup %9407  ;;  %9419 = vpow2.f32 %v7769_v43 }
  0xf8   : > { %v9410_v46 = vpop.eup %9409  ;;  %v988_v47 = vadd.f32 1.0, %v9408_v45  ;;  %9421 = vpow2.f32 %v7767_v44  ;;  %v8586_v48 = vpop.f32.mrb[8].mxu1 }
  0xf9   : > { %v9412_v49 = vpop.eup %9411  ;;  %v986_v50 = vadd.f32 1.0, %v9410_v46  ;;  %v10148_v51 = vadd.f32 %v8586_v48, %v10113_v20  ;;  %v795_v52 = vpop.f32.mrb[9].mxu1 }
  0xfa   : > { %v9414_v53 = vpop.eup %9413  ;;  %9423 = vrcp.f32 %v988_v47  ;;  %v989_v54 = vadd.f32 1.0, %v9412_v49  ;;  %v10151_v55 = vadd.f32 %v10113_v20, %v795_v52  ;;  %v8587_v56 = vpop.f32.mrb[10].mxu1 }
  0xfb   : > { %9425 = vrcp.f32 %v986_v50  ;;  %v987_v57 = vadd.f32 1.0, %v9414_v53  ;;  %v7772_v58 = vmul.f32 -1.442695, %v10148_v51  ;;  %v10155_v59 = vadd.f32 %v8587_v56, %v10113_v20  ;;  %v798_v60 = vpop.f32.mrb[11].mxu1 }
  0xfc   : > { %9427 = vrcp.f32 %v989_v54  ;;  %v7770_v61 = vmul.f32 -1.442695, %v10151_v55  ;;  %v10159_v62 = vadd.f32 %v10113_v20, %v798_v60 }
  0xfd   : > { %9429 = vrcp.f32 %v987_v57  ;;  %v7773_v63 = vmul.f32 -1.442695, %v10155_v59 }
  0xfe   : > { %9431 = vpow2.f32 %v7772_v58  ;;  %v7771_v0 = vmul.f32 -1.442695, %v10159_v62 }
  0xff   : > { %v9416_v1 = vpop.eup %9415  ;;  %9433 = vpow2.f32 %v7770_v61 }
 0x100   : > { %v9418_v2 = vpop.eup %9417  ;;  %v992_v3 = vadd.f32 1.0, %v9416_v1  ;;  %9435 = vpow2.f32 %v7773_v63  ;;  %v8590_v4 = vpop.f32.mrb[12].mxu1 }
 0x101   : > { %v9420_v5 = vpop.eup %9419  ;;  %v990_v6 = vadd.f32 1.0, %v9418_v2  ;;  %9437 = vpow2.f32 %v7771_v0  ;;  %v10164_v7 = vadd.f32 %v8590_v4, %v10113_v20  ;;  %v811_v8 = vpop.f32.mrb[13].mxu1 }
 0x102   : > { %v9422_v9 = vpop.eup %9421  ;;  %9439 = vrcp.f32 %v992_v3  ;;  %v993_v10 = vadd.f32 1.0, %v9420_v5  ;;  %v10167_v11 = vadd.f32 %v10113_v20, %v811_v8  ;;  %v8591_v12 = vpop.f32.mrb[14].mxu1 }
 0x103   : > { %9441 = vrcp.f32 %v990_v6  ;;  %v991_v13 = vadd.f32 1.0, %v9422_v9  ;;  %v7776_v14 = vmul.f32 -1.442695, %v10164_v7  ;;  %v10171_v15 = vadd.f32 %v8591_v12, %v10113_v20  ;;  %v814_v16 = vpop.f32.mrb[15].mxu1 }
 0x104   : > { %v9424_v17 = vpop.eup %9423  ;;  %9443 = vrcp.f32 %v993_v10  ;;  %v7774_v18 = vmul.f32 -1.442695, %v10167_v11  ;;  %v10175_v19 = vadd.f32 %v10113_v20, %v814_v16 }
 0x105   : > { %v9426_v21 = vpop.eup %9425  ;;  %9445 = vrcp.f32 %v991_v13  ;;  %v7777_v23 = vmul.f32 -1.442695, %v10171_v15  ;;  %v1084_v29 = vmul.f32 %v9424_v17, %v10116_v22 }
 0x106   : > { %v9428_v25 = vpop.eup %9427  ;;  %9447 = vpow2.f32 %v7776_v14  ;;  %v7775_v26 = vmul.f32 -1.442695, %v10175_v19  ;;  %v1082_v33 = vmul.f32 %v9426_v21, %v10119_v24 }
 0x107   : > { %v9430_v28 = vpop.eup %9429  ;;  %v1085_v31 = vmul.f32 %v9428_v25, %v10123_v27  ;;  %9449 = vpow2.f32 %v7774_v18 }
 0x108   : > { %v9432_v32 = vpop.eup %9431  ;;  %v1083_v35 = vmul.f32 %v9430_v28, %v10127_v30  ;;  %9451 = vpow2.f32 %v7777_v23  ;;  %v8594_v37 = vpop.f32.mrb[16].mxu1 }
 0x109   : > { %v9434_v38 = vpop.eup %9433  ;;  %v10183_v40 = vpack.c.bf16 %v1085_v31, %v1084_v29  ;;  %v996_v41 = vadd.f32 1.0, %v9432_v32  ;;  %9453 = vpow2.f32 %v7775_v26  ;;  %v10186_v43 = vadd.f32 %v8594_v37, %v10113_v20  ;;  %v827_v44 = vpop.f32.mrb[17].mxu1 }
 0x10a   : > { %v9436_v22 = vpop.eup %9435  ;;  %v10188_v45 = vpack.c.bf16 %v1083_v35, %v1082_v33  ;;  %v994_v27 = vadd.f32 1.0, %v9434_v38  ;;  %v10191_v46 = vadd.f32 %v10113_v20, %v827_v44  ;;  %v8595_v24 = vpop.f32.mrb[18].mxu1 }
 0x10b   : > { %13056 = vst [vmem:[#allocation3_spill] sm:$0xff] %v10183_v40  ;;  %v9438_v30 = vpop.eup %9437  ;;  %9455 = vrcp.f32 %v996_v41  ;;  %v997_v47 = vadd.f32 1.0, %v9436_v22  ;;  %v7780_v48 = vmul.f32 -1.442695, %v10186_v43  ;;  %v10195_v49 = vadd.f32 %v8595_v24, %v10113_v20  ;;  %v830_v50 = vpop.f32.mrb[19].mxu1 }
 0x10c   : > { %13057 = vst [vmem:[#allocation4_spill] sm:$0xff] %v10188_v45  ;;  %v9440_v52 = vpop.eup %9439  ;;  %9457 = vrcp.f32 %v994_v27  ;;  %v995_v53 = vadd.f32 1.0, %v9438_v30  ;;  %v7778_v54 = vmul.f32 -1.442695, %v10191_v46  ;;  %v10199_v56 = vadd.f32 %v10113_v20, %v830_v50  ;;  %8610 = vmatprep.mubr.msk.bf16.mxu1 %vm676_vm1, %v10188_v45 }
 0x10d   : > { %v9442_v57 = vpop.eup %9441  ;;  %9459 = vrcp.f32 %v997_v47  ;;  %v7781_v58 = vmul.f32 -1.442695, %v10195_v49  ;;  %8611 = vmatmul.mubr.msk.bf16.vlgmr.msra.gmra.mrb[32].mxu1 %vm676_vm1, %v10183_v40  ;;  %v1088_v0 = vmul.f32 %v9440_v52, %v10132_v34 }
 0x10e   : > { %v9444_v60 = vpop.eup %9443  ;;  %9461 = vrcp.f32 %v995_v53  ;;  %v7779_v61 = vmul.f32 -1.442695, %v10199_v56  ;;  %v1086_v3 = vmul.f32 %v9442_v57, %v10135_v36 }
 0x10f   : > { %v9446_v63 = vpop.eup %9445  ;;  %v1089_v1 = vmul.f32 %v9444_v60, %v10139_v39  ;;  %9463 = vpow2.f32 %v7780_v48 }
 0x110   : > { %v9448_v2 = vpop.eup %9447  ;;  %v1087_v4 = vmul.f32 %v9446_v63, %v10143_v42  ;;  %9465 = vpow2.f32 %v7778_v54  ;;  %v8598_v5 = vpop.f32.mrb[20].mxu1 }
 0x111   : > { %v9450_v6 = vpop.eup %9449  ;;  %v10211_v8 = vpack.c.bf16 %v1089_v1, %v1088_v0  ;;  %v1000_v9 = vadd.f32 1.0, %v9448_v2  ;;  %9467 = vpow2.f32 %v7781_v58  ;;  %v10214_v10 = vadd.f32 %v8598_v5, %v10113_v20  ;;  %v843_v12 = vpop.f32.mrb[21].mxu1 }
 0x112   : > { %v9452_v34 = vpop.eup %9451  ;;  %v10216_v13 = vpack.c.bf16 %v1087_v4, %v1086_v3  ;;  %v998_v39 = vadd.f32 1.0, %v9450_v6  ;;  %9469 = vpow2.f32 %v7779_v61  ;;  %v10219_v36 = vadd.f32 %v10113_v20, %v843_v12  ;;  %v8599_v42 = vpop.f32.mrb[22].mxu1 }
 0x113   : > { %13058 = vst [vmem:[#allocation5_spill] sm:$0xff] %v10211_v8  ;;  %v9454_v14 = vpop.eup %9453  ;;  %9471 = vrcp.f32 %v1000_v9  ;;  %v1001_v16 = vadd.f32 1.0, %v9452_v34  ;;  %v7784_v17 = vmul.f32 -1.442695, %v10214_v10  ;;  %v10223_v18 = vadd.f32 %v8599_v42, %v10113_v20  ;;  %v846_v21 = vpop.f32.mrb[23].mxu1 }
 0x114   : > { %13059 = vst [vmem:[#allocation6_spill] sm:$0xff] %v10216_v13  ;;  %9473 = vrcp.f32 %v998_v39  ;;  %v999_v23 = vadd.f32 1.0, %v9454_v14  ;;  %v7782_v25 = vmul.f32 -1.442695, %v10219_v36  ;;  %v10227_v26 = vadd.f32 %v10113_v20, %v846_v21  ;;  %8614 = vmatprep.mubr.msk.bf16.mxu1 %vm676_vm1, %v10216_v13 }
 0x115   : > { %v9456_v28 = vpop.eup %9455  ;;  %9475 = vrcp.f32 %v1001_v16  ;;  %v7785_v29 = vmul.f32 -1.442695, %v10223_v18  ;;  %8615 = vmatmul.mubr.msk.bf16.gmra.mrb[36].mxu1 %vm676_vm1, %v10211_v8 }
 0x116   : > { %v9458_v31 = vpop.eup %9457  ;;  %9477 = vrcp.f32 %v999_v23  ;;  %v7783_v32 = vmul.f32 -1.442695, %v10227_v26  ;;  %v1092_v37 = vmul.f32 %v9456_v28, %v10148_v51 }
 0x117   : > { %v9460_v33 = vpop.eup %9459  ;;  %9479 = vpow2.f32 %v7784_v17  ;;  %v1090_v22 = vmul.f32 %v9458_v31, %v10151_v55 }
 0x118   : > { %v9462_v35 = vpop.eup %9461  ;;  %v1093_v38 = vmul.f32 %v9460_v33, %v10155_v59  ;;  %9481 = vpow2.f32 %v7782_v25  ;;  %v8602_v41 = vpop.f32.mrb[24].mxu1 }
 0x119   : > { %v9464_v44 = vpop.eup %9463  ;;  %v1091_v27 = vmul.f32 %v9462_v35, %v10159_v62  ;;  %9483 = vpow2.f32 %v7785_v29  ;;  %v10240_v24 = vadd.f32 %v8602_v41, %v10113_v20  ;;  %v859_v30 = vpop.f32.mrb[25].mxu1 }
 0x11a   : > { %v9466_v47 = vpop.eup %9465  ;;  %v10242_v48 = vpack.c.bf16 %v1093_v38, %v1092_v37  ;;  %v1004_v50 = vadd.f32 1.0, %v9464_v44  ;;  %9485 = vpow2.f32 %v7783_v32  ;;  %v10245_v51 = vadd.f32 %v10113_v20, %v859_v30  ;;  %v8603_v59 = vpop.f32.mrb[26].mxu1 }
 0x11b   : > { %v9468_v52 = vpop.eup %9467  ;;  %v10247_v53 = vpack.c.bf16 %v1091_v27, %v1090_v22  ;;  %v1002_v55 = vadd.f32 1.0, %v9466_v47  ;;  %v10250_v62 = vadd.f32 %v8603_v59, %v10113_v20  ;;  %v862_v54 = vpop.f32.mrb[27].mxu1  ;;  %v7788_v60 = vmul.f32 -1.442695, %v10240_v24 }
 0x11c   : > { %13060 = vst [vmem:[#allocation7_spill] sm:$0xff] %v10242_v48  ;;  %v9470_v57 = vpop.eup %9469  ;;  %9487 = vrcp.f32 %v1004_v50  ;;  %v1005_v58 = vadd.f32 1.0, %v9468_v52  ;;  %v10254_v61 = vadd.f32 %v10113_v20, %v862_v54  ;;  %v7786_v1 = vmul.f32 -1.442695, %v10245_v51 }
 0x11d   : > { %13061 = vst [vmem:[#allocation8_spill] sm:$0xff] %v10247_v53  ;;  %v9472_v63 = vpop.eup %9471  ;;  %9489 = vrcp.f32 %v1002_v55  ;;  %v1003_v0 = vadd.f32 1.0, %v9470_v57  ;;  %8618 = vmatprep.mubr.msk.bf16.mxu1 %vm676_vm1, %v10247_v53  ;;  %v7789_v3 = vmul.f32 -1.442695, %v10250_v62 }
 0x11e   : > { %v9474_v2 = vpop.eup %9473  ;;  %9491 = vrcp.f32 %v1005_v58  ;;  %8619 = vmatmul.mubr.msk.bf16.gmra.mrb[40].mxu1 %vm676_vm1, %v10242_v48  ;;  %v7787_v5 = vmul.f32 -1.442695, %v10254_v61  ;;  %v1096_v9 = vmul.f32 %v9472_v63, %v10164_v7 }
 0x11f   : > { %v9476_v4 = vpop.eup %9475  ;;  %9493 = vrcp.f32 %v1003_v0  ;;  %v1094_v42 = vmul.f32 %v9474_v2, %v10167_v11 }
 0x120   : > { %v9478_v6 = vpop.eup %9477  ;;  %v1097_v12 = vmul.f32 %v9476_v4, %v10171_v15  ;;  %9495 = vpow2.f32 %v7788_v60  ;;  %v8606_v34 = vpop.f32.mrb[28].mxu1 }
 0x121   : > { %v9480_v39 = vpop.eup %9479  ;;  %v1095_v14 = vmul.f32 %v9478_v6, %v10175_v19  ;;  %9497 = vpow2.f32 %v7786_v1  ;;  %v10268_v16 = vadd.f32 %v8606_v34, %v10113_v20  ;;  %v875_v17 = vpop.f32.mrb[29].mxu1 }
 0x122   : > { %v9482_v21 = vpop.eup %9481  ;;  %v10270_v23 = vpack.c.bf16 %v1097_v12, %v1096_v9  ;;  %v1008_v25 = vadd.f32 1.0, %v9480_v39  ;;  %9499 = vpow2.f32 %v7789_v3  ;;  %v10273_v7 = vadd.f32 %v10113_v20, %v875_v17  ;;  %v8607_v15 = vpop.f32.mrb[30].mxu1 }
 0x123   : > { %v9484_v28 = vpop.eup %9483  ;;  %v10275_v29 = vpack.c.bf16 %v1095_v14, %v1094_v42  ;;  %v1006_v11 = vadd.f32 1.0, %v9482_v21  ;;  %9501 = vpow2.f32 %v7787_v5  ;;  %v878_v19 = vpop.f32.mrb[31].mxu1  ;;  %v7792_v33 = vmul.f32 -1.442695, %v10268_v16 }
 0x124   : > { %13062 = vst [vmem:[#allocation9_spill] sm:$0xff] %v10270_v23  ;;  %v9486_v31 = vpop.eup %9485  ;;  %9503 = vrcp.f32 %v1008_v25  ;;  %v1009_v32 = vadd.f32 1.0, %v9484_v28  ;;  %v10279_v35 = vadd.f32 %v8607_v15, %v10113_v20  ;;  %v7790_v38 = vmul.f32 -1.442695, %v10273_v7 }
 0x125   : > { %13063 = vst [vmem:[#allocation10_spill] sm:$0xff] %v10275_v29  ;;  %9505 = vrcp.f32 %v1006_v11  ;;  %v1007_v37 = vadd.f32 1.0, %v9486_v31  ;;  %v10283_v41 = vadd.f32 %v10113_v20, %v878_v19  ;;  %8622 = vmatprep.mubr.msk.bf16.mxu1 %vm676_vm1, %v10275_v29 }
 0x126   : > { %v9488_v44 = vpop.eup %9487  ;;  %9507 = vrcp.f32 %v1009_v32  ;;  %v7793_v22 = vmul.f32 -1.442695, %v10279_v35  ;;  %8623 = vmatmul.mubr.msk.bf16.gmra.mrb[44].mxu1 %vm676_vm1, %v10270_v23 }
 0x127   : > { %v9490_v27 = vpop.eup %9489  ;;  %v1100_v30 = vmul.f32 %v9488_v44, %v10186_v43  ;;  %9509 = vrcp.f32 %v1007_v37  ;;  %v7791_v47 = vmul.f32 -1.442695, %v10283_v41 }
 0x128   : > { %v9492_v50 = vpop.eup %9491  ;;  %v1098_v20 = vmul.f32 %v9490_v27, %v10191_v46  ;;  %9511 = vpow2.f32 %v7792_v33 }
 0x129   : > { %v9494_v59 = vpop.eup %9493  ;;  %v1101_v52 = vmul.f32 %v9492_v50, %v10195_v49  ;;  %9513 = vpow2.f32 %v7790_v38 }
 0x12a   : > { %v9496_v55 = vpop.eup %9495  ;;  %v1099_v54 = vmul.f32 %v9494_v59, %v10199_v56  ;;  %9515 = vpow2.f32 %v7793_v22  ;;  %v13075_v59 = vmov 0 }
 0x12b   : > { %v9498_v57 = vpop.eup %9497  ;;  %v10295_v58 = vpack.c.bf16 %v1101_v52, %v1100_v30  ;;  %v1012_v60 = vadd.f32 1.0, %v9496_v55  ;;  %9517 = vpow2.f32 %v7791_v47  ;;  %v13076_v59 = vsel %vm10351_vm6, 4294967295, %v13075_v59  ;;  %v1639_v52 = vld [vmem:[#allocation2 + $0x20] sm:$0x1] }
 0x12c   : > { %v9500_v43 = vpop.eup %9499  ;;  %v10297_v63 = vpack.c.bf16 %v1099_v54, %v1098_v20  ;;  %v1010_v0 = vadd.f32 1.0, %v9498_v57  ;;  %13077 = vst [vmem:[#allocation20_spill] sm:$0xff] %v13076_v59  ;;  %v1640_v55 = vsel %vm10351_vm6, 0, %v1639_v52  ;;  %v1636_v54 = vld [vmem:[#allocation2 + $0x14] sm:$0x1] }
 0x12d   : > { %13064 = vst [vmem:[#allocation11_spill] sm:$0xff] %v10295_v58  ;;  %v9502_v1 = vpop.eup %9501  ;;  %9519 = vrcp.f32 %v1012_v60  ;;  %v1013_v46 = vadd.f32 1.0, %v9500_v43  ;;  %1641 = vst [vmem:[#allocation2 + $0x20] sm:$0x1] %v1640_v55  ;;  %v1637_v57 = vsel %vm10351_vm6, 0, %v1636_v54 }
 0x12e   : > { %13065 = vst [vmem:[#allocation12_spill] sm:$0xff] %v10297_v63  ;;  %v9504_v2 = vpop.eup %9503  ;;  %9521 = vrcp.f32 %v1010_v0  ;;  %v1011_v49 = vadd.f32 1.0, %v9502_v1  ;;  %8626 = vmatprep.mubr.msk.bf16.mxu1 %vm676_vm1, %v10297_v63  ;;  %1638 = vst [vmem:[#allocation2 + $0x14] sm:$0x1] %v1637_v57  ;;  %v1589_v60 = vld [vmem:[#allocation2 + $0x30] sm:$0x1] }
 0x12f   : > { %v9506_v56 = vpop.eup %9505  ;;  %v1104_v3 = vmul.f32 %v9504_v2, %v10214_v10  ;;  %9523 = vrcp.f32 %v1013_v46  ;;  %8627 = vmatmul.mubr.msk.bf16.gmra.mrb[48].mxu1 %vm676_vm1, %v10295_v58  ;;  %v1590_v43 = vsel %vm10341_vm4, 0, %v1589_v60  ;;  %v1586_v0 = vld [vmem:[#allocation2 + $0x24] sm:$0x1]  ;;  %v1645_v46 = vld [vmem:[#allocation2 + $0x38] sm:$0x1]  ;;  %v13078_v57 = vmov 0 }
 0x130   : > { %v9508_v4 = vpop.eup %9507  ;;  %v1102_v5 = vmul.f32 %v9506_v56, %v10219_v36  ;;  %9525 = vrcp.f32 %v1011_v49  ;;  %1591 = vst [vmem:[#allocation2 + $0x30] sm:$0x1] %v1590_v43  ;;  %v1587_v1 = vsel %vm10341_vm4, 0, %v1586_v0  ;;  %v1646_v2 = vsel %vm10351_vm6, 0, %v1645_v46  ;;  %v1642_v49 = vld [vmem:[#allocation2 + $0x2c] sm:$0x1] }
 0x131   : > { %v9510_v6 = vpop.eup %9509  ;;  %v1105_v9 = vmul.f32 %v9508_v4, %v10223_v18  ;;  %1588 = vst [vmem:[#allocation2 + $0x24] sm:$0x1] %v1587_v1  ;;  %1647 = vst [vmem:[#allocation2 + $0x38] sm:$0x1] %v1646_v2  ;;  %v1643_v56 = vsel %vm10351_vm6, 0, %v1642_v49  ;;  %v13079_v57 = vsel %vm10410_vm10, 4294967295, %v13078_v57 }
 0x132   : > { %v9512_v12 = vpop.eup %9511  ;;  %v1103_v34 = vmul.f32 %v9510_v6, %v10227_v26  ;;  %1644 = vst [vmem:[#allocation2 + $0x2c] sm:$0x1] %v1643_v56  ;;  %13080 = vst [vmem:[#allocation21_spill] sm:$0xff] %v13079_v57  ;;  %v1613_v60 = vld [vmem:[#allocation2 + $0x90] sm:$0x1] }
 0x133   : > { %v9514_v39 = vpop.eup %9513  ;;  %v10307_v42 = vpack.c.bf16 %v1105_v9, %v1104_v3  ;;  %v1016_v14 = vadd.f32 1.0, %v9512_v12  ;;  %v1595_v3 = vld [vmem:[#allocation2 + $0x48] sm:$0x1]  ;;  %v1651_v9 = vld [vmem:[#allocation2 + $0x50] sm:$0x1]  ;;  %v1614_v1 = vsel %vm10341_vm4, 0, %v1613_v60 }
 0x134   : > { %v9516_v17 = vpop.eup %9515  ;;  %v10309_v10 = vpack.c.bf16 %v1103_v34, %v1102_v5  ;;  %v1014_v21 = vadd.f32 1.0, %v9514_v39  ;;  %v1596_v4 = vsel %vm10341_vm4, 0, %v1595_v3  ;;  %v1592_v5 = vld [vmem:[#allocation2 + $0x3c] sm:$0x1]  ;;  %v1652_v12 = vsel %vm10351_vm6, 0, %v1651_v9 }
 0x135   : > { %13066 = vst [vmem:[#allocation13_spill] sm:$0xff] %v10307_v42  ;;  %v9518_v25 = vpop.eup %9517  ;;  %9527 = vrcp.f32 %v1016_v14  ;;  %v1017_v15 = vadd.f32 1.0, %v9516_v17  ;;  %1597 = vst [vmem:[#allocation2 + $0x48] sm:$0x1] %v1596_v4  ;;  %v1593_v6 = vsel %vm10341_vm4, 0, %v1592_v5 }
 0x136   : > { %13067 = vst [vmem:[#allocation14_spill] sm:$0xff] %v10309_v10  ;;  %9529 = vrcp.f32 %v1014_v21  ;;  %v1015_v36 = vadd.f32 1.0, %v9518_v25  ;;  %8630 = vmatprep.mubr.msk.bf16.mxu1 %vm676_vm1, %v10309_v10  ;;  %1594 = vst [vmem:[#allocation2 + $0x3c] sm:$0x1] %v1593_v6  ;;  %v1648_v34 = vld [vmem:[#allocation2 + $0x44] sm:$0x1] }
 0x137   : > { %v9520_v18 = vpop.eup %9519  ;;  %9531 = vrcp.f32 %v1017_v15  ;;  %8631 = vmatmul.mubr.msk.bf16.gmra.mrb[52].mxu1 %vm676_vm1, %v10307_v42  ;;  %1653 = vst [vmem:[#allocation2 + $0x50] sm:$0x1] %v1652_v12  ;;  %v1649_v39 = vsel %vm10351_vm6, 0, %v1648_v34  ;;  %v1601_v14 = vld [vmem:[#allocation2 + $0x60] sm:$0x1] }
 0x138   : > { %v9522_v26 = vpop.eup %9521  ;;  %v1108_v28 = vmul.f32 %v9520_v18, %v10240_v24  ;;  %9533 = vrcp.f32 %v1015_v36  ;;  %1650 = vst [vmem:[#allocation2 + $0x44] sm:$0x1] %v1649_v39  ;;  %v1602_v17 = vsel %vm10341_vm4, 0, %v1601_v14  ;;  %v1598_v21 = vld [vmem:[#allocation2 + $0x54] sm:$0x1] }
 0x139   : > { %v9524_v11 = vpop.eup %9523  ;;  %v1106_v19 = vmul.f32 %v9522_v26, %v10245_v51  ;;  %1603 = vst [vmem:[#allocation2 + $0x60] sm:$0x1] %v1602_v17  ;;  %v1599_v25 = vsel %vm10341_vm4, 0, %v1598_v21  ;;  %v1657_v15 = vld [vmem:[#allocation2 + $0x68] sm:$0x1] }
 0x13a   : > { %v9526_v31 = vpop.eup %9525  ;;  %v1109_v32 = vmul.f32 %v9524_v11, %v10250_v62  ;;  %1600 = vst [vmem:[#allocation2 + $0x54] sm:$0x1] %v1599_v25  ;;  %v1658_v36 = vsel %vm10351_vm6, 0, %v1657_v15  ;;  %v1577_v18 = vld [vmem:[#allocation2] sm:$0x1] }
 0x13b   : > { %v1107_v33 = vmul.f32 %v9526_v31, %v10254_v61  ;;  %1659 = vst [vmem:[#allocation2 + $0x68] sm:$0x1] %v1658_v36  ;;  %v1578_v26 = vsel %vm10341_vm4, 0, %v1577_v18  ;;  %v1654_v11 = vld [vmem:[#allocation2 + $0x5c] sm:$0x1]  ;;  %v12979_v31 = vmov 0  }
 0x13c   : > { %v10319_v37 = vpack.c.bf16 %v1109_v32, %v1108_v28  ;;  %1579 = vst [vmem:[#allocation2] sm:$0x1] %v1578_v26  ;;  %v1633_v28 = vld [vmem:[#allocation2 + $0x8] sm:$0x1]  ;;  %1693 = vst.msk [vmem:[#allocation2 + $0x4] sm:$0xf] %vm1691_vm7, %v12979_v31 }
 0x13d   : > { %v10321_v38 = vpack.c.bf16 %v1107_v33, %v1106_v19  ;;  %v1634_v19 = vsel %vm10351_vm6, 0, %v1633_v28  ;;  %1692 = vst.msk [vmem:[#allocation2] sm:$0xf] %vm1691_vm7, %v12979_v31  ;;  %1698 = vst.msk [vmem:[#allocation2 + $0xd0] sm:$0xf] %vm1691_vm7, %v12979_v31  ;;  %v1655_v32 = vsel %vm10351_vm6, 0, %v1654_v11 }
 0x13e   : > { %13068 = vst [vmem:[#allocation15_spill] sm:$0xff] %v10319_v37  ;;  %1635 = vst [vmem:[#allocation2 + $0x8] sm:$0x1] %v1634_v19  ;;  %v1607_v33 = vld [vmem:[#allocation2 + $0x78] sm:$0x1] }
 0x13f   : > { %13069 = vst [vmem:[#allocation16_spill] sm:$0xff] %v10321_v38  ;;  %v9528_v44 = vpop.eup %9527  ;;  %8634 = vmatprep.mubr.msk.bf16.mxu1 %vm676_vm1, %v10321_v38  ;;  %1656 = vst [vmem:[#allocation2 + $0x5c] sm:$0x1] %v1655_v32  ;;  %v1610_v46 = vld [vmem:[#allocation2 + $0x84] sm:$0x1] }
 0x140   : > { %v9530_v22 = vpop.eup %9529  ;;  %v1112_v24 = vmul.f32 %v9528_v44, %v10268_v16  ;;  %8635 = vmatmul.mubr.msk.bf16.gmra.mrb[56].mxu1 %vm676_vm1, %v10319_v37  ;;  %v1583_v16 = vld [vmem:[#allocation2 + $0x18] sm:$0x1]  ;;  %1695 = vst.msk [vmem:[#allocation2 + $0x8] sm:$0x1] %vm1574_vm2, %v12979_v31  ;;  %v1608_v44 = vsel %vm10341_vm4, 0, %v1607_v33  ;;  %v1611_v2 = vsel %vm10341_vm4, 0, %v1610_v46 }
 0x141   : > { %v9532_v51 = vpop.eup %9531  ;;  %v1110_v27 = vmul.f32 %v9530_v22, %v10273_v7  ;;  %v13072_v7 = vmov 0  ;;  %v1604_v22 = vld [vmem:[#allocation2 + $0x6c] sm:$0x1]  ;;  %1609 = vst [vmem:[#allocation2 + $0x78] sm:$0x1] %v1608_v44 }
 0x142   : > { %v9534_v62 = vpop.eup %9533  ;;  %v1113_v61 = vmul.f32 %v9532_v51, %v10279_v35  ;;  %v13073_v7 = vsel %vm10341_vm4, 4294967295, %v13072_v7  ;;  %v1584_v35 = vsel %vm10341_vm4, 0, %v1583_v16  ;;  %v1663_v51 = vld [vmem:[#allocation2 + $0x80] sm:$0x1]  ;;  %1615 = vst [vmem:[#allocation2 + $0x90] sm:$0x1] %v1614_v1 }
 0x143   : > { %v1111_v30 = vmul.f32 %v9534_v62, %v10283_v41  ;;  %13074 = vst [vmem:[#allocation19_spill] sm:$0xff] %v13073_v7  ;;  %1585 = vst [vmem:[#allocation2 + $0x18] sm:$0x1] %v1584_v35  ;;  %v1580_v41 = vld [vmem:[#allocation2 + $0xc] sm:$0x1] }
 0x144   : > { %v10331_v47 = vpack.c.bf16 %v1113_v61, %v1112_v24  ;;  %v1581_v20 = vsel %vm10341_vm4, 0, %v1580_v41  ;;  %v1605_v24 = vsel %vm10341_vm4, 0, %v1604_v22  ;;  %v1660_v62 = vld [vmem:[#allocation2 + $0x74] sm:$0x1]  ;;  %v2235_v61 = vld [vmem:[#allocation2 + $0x4] sm:$0xf] }
 0x145   : > { %v10333_v50 = vpack.c.bf16 %v1111_v30, %v1110_v27  ;;  %1582 = vst [vmem:[#allocation2 + $0xc] sm:$0x1] %v1581_v20  ;;  %1606 = vst [vmem:[#allocation2 + $0x6c] sm:$0x1] %v1605_v24  ;;  %v1664_v27 = vsel %vm10351_vm6, 0, %v1663_v51  ;;  %v1661_v30 = vsel %vm10351_vm6, 0, %v1660_v62 }
 0x146   : > { %13070 = vst [vmem:[#allocation17_spill] sm:$0xff] %v10331_v47  ;;  %1665 = vst [vmem:[#allocation2 + $0x80] sm:$0x1] %v1664_v27  ;;  %v2234_v16 = vld [vmem:[#allocation2] sm:$0xf]  ;;  %v3245_v52 = vrot.slane %v2235_v61, 5 }
 0x147   : > { %13071 = vst [vmem:[#allocation18_spill] sm:$0xff] %v10333_v50  ;;  %8638 = vmatprep.mubr.msk.bf16.mxu1 %vm676_vm1, %v10333_v50  ;;  %v2236_v35 = vld [vmem:[#allocation2 + $0x8] sm:$0x1]  ;;  %1662 = vst [vmem:[#allocation2 + $0x74] sm:$0x1] %v1661_v30  ;;  %v7940_v41 = vrot.slane %v2234_v16, 9 }
 0x148   : > { %8639 = vmatmul.mubr.msk.bf16.gmra.mrb[60].mxu1 %vm676_vm1, %v10331_v47  ;;  %v7956_v20 = vld [vmem:[%s12974_s7 + $0x4] sm:$0x3]  ;;  %v3248_v55 = vrot.slane %v2236_v35, 5  ;;  %v3247_v0 = vrot.slane %v3245_v52, 4  ;;  %v7875_v56 = vld [vmem:[%s12974_s7 + $0x2] sm:$0x3] }
 0x149   : > { %9310 = vmatprep.subr.msk.bf16.mxu0 %vm725_vm0, %v7956_v20  ;;  %v10408_v54 = vsel %vm725_vm0, %v7956_v20, 0  ;;  %v3246_v43 = vsel %vm10410_vm10, %v7940_v41, %v3245_v52  ;;  %1612 = vst [vmem:[#allocation2 + $0x84] sm:$0x1] %v1611_v2  ;;  %v1669_v3 = vld [vmem:[#allocation2 + $0x98] sm:$0x1]  ;;  %9308 = vmatprep.subr.msk.bf16.mxu1 %vm725_vm0, %v7875_v56  ;;  %v2287_v6 = vshrl.u32 %v2234_v16, 16 }
 0x14a   : > { %8711 = vmatpush3.bf16.msra.mxu0 %v10408_v54  ;;  %v3249_v49 = vsel %vm10410_vm10, %v3247_v0, %v3248_v55  ;;  %v1670_v5 = vsel %vm10351_vm6, 0, %v1669_v3  ;;  %v2290_v9 = vshll.u32 %v2234_v16, 16  ;;  %v2300_v12 = vshrl.u32 %v2235_v61, 16  ;;  %v1666_v39 = vld [vmem:[#allocation2 + $0x8c] sm:$0x1] }
 0x14b   : > { %v7957_v4 = vcombine.low %v3246_v43, %v3249_v49  ;;  %1671 = vst [vmem:[#allocation2 + $0x98] sm:$0x1] %v1670_v5  ;;  %v2296_v34 = vshll.u32 %v2235_v61, 16  ;;  %v2306_v14 = vshll.u32 %v2236_v35, 16  ;;  %v1667_v17 = vsel %vm10351_vm6, 0, %v1666_v39 }
 0x14c   : > { %v2289_v21 = vrot.slane %v2287_v6, 4  ;;  %v2292_v25 = vrot.slane %v2290_v9, 5  ;;  %1668 = vst [vmem:[#allocation2 + $0x8c] sm:$0x1] %v1667_v17  ;;  %v2302_v36 = vrot.slane %v2300_v12, 4  ;;  %v2769_v18 = vsel %vm725_vm0, %v7875_v56, 0 }
 0x14d   : > { %8712 = vmatprep.mubr.msk.bf16.mxu0 %vm676_vm1, %v7957_v4  ;;  %v2298_v15 = vrot.slane %v2296_v34, 5  ;;  %v2308_v28 = vrot.slane %v2306_v14, 5  ;;  %8643 = vmatpush3.bf16.msra.mxu1 %v2769_v18  ;;  %v1619_v19 = vld [vmem:[#allocation2 + $0xa8] sm:$0x1]  ;;  %v1616_v44 = vld [vmem:[#allocation2 + $0x9c] sm:$0x1] }
 0x14e   : > { %v2293_v26 = vor.u32 %v2292_v25, %v2289_v21  ;;  %v1620_v33 = vsel %vm10341_vm4, 0, %v1619_v19  ;;  %v1617_v51 = vsel %vm10341_vm4, 0, %v1616_v44  ;;  %v1675_v27 = vld [vmem:[#allocation2 + $0xb0] sm:$0x1]  ;;  %v1672_v30 = vld [vmem:[#allocation2 + $0xa4] sm:$0x1] }
 0x14f   : > { %v2303_v11 = vor.u32 %v2302_v36, %v2298_v15  ;;  %1621 = vst [vmem:[#allocation2 + $0xa8] sm:$0x1] %v1620_v33  ;;  %1618 = vst [vmem:[#allocation2 + $0x9c] sm:$0x1] %v1617_v51  ;;  %v1676_v61 = vsel %vm10351_vm6, 0, %v1675_v27  ;;  %v1673_v35 = vsel %vm10351_vm6, 0, %v1672_v30 }
 0x150   : > { %v2294_v32 = vrot.slane %v2293_v26, 4  ;;  %1677 = vst [vmem:[#allocation2 + $0xb0] sm:$0x1] %v1676_v61  ;;  %1674 = vst [vmem:[#allocation2 + $0xa4] sm:$0x1] %v1673_v35 }
 0x151   : > { %v2304_v24 = vrot.slane %v2303_v11, 4  ;;  %v1625_v20 = vld [vmem:[#allocation2 + $0xc0] sm:$0x1]  ;;  %v10453_v52 = vld [vmem:[%s12974_s7 + $0x6] sm:$0x3] }
 0x152   : > { %v2299_v62 = vsel %vm10435_vm13, %v2294_v32, %v2298_v15  ;;  %v1626_v55 = vsel %vm10341_vm4, 0, %v1625_v20  ;;  %v1622_v60 = vld [vmem:[#allocation2 + $0xb4] sm:$0x1]  ;;  %9312 = vmatprep.subr.msk.bf16.mxu0 %vm725_vm0, %v10453_v52  ;;  %v1681_v0 = vld [vmem:[#allocation2 + $0xc8] sm:$0x1] }
 0x153   : > { %v2309_v16 = vsel %vm10435_vm13, %v2304_v24, %v2308_v28  ;;  %1627 = vst [vmem:[#allocation2 + $0xc0] sm:$0x1] %v1626_v55  ;;  %v1623_v43 = vsel %vm10341_vm4, 0, %v1622_v60  ;;  %v10464_v1 = vld [vmem:[%s12973_s6] ss:$0 sm:$0xff]  ;;  %v1682_v46 = vsel %vm10351_vm6, 0, %v1681_v0 }
 0x154   : > { %v7876_v41 = vcombine.low %v2299_v62, %v2309_v16  ;;  %1624 = vst [vmem:[#allocation2 + $0xb4] sm:$0x1] %v1623_v43  ;;  %1683 = vst [vmem:[#allocation2 + $0xc8] sm:$0x1] %v1682_v46  ;;  %v1678_v18 = vld [vmem:[#allocation2 + $0xbc] sm:$0x1] }
 0x155   : > { %v1679_v19 = vsel %vm10351_vm6, 0, %v1678_v18  ;;  %v2126_v50 = vld [vmem:[#allocation2 + $0x14] sm:$0x1]  ;;  %v2189_v63 = vld [vmem:[#allocation2 + $0x80] sm:$0x1] }
 0x156   : > { %8644 = vmatprep.mubr.msk.bf16.mxu1 %vm676_vm1, %v7876_v41  ;;  %1680 = vst [vmem:[#allocation2 + $0xbc] sm:$0x1] %v1679_v19 }
 0x1e0   : > { %v8612_v2 = vpop.f32.mrb[32].mxu1 }
 0x1e1   : > { %v10469_v49 = vadd.f32 %v8612_v2, %v10464_v1  ;;  %v1223_v56 = vpop.f32.mrb[33].mxu1 }
 0x1e2   : > { %v10472_v3 = vadd.f32 %v10464_v1, %v1223_v56  ;;  %v8613_v4 = vpop.f32.mrb[34].mxu1 }
 0x1e3   : > { %v7813_v5 = vmul.f32 -1.442695, %v10469_v49  ;;  %v10476_v6 = vadd.f32 %v8613_v4, %v10464_v1  ;;  %v1226_v9 = vpop.f32.mrb[35].mxu1 }
 0x1e4   : > { %v7811_v12 = vmul.f32 -1.442695, %v10472_v3  ;;  %v10480_v34 = vadd.f32 %v10464_v1, %v1226_v9 }
 0x1e5   : > { %9535 = vpow2.f32 %v7813_v5  ;;  %v7814_v39 = vmul.f32 -1.442695, %v10476_v6 }
 0x1e6   : > { %9537 = vpow2.f32 %v7811_v12  ;;  %v7812_v14 = vmul.f32 -1.442695, %v10480_v34 }
 0x1e7   : > { %9539 = vpow2.f32 %v7814_v39 }
 0x1e8   : > { %9541 = vpow2.f32 %v7812_v14  ;;  %v8616_v17 = vpop.f32.mrb[36].mxu1 }
 0x1e9   : > { %v10485_v21 = vadd.f32 %v8616_v17, %v10464_v1  ;;  %v1239_v25 = vpop.f32.mrb[37].mxu1 }
 0x1ea   : > { %v10488_v15 = vadd.f32 %v10464_v1, %v1239_v25  ;;  %v8617_v36 = vpop.f32.mrb[38].mxu1 }
 0x1eb   : > { %v7817_v26 = vmul.f32 -1.442695, %v10485_v21  ;;  %v10492_v28 = vadd.f32 %v8617_v36, %v10464_v1  ;;  %v1242_v11 = vpop.f32.mrb[39].mxu1 }
 0x1ec   : > { %v7815_v32 = vmul.f32 -1.442695, %v10488_v15  ;;  %v10498_v33 = vadd.f32 %v10464_v1, %v1242_v11 }
 0x1ed   : > { %9543 = vpow2.f32 %v7817_v26  ;;  %v7818_v44 = vmul.f32 -1.442695, %v10492_v28 }
 0x1ee   : > { %9545 = vpow2.f32 %v7815_v32  ;;  %v7816_v24 = vmul.f32 -1.442695, %v10498_v33 }
 0x1ef   : > { %v9536_v51 = vpop.eup %9535  ;;  %9547 = vpow2.f32 %v7818_v44 }
 0x1f0   : > { %v9538_v27 = vpop.eup %9537  ;;  %v1448_v62 = vadd.f32 1.0, %v9536_v51  ;;  %9549 = vpow2.f32 %v7816_v24 }
 0x1f1   : > { %v9540_v61 = vpop.eup %9539  ;;  %v1446_v30 = vadd.f32 1.0, %v9538_v27  ;;  %v8620_v16 = vpop.f32.mrb[40].mxu1 }
 0x1f2   : > { %v9542_v35 = vpop.eup %9541  ;;  %9551 = vrcp.f32 %v1448_v62  ;;  %v1449_v41 = vadd.f32 1.0, %v9540_v61  ;;  %v10503_v20 = vadd.f32 %v8620_v16, %v10464_v1  ;;  %v1255_v55 = vpop.f32.mrb[41].mxu1 }
 0x1f3   : > { %9553 = vrcp.f32 %v1446_v30  ;;  %v1447_v60 = vadd.f32 1.0, %v9542_v35  ;;  %v10506_v43 = vadd.f32 %v10464_v1, %v1255_v55  ;;  %v8621_v0 = vpop.f32.mrb[42].mxu1 }
 0x1f4   : > { %9555 = vrcp.f32 %v1449_v41  ;;  %v7821_v46 = vmul.f32 -1.442695, %v10503_v20  ;;  %v10510_v2 = vadd.f32 %v8621_v0, %v10464_v1  ;;  %v1258_v56 = vpop.f32.mrb[43].mxu1 }
 0x1f5   : > { %9557 = vrcp.f32 %v1447_v60  ;;  %v7819_v4 = vmul.f32 -1.442695, %v10506_v43  ;;  %v10514_v5 = vadd.f32 %v10464_v1, %v1258_v56 }
 0x1f6   : > { %9559 = vpow2.f32 %v7821_v46  ;;  %v7822_v9 = vmul.f32 -1.442695, %v10510_v2 }
 0x1f7   : > { %v9544_v12 = vpop.eup %9543  ;;  %9561 = vpow2.f32 %v7819_v4  ;;  %v7820_v39 = vmul.f32 -1.442695, %v10514_v5 }
 0x1f8   : > { %v9546_v14 = vpop.eup %9545  ;;  %v1452_v17 = vadd.f32 1.0, %v9544_v12  ;;  %9563 = vpow2.f32 %v7822_v9 }
 0x1f9   : > { %v9548_v25 = vpop.eup %9547  ;;  %v1450_v36 = vadd.f32 1.0, %v9546_v14  ;;  %9565 = vpow2.f32 %v7820_v39  ;;  %v8624_v18 = vpop.f32.mrb[44].mxu1 }
 0x1fa   : > { %v9550_v26 = vpop.eup %9549  ;;  %9567 = vrcp.f32 %v1452_v17  ;;  %v1453_v11 = vadd.f32 1.0, %v9548_v25  ;;  %v10519_v19 = vadd.f32 %v8624_v18, %v10464_v1  ;;  %v1271_v32 = vpop.f32.mrb[45].mxu1 }
 0x1fb   : > { %9569 = vrcp.f32 %v1450_v36  ;;  %v1451_v44 = vadd.f32 1.0, %v9550_v26  ;;  %v10522_v24 = vadd.f32 %v10464_v1, %v1271_v32  ;;  %v8625_v51 = vpop.f32.mrb[46].mxu1 }
 0x1fc   : > { %v9552_v27 = vpop.eup %9551  ;;  %9571 = vrcp.f32 %v1453_v11  ;;  %v7825_v62 = vmul.f32 -1.442695, %v10519_v19  ;;  %v10526_v61 = vadd.f32 %v8625_v51, %v10464_v1  ;;  %v1274_v30 = vpop.f32.mrb[47].mxu1 }
 0x1fd   : > { %v9554_v16 = vpop.eup %9553  ;;  %v1544_v35 = vmul.f32 %v9552_v27, %v10469_v49  ;;  %9573 = vrcp.f32 %v1451_v44  ;;  %v7823_v41 = vmul.f32 -1.442695, %v10522_v24  ;;  %v10531_v55 = vadd.f32 %v10464_v1, %v1274_v30 }
 0x1fe   : > { %v9556_v60 = vpop.eup %9555  ;;  %v1542_v0 = vmul.f32 %v9554_v16, %v10472_v3  ;;  %9575 = vpow2.f32 %v7825_v62  ;;  %v7826_v46 = vmul.f32 -1.442695, %v10526_v61  ;;  %v10538_v49 = vsel %vm725_vm0, %v10453_v52, 0 }
 0x1ff   : > { %v9558_v56 = vpop.eup %9557  ;;  %v8323_v4 = vpack.c.bf16 %v1544_v35, %v1544_v35  ;;  %v1545_v9 = vmul.f32 %v9556_v60, %v10476_v6  ;;  %9577 = vpow2.f32 %v7823_v41  ;;  %v10542_v3 = vmul.f32 -1.442695, %v10531_v55  ;;  %v2129_v60 = vld [vmem:[#allocation2 + $0x18] sm:$0xf] }
 0x200   : > { %v9560_v12 = vpop.eup %9559  ;;  %v8321_v39 = vpack.c.bf16 %v1542_v0, %v1542_v0  ;;  %v1543_v14 = vmul.f32 %v9558_v56, %v10480_v34  ;;  %9579 = vpow2.f32 %v7826_v46 }
 0x201   : > { %v9562_v17 = vpop.eup %9561  ;;  %v1816_v25 = vshrl.u32 %v8323_v4, 16  ;;  %v1819_v36 = vshll.u32 %v8323_v4, 16  ;;  %v8324_v18 = vpack.c.bf16 %v1545_v9, %v1545_v9  ;;  %v1456_v26 = vadd.f32 1.0, %v9560_v12 }
 0x202   : > { %v10544_v11 = vpop.eup %9563  ;;  %v1799_v6 = vshrl.u32 %v8321_v39, 16  ;;  %v1802_v32 = vshll.u32 %v8321_v39, 16  ;;  %v8322_v44 = vpack.c.bf16 %v1543_v14, %v1543_v14  ;;  %v1454_v52 = vadd.f32 1.0, %v9562_v17  ;;  %v10546_v51 = vpop.f32.mrb[48].mxu1  ;;  %v2121_v14 = vld [vmem:[#allocation2 + $0xc] sm:$0xf] }
 0x203   : > { %v9566_v27 = vpop.eup %9565  ;;  %v1818_v62 = vrot.slane %v1816_v25, 7  ;;  %v1824_v34 = vshrl.u32 %v8324_v18, 16  ;;  %v1827_v30 = vshll.u32 %v8324_v18, 16  ;;  %9581 = vrcp.f32 %v1456_v26  ;;  %v10548_v16 = vpop.f32.mrb[49].mxu1 }
 0x204   : > { %v9568_v35 = vpop.eup %9567  ;;  %v1801_v0 = vrot.slane %v1799_v6, 7  ;;  %v1807_v46 = vshrl.u32 %v8322_v44, 16  ;;  %v1810_v56 = vshll.u32 %v8322_v44, 16  ;;  %9583 = vrcp.f32 %v1454_v52  ;;  %v10556_v4 = vpop.f32.mrb[50].mxu1  ;;  %v2133_v44 = vld [vmem:[#allocation2 + $0x20] sm:$0x1] }
 0x205   : > { %v9570_v9 = vpop.eup %9569  ;;  %v1821_v12 = vor.u32 %v1819_v36, %v1818_v62  ;;  %v1822_v39 = vrot.slane %v1818_v62, 4  ;;  %v1826_v17 = vrot.slane %v1824_v34, 7  ;;  %v1548_v25 = vmul.f32 %v9568_v35, %v10485_v21  ;;  %v10559_v18 = vpop.f32.mrb[51].mxu1 }
 0x206   : > { %v9572_v26 = vpop.eup %9571  ;;  %v1804_v31 = vor.u32 %v1802_v32, %v1801_v0  ;;  %v1805_v47 = vrot.slane %v1801_v0, 4  ;;  %v1809_v52 = vrot.slane %v1807_v46, 7  ;;  %v1546_v36 = vmul.f32 %v9570_v9, %v10488_v15 }
 0x207   : > { %v9574_v62 = vpop.eup %9573  ;;  %v2130_v34 = vsel %vm10552_vm15, %v1821_v12, %v2129_v60  ;;  %v1829_v21 = vor.u32 %v1827_v30, %v1826_v17  ;;  %v1831_v35 = vrot.slane %v1826_v17, 4  ;;  %v8327_v37 = vpack.c.bf16 %v1548_v25, %v1548_v25  ;;  %v2143_v25 = vld [vmem:[#allocation2 + $0x30] sm:$0xf] }
 0x208   : > { %v9576_v32 = vpop.eup %9575  ;;  %2131 = vst [vmem:[#allocation2 + $0x18] sm:$0xf] %v2130_v34  ;;  %v2122_v0 = vsel %vm10552_vm15, %v1804_v31, %v2121_v14  ;;  %v1812_v38 = vor.u32 %v1810_v56, %v1809_v52  ;;  %v1814_v42 = vrot.slane %v1809_v52, 4  ;;  %v8325_v10 = vpack.c.bf16 %v1546_v36, %v1546_v36 }
 0x209   : > { %v9578_v58 = vpop.eup %9577  ;;  %2123 = vst [vmem:[#allocation2 + $0xc] sm:$0xf] %v2122_v0  ;;  %v1830_v15 = vsel %vm10563_vm5, %v1822_v39, %v1829_v21  ;;  %v2134_v60 = vsel %vm10341_vm4, %v1831_v35, %v2133_v44  ;;  %v1850_v30 = vshrl.u32 %v8327_v37, 16  ;;  %v1853_v46 = vshll.u32 %v8327_v37, 16  ;;  %v2136_v0 = vld [vmem:[#allocation2 + $0x24] sm:$0xf] }
 0x20a   : > { %v9580_v9 = vpop.eup %9579  ;;  %2132 = vst.msk [vmem:[#allocation2 + $0x1c] sm:$0xf] %vm1691_vm7, %v1830_v15  ;;  %2135 = vst [vmem:[#allocation2 + $0x20] sm:$0x1] %v2134_v60  ;;  %v1813_v31 = vsel %vm10563_vm5, %v1805_v47, %v1812_v38  ;;  %v2127_v56 = vsel %vm10341_vm4, %v1814_v42, %v2126_v50  ;;  %v1833_v12 = vshrl.u32 %v8325_v10, 16  ;;  %v1836_v14 = vshll.u32 %v8325_v10, 16 }
 0x20b   : > { %v10581_v17 = vpop.f32.mrb[52].mxu1  ;;  %2125 = vst.msk [vmem:[#allocation2 + $0x10] sm:$0xf] %vm1691_vm7, %v1813_v31  ;;  %2128 = vst [vmem:[#allocation2 + $0x14] sm:$0x1] %v2127_v56  ;;  %v1852_v39 = vrot.slane %v1850_v30, 7  ;;  %v1549_v37 = vmul.f32 %v9572_v26, %v10492_v28  ;;  %v1547_v44 = vmul.f32 %v9574_v62, %v10498_v33 }
 0x20c   : > { %v1457_v52 = vadd.f32 1.0, %v10544_v11  ;;  %v10587_v36 = vpop.f32.mrb[53].mxu1  ;;  %v1835_v38 = vrot.slane %v1833_v12, 7  ;;  %v1455_v47 = vadd.f32 1.0, %v9566_v27  ;;  %v1460_v42 = vadd.f32 1.0, %v9576_v32 }
 0x20d   : > { %v1458_v50 = vadd.f32 1.0, %v9578_v58  ;;  %v10589_v10 = vpop.f32.mrb[54].mxu1  ;;  %v9582_v34 = vpop.eup %9581  ;;  %v1855_v21 = vor.u32 %v1853_v46, %v1852_v39  ;;  %v1856_v35 = vrot.slane %v1852_v39, 4  ;;  %v8328_v15 = vpack.c.bf16 %v1549_v37, %v1549_v37  ;;  %v2147_v37 = vld [vmem:[#allocation2 + $0x38] sm:$0x1] }
 0x20e   : > { %v8326_v60 = vpack.c.bf16 %v1547_v44, %v1547_v44  ;;  %v10591_v30 = vpop.f32.mrb[55].mxu1  ;;  %v9584_v28 = vpop.eup %9583  ;;  %v1838_v33 = vor.u32 %v1836_v14, %v1835_v38  ;;  %v1839_v26 = vrot.slane %v1835_v38, 4  ;;  %v1552_v11 = vmul.f32 %v9582_v34, %v10503_v20  ;;  %v2140_v44 = vld [vmem:[#allocation2 + $0x2c] sm:$0x1] }
 0x20f   : > { %9585 = vrcp.f32 %v1457_v52  ;;  %v2144_v27 = vsel %vm10552_vm15, %v1855_v21, %v2143_v25  ;;  %v1858_v58 = vshrl.u32 %v8328_v15, 16  ;;  %v1861_v62 = vshll.u32 %v8328_v15, 16 }
 0x210   : > { %v1841_v32 = vshrl.u32 %v8326_v60, 16  ;;  %2145 = vst [vmem:[#allocation2 + $0x30] sm:$0xf] %v2144_v27  ;;  %v2137_v46 = vsel %vm10552_vm15, %v1838_v33, %v2136_v0  ;;  %v1844_v31 = vshll.u32 %v8326_v60, 16  ;;  %v8331_v56 = vpack.c.bf16 %v1552_v11, %v1552_v11 }
 0x211   : > { %v1550_v12 = vmul.f32 %v9584_v28, %v10506_v43  ;;  %2138 = vst [vmem:[#allocation2 + $0x24] sm:$0xf] %v2137_v46  ;;  %v1860_v14 = vrot.slane %v1858_v58, 7  ;;  %9587 = vrcp.f32 %v1455_v47  ;;  %v1461_v20 = vadd.f32 1.0, %v9580_v9  ;;  %v2157_v58 = vld [vmem:[#allocation2 + $0x48] sm:$0xf] }
 0x212   : > { %v1843_v39 = vrot.slane %v1841_v32, 7  ;;  %v1884_v52 = vshrl.u32 %v8331_v56, 16  ;;  %v1887_v25 = vshll.u32 %v8331_v56, 16  ;;  %9589 = vrcp.f32 %v1460_v42  ;;  %v2150_v46 = vld [vmem:[#allocation2 + $0x3c] sm:$0xf] }
 0x213   : > { %v8329_v38 = vpack.c.bf16 %v1550_v12, %v1550_v12  ;;  %v1863_v34 = vor.u32 %v1861_v62, %v1860_v14  ;;  %v1865_v21 = vrot.slane %v1860_v14, 4  ;;  %v10599_v0 = vpop.f32.mrb[56].mxu1  ;;  %9591 = vrcp.f32 %v1458_v50 }
 0x214   : > { %v1846_v15 = vor.u32 %v1844_v31, %v1843_v39  ;;  %v1848_v27 = vrot.slane %v1843_v39, 4  ;;  %v10601_v60 = vrot.slane %v1884_v52, 7  ;;  %v10603_v33 = vpop.f32.mrb[57].mxu1  ;;  %9593 = vrcp.f32 %v1461_v20 }
 0x215   : > { %v1867_v43 = vshrl.u32 %v8329_v38, 16  ;;  %v1870_v28 = vshll.u32 %v8329_v38, 16  ;;  %v1864_v9 = vsel %vm10563_vm5, %v1856_v35, %v1863_v34  ;;  %v2148_v47 = vsel %vm10341_vm4, %v1865_v21, %v2147_v37  ;;  %v10613_v62 = vpop.f32.mrb[58].mxu1 }
 0x216   : > { %v1847_v42 = vsel %vm10563_vm5, %v1839_v26, %v1846_v15  ;;  %v2141_v11 = vsel %vm10341_vm4, %v1848_v27, %v2140_v44  ;;  %2146 = vst.msk [vmem:[#allocation2 + $0x34] sm:$0xf] %vm1691_vm7, %v1864_v9  ;;  %2149 = vst [vmem:[#allocation2 + $0x38] sm:$0x1] %v2148_v47  ;;  %v1889_v50 = vor.u32 %v1887_v25, %v10601_v60  ;;  %v1890_v35 = vrot.slane %v10601_v60, 4  ;;  %v10621_v26 = vpop.f32.mrb[59].mxu1 }
 0x217   : > { %2139 = vst.msk [vmem:[#allocation2 + $0x28] sm:$0xf] %vm1691_vm7, %v1847_v42  ;;  %2142 = vst [vmem:[#allocation2 + $0x2c] sm:$0x1] %v2141_v11  ;;  %v10619_v32 = vrot.slane %v1867_v43, 7  ;;  %9595 = vpow2.f32 %v10542_v3  ;;  %v10626_v31 = vadd.f32 %v10546_v51, %v10464_v1  ;;  %v10630_v56 = vadd.f32 %v10464_v1, %v10548_v16 }
 0x218   : > { %v10634_v12 = vadd.f32 %v10556_v4, %v10464_v1  ;;  %v2158_v39 = vsel %vm10552_vm15, %v1889_v50, %v2157_v58  ;;  %v10642_v51 = vadd.f32 %v10464_v1, %v10559_v18  ;;  %v10653_v38 = vadd.f32 %v10581_v17, %v10464_v1 }
 0x219   : > { %v9586_v14 = vpop.eup %9585  ;;  %v1872_v20 = vor.u32 %v1870_v28, %v10619_v32  ;;  %v1873_v3 = vrot.slane %v10619_v32, 4  ;;  %2159 = vst [vmem:[#allocation2 + $0x48] sm:$0xf] %v2158_v39  ;;  %v7829_v37 = vmul.f32 -1.442695, %v10626_v31  ;;  %v10657_v18 = vadd.f32 %v10464_v1, %v10587_v36 }
 0x21a   : > { %v1553_v16 = vmul.f32 %v9586_v14, %v10510_v2  ;;  %v7827_v4 = vmul.f32 -1.442695, %v10630_v56  ;;  %v7830_v44 = vmul.f32 -1.442695, %v10634_v12  ;;  %v7828_v25 = vmul.f32 -1.442695, %v10642_v51 }
 0x21b   : > { %v2151_v52 = vsel %vm10552_vm15, %v1872_v20, %v2150_v46  ;;  %v9588_v2 = vpop.eup %9587  ;;  %9597 = vpow2.f32 %v7829_v37  ;;  %v10661_v21 = vadd.f32 %v10589_v10, %v10464_v1  ;;  %v10665_v15 = vadd.f32 %v10464_v1, %v10591_v30  ;;  %v10667_v27 = vpop.f32.mrb[60].mxu1 }
 0x21c   : > { %2152 = vst [vmem:[#allocation2 + $0x3c] sm:$0xf] %v2151_v52  ;;  %v8332_v34 = vpack.c.bf16 %v1553_v16, %v1553_v16  ;;  %v9590_v17 = vpop.eup %9589  ;;  %v1551_v43 = vmul.f32 %v9588_v2, %v10514_v5  ;;  %9599 = vpow2.f32 %v7827_v4  ;;  %v7833_v36 = vmul.f32 -1.442695, %v10653_v38  ;;  %v10672_v9 = vpop.f32.mrb[61].mxu1 }
 0x21d   : > { %v7831_v28 = vmul.f32 -1.442695, %v10657_v18  ;;  %v1556_v10 = vmul.f32 %v9590_v17, %v10519_v19  ;;  %9601 = vpow2.f32 %v7830_v44  ;;  %v10675_v11 = vpop.f32.mrb[62].mxu1  ;;  %v9592_v30 = vpop.eup %9591  ;;  %v7834_v50 = vmul.f32 -1.442695, %v10661_v21 }
 0x21e   : > { %v1892_v47 = vshrl.u32 %v8332_v34, 16  ;;  %v1895_v42 = vshll.u32 %v8332_v34, 16  ;;  %v8330_v58 = vpack.c.bf16 %v1551_v43, %v1551_v43  ;;  %9603 = vpow2.f32 %v7828_v25  ;;  %v10681_v46 = vpop.f32.mrb[63].mxu1  ;;  %v9594_v16 = vpop.eup %9593  ;;  %v2161_v19 = vld [vmem:[#allocation2 + $0x50] sm:$0x1] }
 0x21f   : > { %v10679_v5 = vmul.f32 -1.442695, %v10665_v15  ;;  %v8335_v39 = vpack.c.bf16 %v1556_v10, %v1556_v10  ;;  %v1554_v20 = vmul.f32 %v9592_v30, %v10522_v24  ;;  %9605 = vpow2.f32 %v7833_v36 }
 0x220   : > { %v1894_v14 = vrot.slane %v1892_v47, 7  ;;  %v1875_v37 = vshrl.u32 %v8330_v58, 16  ;;  %v1878_v4 = vshll.u32 %v8330_v58, 16  ;;  %9607 = vpow2.f32 %v7831_v28  ;;  %v11159_v8 = vld [vmem:[#allocation2 + $0x48] sm:$0xf] }
 0x221   : > { %v10686_v44 = vadd.f32 %v10599_v0, %v10464_v1  ;;  %v9596_v52 = vpop.eup %9595  ;;  %v1918_v34 = vshrl.u32 %v8335_v39, 16  ;;  %v1921_v17 = vshll.u32 %v8335_v39, 16  ;;  %v8333_v47 = vpack.c.bf16 %v1554_v20, %v1554_v20  ;;  %v2154_v0 = vld [vmem:[#allocation2 + $0x44] sm:$0x1] }
 0x222   : > { %v1897_v25 = vor.u32 %v1895_v42, %v1894_v14  ;;  %v1899_v2 = vrot.slane %v1894_v14, 4  ;;  %v1877_v43 = vrot.slane %v1875_v37, 7  ;;  %v1557_v10 = vmul.f32 %v9594_v16, %v10526_v61  ;;  %v2171_v14 = vld [vmem:[#allocation2 + $0x60] sm:$0xf] }
 0x223   : > { %v1459_v24 = vadd.f32 1.0, %v9596_v52  ;;  %v1920_v30 = vrot.slane %v1918_v34, 7  ;;  %9609 = vpow2.f32 %v7834_v50  ;;  %v1901_v39 = vshrl.u32 %v8333_v47, 16  ;;  %v2164_v34 = vld [vmem:[#allocation2 + $0x54] sm:$0xf] }
 0x224   : > { %v1898_v36 = vsel %vm10563_vm5, %v1890_v35, %v1897_v25  ;;  %v2162_v28 = vsel %vm10341_vm4, %v1899_v2, %v2161_v19  ;;  %v1880_v42 = vor.u32 %v1878_v4, %v1877_v43  ;;  %v1882_v58 = vrot.slane %v1877_v43, 4 }
 0x225   : > { %2160 = vst.msk [vmem:[#allocation2 + $0x4c] sm:$0xf] %vm1691_vm7, %v1898_v36  ;;  %2163 = vst [vmem:[#allocation2 + $0x50] sm:$0x1] %v2162_v28  ;;  %v1904_v61 = vshll.u32 %v8333_v47, 16  ;;  %v9598_v20 = vpop.eup %9597  ;;  %v1923_v16 = vor.u32 %v1921_v17, %v1920_v30  ;;  %v1924_v60 = vrot.slane %v1920_v30, 4  ;;  %v8336_v37 = vpack.c.bf16 %v1557_v10, %v1557_v10 }
 0x226   : > { %9611 = vrcp.f32 %v1459_v24  ;;  %v9600_v35 = vpop.eup %9599  ;;  %v1881_v19 = vsel %vm10563_vm5, %v1873_v3, %v1880_v42  ;;  %v2155_v50 = vsel %vm10341_vm4, %v1882_v58, %v2154_v0  ;;  %v10702_v52 = vrot.slane %v1901_v39, 7 }
 0x227   : > { %v1464_v4 = vadd.f32 1.0, %v9598_v20  ;;  %v9602_v25 = vpop.eup %9601  ;;  %2153 = vst.msk [vmem:[#allocation2 + $0x40] sm:$0xf] %vm1691_vm7, %v1881_v19  ;;  %2156 = vst [vmem:[#allocation2 + $0x44] sm:$0x1] %v2155_v50  ;;  %v2172_v2 = vsel %vm10552_vm15, %v1923_v16, %v2171_v14  ;;  %v1926_v17 = vshrl.u32 %v8336_v37, 16  ;;  %v10719_v19 = vadd.f32 %v10613_v62, %v10464_v1 }
 0x228   : > { %v1929_v43 = vshll.u32 %v8336_v37, 16  ;;  %v1462_v32 = vadd.f32 1.0, %v9600_v35  ;;  %v9604_v47 = vpop.eup %9603  ;;  %2173 = vst [vmem:[#allocation2 + $0x60] sm:$0xf] %v2172_v2  ;;  %v1906_v3 = vor.u32 %v1904_v61, %v10702_v52  ;;  %v1907_v10 = vrot.slane %v10702_v52, 4 }
 0x229   : > { %9613 = vrcp.f32 %v1464_v4  ;;  %v1465_v24 = vadd.f32 1.0, %v9602_v25  ;;  %v9606_v36 = vpop.eup %9605  ;;  %v1928_v28 = vrot.slane %v1926_v17, 7  ;;  %v1463_v0 = vadd.f32 1.0, %v9604_v47  ;;  %v2175_v14 = vld [vmem:[#allocation2 + $0x68] sm:$0x1] }
 0x22a   : > { %9615 = vrcp.f32 %v1462_v32  ;;  %v7837_v30 = vmul.f32 -1.442695, %v10686_v44  ;;  %v9608_v42 = vpop.eup %9607  ;;  %v2165_v58 = vsel %vm10552_vm15, %v1906_v3, %v2164_v34  ;;  %v1468_v39 = vadd.f32 1.0, %v9606_v36  ;;  %v10733_v34 = vld [vmem:[#allocation2 + $0xc] sm:$0xf] }
 0x22b   : > { %9617 = vrcp.f32 %v1465_v24  ;;  %v10714_v61 = vadd.f32 %v10464_v1, %v10603_v33  ;;  %2166 = vst [vmem:[#allocation2 + $0x54] sm:$0xf] %v2165_v58  ;;  %v1931_v20 = vor.u32 %v1929_v43, %v1928_v28  ;;  %v1933_v16 = vrot.slane %v1928_v28, 4  ;;  %v10735_v62 = vld [vmem:[#allocation2 + $0x10] sm:$0xf] }
 0x22c   : > { %9619 = vrcp.f32 %v1463_v0  ;;  %v1466_v37 = vadd.f32 1.0, %v9608_v42  ;;  %v10723_v50 = vadd.f32 %v10464_v1, %v10621_v26  ;;  %v10731_v2 = vadd.f32 %v10667_v27, %v10464_v1 }
 0x22d   : > { %9621 = vrcp.f32 %v1468_v39  ;;  %v7835_v35 = vmul.f32 -1.442695, %v10714_v61  ;;  %v9610_v4 = vpop.eup %9609  ;;  %v1932_v33 = vsel %vm10563_vm5, %v1924_v60, %v1931_v20  ;;  %v2176_v25 = vsel %vm10341_vm4, %v1933_v16, %v2175_v14 }
 0x22e   : > { %9623 = vrcp.f32 %v1466_v37  ;;  %2174 = vst.msk [vmem:[#allocation2 + $0x64] sm:$0xf] %vm1691_vm7, %v1932_v33  ;;  %2177 = vst [vmem:[#allocation2 + $0x68] sm:$0x1] %v2176_v25  ;;  %v1469_v26 = vadd.f32 1.0, %v9610_v4  ;;  %v10744_v27 = vadd.f32 %v10464_v1, %v10672_v9  ;;  %v10748_v47 = vadd.f32 %v10675_v11, %v10464_v1 }
 0x22f   : > { %9625 = vpow2.f32 %v10679_v5  ;;  %v7838_v60 = vmul.f32 -1.442695, %v10719_v19  ;;  %v7836_v17 = vmul.f32 -1.442695, %v10723_v50  ;;  %v7841_v32 = vmul.f32 -1.442695, %v10731_v2 }
 0x230   : > { %v9612_v43 = vpop.eup %9611  ;;  %9627 = vpow2.f32 %v7837_v30  ;;  %v2311_v5 = vshrl.u32 %v10733_v34, 16  ;;  %v2314_v24 = vshll.u32 %v10733_v34, 16  ;;  %v7839_v36 = vmul.f32 -1.442695, %v10744_v27 }
 0x231   : > { %v1555_v3 = vmul.f32 %v9612_v43, %v10531_v55  ;;  %9629 = vrcp.f32 %v1469_v26  ;;  %v7842_v28 = vmul.f32 -1.442695, %v10748_v47  ;;  %v2320_v0 = vshll.u32 %v10735_v62, 16 }
 0x232   : > { %9631 = vpow2.f32 %v7835_v35  ;;  %v10756_v42 = vrot.slane %v2311_v5, 4  ;;  %v10758_v1 = vrot.slane %v2314_v24, 5  ;;  %v2324_v14 = vshrl.u32 %v10735_v62, 16 }
 0x233   : > { %v9614_v9 = vpop.eup %9613  ;;  %v8334_v30 = vpack.c.bf16 %v1555_v3, %v1555_v3  ;;  %9633 = vpow2.f32 %v7838_v60  ;;  %v10761_v58 = vrot.slane %v2320_v0, 5  ;;  %v2168_v3 = vld [vmem:[#allocation2 + $0x5c] sm:$0x1] }
 0x234   : > { %v9616_v55 = vpop.eup %9615  ;;  %v1560_v11 = vmul.f32 %v9614_v9, %v10626_v31  ;;  %9635 = vpow2.f32 %v7836_v17  ;;  %v10766_v25 = vrot.slane %v2324_v14, 4 }
 0x235   : > { %v9618_v39 = vpop.eup %9617  ;;  %v1909_v20 = vshrl.u32 %v8334_v30, 16  ;;  %v1912_v16 = vshll.u32 %v8334_v30, 16  ;;  %v1558_v37 = vmul.f32 %v9616_v55, %v10630_v56  ;;  %9637 = vpow2.f32 %v7841_v32  ;;  %v2282_v55 = vld [vmem:[%s12974_s7] sm:$0x3] }
 0x236   : > { %v9620_v35 = vpop.eup %9619  ;;  %v8339_v4 = vpack.c.bf16 %v1560_v11, %v1560_v11  ;;  %v1561_v33 = vmul.f32 %v9618_v39, %v10634_v12  ;;  %9639 = vpow2.f32 %v7839_v36  ;;  %9309 = vmatprep.subr.msk.bf16.mxu1 %vm725_vm0, %v2282_v55 }
 0x237   : > { %v9622_v26 = vpop.eup %9621  ;;  %v1911_v31 = vrot.slane %v1909_v20, 7  ;;  %v8337_v60 = vpack.c.bf16 %v1558_v37, %v1558_v37  ;;  %v1559_v17 = vmul.f32 %v9620_v35, %v10642_v51  ;;  %9641 = vpow2.f32 %v7842_v28  ;;  %v2185_v37 = vld [vmem:[#allocation2 + $0x78] sm:$0xf] }
 0x238   : > { %v9624_v43 = vpop.eup %9623  ;;  %v1952_v5 = vshrl.u32 %v8339_v4, 16  ;;  %v1955_v24 = vshll.u32 %v8339_v4, 16  ;;  %v8340_v0 = vpack.c.bf16 %v1561_v33, %v1561_v33  ;;  %v1564_v56 = vmul.f32 %v9622_v26, %v10653_v38 }
 0x239   : > { %v9626_v32 = vpop.eup %9625  ;;  %v1914_v9 = vor.u32 %v1912_v16, %v1911_v31  ;;  %v1916_v30 = vrot.slane %v1911_v31, 4  ;;  %v1935_v12 = vshrl.u32 %v8337_v60, 16  ;;  %v1938_v36 = vshll.u32 %v8337_v60, 16  ;;  %v2178_v60 = vld [vmem:[#allocation2 + $0x6c] sm:$0xf] }
 0x23a   : > { %v9628_v11 = vpop.eup %9627  ;;  %v1954_v14 = vrot.slane %v1952_v5, 7  ;;  %v1960_v51 = vshrl.u32 %v8340_v0, 16  ;;  %v1963_v28 = vshll.u32 %v8340_v0, 16  ;;  %v8338_v39 = vpack.c.bf16 %v1559_v17, %v1559_v17 }
 0x23b   : > { %v9630_v20 = vpop.eup %9629  ;;  %v1915_v38 = vsel %vm10563_vm5, %v1907_v10, %v1914_v9  ;;  %v2169_v16 = vsel %vm10341_vm4, %v1916_v30, %v2168_v3  ;;  %v1937_v35 = vrot.slane %v1935_v12, 7  ;;  %v8343_v4 = vpack.c.bf16 %v1564_v56, %v1564_v56 }
 0x23c   : > { %v9632_v33 = vpop.eup %9631  ;;  %2167 = vst.msk [vmem:[#allocation2 + $0x58] sm:$0xf] %vm1691_vm7, %v1915_v38  ;;  %2170 = vst [vmem:[#allocation2 + $0x5c] sm:$0x1] %v2169_v16  ;;  %v1957_v26 = vor.u32 %v1955_v24, %v1954_v14  ;;  %v1958_v31 = vrot.slane %v1954_v14, 4  ;;  %v1962_v17 = vrot.slane %v1960_v51, 7  ;;  %v1562_v16 = vmul.f32 %v9624_v43, %v10657_v18 }
 0x23d   : > { %v1943_v5 = vshrl.u32 %v8338_v39, 16  ;;  %v9634_v0 = vpop.eup %9633  ;;  %v1940_v52 = vor.u32 %v1938_v36, %v1937_v35  ;;  %v1941_v55 = vrot.slane %v1937_v35, 4  ;;  %v1946_v10 = vshll.u32 %v8338_v39, 16  ;;  %v2182_v14 = vld [vmem:[#allocation2 + $0x74] sm:$0x1] }
 0x23e   : > { %v1986_v9 = vshrl.u32 %v8343_v4, 16  ;;  %v9636_v23 = vpop.eup %9635  ;;  %v2186_v3 = vsel %vm10552_vm15, %v1957_v26, %v2185_v37  ;;  %v1965_v56 = vor.u32 %v1963_v28, %v1962_v17  ;;  %v1967_v30 = vrot.slane %v1962_v17, 4  ;;  %v2199_v17 = vld [vmem:[#allocation2 + $0x90] sm:$0xf] }
 0x23f   : > { %v1945_v12 = vrot.slane %v1943_v5, 7  ;;  %v9638_v38 = vpop.eup %9637  ;;  %2187 = vst [vmem:[#allocation2 + $0x78] sm:$0xf] %v2186_v3  ;;  %v2179_v24 = vsel %vm10552_vm15, %v1940_v52, %v2178_v60  ;;  %v1989_v36 = vshll.u32 %v8343_v4, 16  ;;  %v8341_v18 = vpack.c.bf16 %v1562_v16, %v1562_v16 }
 0x240   : > { %v10785_v51 = vrot.slane %v1986_v9, 7  ;;  %v9640_v39 = vpop.eup %9639  ;;  %2180 = vst [vmem:[#allocation2 + $0x6c] sm:$0xf] %v2179_v24  ;;  %v1966_v35 = vsel %vm10563_vm5, %v1958_v31, %v1965_v56  ;;  %v2190_v28 = vsel %vm10341_vm4, %v1967_v30, %v2189_v63  ;;  %v1565_v43 = vmul.f32 %v9630_v20, %v10661_v21 }
 0x241   : > { %v1948_v37 = vor.u32 %v1946_v10, %v1945_v12  ;;  %v1950_v26 = vrot.slane %v1945_v12, 4  ;;  %v9642_v5 = vpop.eup %9641  ;;  %2188 = vst.msk [vmem:[#allocation2 + $0x7c] sm:$0xf] %vm1691_vm7, %v1966_v35  ;;  %2191 = vst [vmem:[#allocation2 + $0x80] sm:$0x1] %v2190_v28  ;;  %v1467_v52 = vadd.f32 1.0, %v9626_v32 }
 0x242   : > { %v1991_v60 = vor.u32 %v1989_v36, %v10785_v51  ;;  %v1992_v4 = vrot.slane %v10785_v51, 4  ;;  %v1472_v10 = vadd.f32 1.0, %v9628_v11  ;;  %v1969_v3 = vshrl.u32 %v8341_v18, 16  ;;  %v2239_v32 = vld [vmem:[#allocation2 + $0x14] sm:$0x1] }
 0x243   : > { %v1949_v31 = vsel %vm10563_vm5, %v1941_v55, %v1948_v37  ;;  %v2183_v63 = vsel %vm10341_vm4, %v1950_v26, %v2182_v14  ;;  %v1972_v56 = vshll.u32 %v8341_v18, 16  ;;  %v8344_v30 = vpack.c.bf16 %v1565_v43, %v1565_v43  ;;  %v2192_v11 = vld [vmem:[#allocation2 + $0x84] sm:$0xf]  ;;  %v2203_v26 = vld [vmem:[#allocation2 + $0x98] sm:$0x1] }
 0x244   : > { %2181 = vst.msk [vmem:[#allocation2 + $0x70] sm:$0xf] %vm1691_vm7, %v1949_v31  ;;  %2184 = vst [vmem:[#allocation2 + $0x74] sm:$0x1] %v2183_v63  ;;  %v2200_v9 = vsel %vm10552_vm15, %v1991_v60, %v2199_v17  ;;  %9643 = vrcp.f32 %v1467_v52  ;;  %v1470_v21 = vadd.f32 1.0, %v9632_v33  ;;  %v1473_v20 = vadd.f32 1.0, %v9634_v0 }
 0x245   : > { %2201 = vst [vmem:[#allocation2 + $0x90] sm:$0xf] %v2200_v9  ;;  %v1471_v12 = vadd.f32 1.0, %v9636_v23  ;;  %v10803_v55 = vrot.slane %v1969_v3, 7  ;;  %v1994_v24 = vshrl.u32 %v8344_v30, 16  ;;  %v1997_v14 = vshll.u32 %v8344_v30, 16 }
 0x246   : > { %9645 = vrcp.f32 %v1472_v10  ;;  %v1476_v51 = vadd.f32 1.0, %v9638_v38  ;;  %v1474_v36 = vadd.f32 1.0, %v9640_v39  ;;  %v1477_v16 = vadd.f32 1.0, %v9642_v5  ;;  %v2240_v17 = vld [vmem:[#allocation2 + $0x18] sm:$0xf] }
 0x247   : > { %9647 = vrcp.f32 %v1470_v21  ;;  %v1974_v35 = vor.u32 %v1972_v56, %v10803_v55  ;;  %v1975_v28 = vrot.slane %v10803_v55, 4  ;;  %v1996_v37 = vrot.slane %v1994_v24, 7  ;;  %v10811_v5 = vld [vmem:[#allocation2 + $0x1c] sm:$0xf]  ;;  %v10813_v18 = vld [vmem:[#allocation2 + $0x20] sm:$0x1] }
 0x248   : > { %9649 = vrcp.f32 %v1473_v20  ;;  %v2330_v23 = vshll.u32 %v2239_v32, 16  ;;  %v7941_v33 = vrot.slane %v10733_v34, 9  ;;  %v3252_v0 = vrot.slane %v10735_v62, 5  ;;  %v9919_v10 = vld [vmem:[%s12973_s6] ss:$0 sm:$0xff] }
 0x249   : > { %9651 = vrcp.f32 %v1471_v12  ;;  %v2193_v60 = vsel %vm10552_vm15, %v1974_v35, %v2192_v11  ;;  %v1999_v38 = vor.u32 %v1997_v14, %v1996_v37  ;;  %v2001_v39 = vrot.slane %v1996_v37, 4 }
 0x24a   : > { %9653 = vrcp.f32 %v1476_v51  ;;  %2194 = vst [vmem:[#allocation2 + $0x84] sm:$0xf] %v2193_v60  ;;  %v10815_v43 = vrot.slane %v2330_v23, 5  ;;  %v3253_v34 = vsel %vm10410_vm10, %v7941_v33, %v3252_v0  ;;  %v3254_v31 = vrot.slane %v3252_v0, 4 }
 0x24b   : > { %9655 = vrcp.f32 %v1474_v36  ;;  %v2000_v62 = vsel %vm10563_vm5, %v1992_v4, %v1999_v38  ;;  %v2204_v63 = vsel %vm10341_vm4, %v2001_v39, %v2203_v26  ;;  %v3255_v52 = vrot.slane %v2239_v32, 5 }
 0x24c   : > { %9657 = vrcp.f32 %v1477_v16  ;;  %2202 = vst.msk [vmem:[#allocation2 + $0x94] sm:$0xf] %vm1691_vm7, %v2000_v62  ;;  %2205 = vst [vmem:[#allocation2 + $0x98] sm:$0x1] %v2204_v63  ;;  %v10828_v9 = vadd.f32 %v9919_v10, %v10681_v46  ;;  %v7942_v3 = vrot.slane %v2240_v17, 9  ;;  %v3259_v56 = vrot.slane %v10811_v5, 5 }
 0x24d   : > { %v3262_v4 = vrot.slane %v10813_v18, 5  ;;  %v3256_v30 = vsel %vm10410_vm10, %v3254_v31, %v3255_v52  ;;  %v2317_v21 = vor.u32 %v10758_v1, %v10756_v42  ;;  %v2327_v20 = vor.u32 %v10766_v25, %v10761_v58  ;;  %v10851_v1 = vld [vmem:[%s12974_s7 + $0x8] sm:$0x3] }
 0x24e   : > { %v2335_v12 = vshrl.u32 %v2240_v17, 16  ;;  %v9644_v24 = vpop.eup %9643  ;;  %v7958_v14 = vcombine.low %v3253_v34, %v3256_v30  ;;  %v7840_v46 = vmul.f32 -1.442695, %v10828_v9  ;;  %v3260_v32 = vsel %vm10410_vm10, %v7942_v3, %v3259_v56 }
 0x24f   : > { %v3261_v11 = vrot.slane %v3259_v56, 4  ;;  %v1563_v36 = vmul.f32 %v9644_v24, %v10665_v15  ;;  %v10842_v16 = vrot.slane %v2317_v21, 4  ;;  %v10844_v35 = vrot.slane %v2327_v20, 4 }
 0x250   : > { %v9646_v51 = vpop.eup %9645  ;;  %v10846_v42 = vrot.slane %v2335_v12, 4  ;;  %8713 = vmatmul.mubr.msk.bf16.vlgmr.msra.gmra.mrb[0].mxu0 %vm676_vm1, %v7958_v14  ;;  %9659 = vpow2.f32 %v7840_v46  ;;  %v2338_v26 = vshll.u32 %v2240_v17, 16  ;;  %v2196_v14 = vld [vmem:[#allocation2 + $0x8c] sm:$0x1] }
 0x251   : > { %v9648_v25 = vpop.eup %9647  ;;  %v1568_v37 = vmul.f32 %v9646_v51, %v10686_v44  ;;  %v3263_v15 = vsel %vm10410_vm10, %v3261_v11, %v3262_v4  ;;  %v8342_v33 = vpack.c.bf16 %v1563_v36, %v1563_v36  ;;  %8745 = vmatpush3.bf16.msra.mxu0 %v10538_v49  ;;  %v2323_v38 = vsel %vm10435_vm13, %v10842_v16, %v10761_v58  ;;  %v10914_v16 = vld [vmem:[#allocation2 + $0x28] sm:$0xf] }
 0x252   : > { %v9650_v23 = vpop.eup %9649  ;;  %v1566_v0 = vmul.f32 %v9648_v25, %v10714_v61  ;;  %v7959_v60 = vcombine.low %v3260_v32, %v3263_v15  ;;  %v2333_v17 = vsel %vm10435_vm13, %v10844_v35, %v10815_v43  ;;  %v10868_v31 = vrot.slane %v2338_v26, 5  ;;  %9313 = vmatprep.subr.msk.bf16.mxu0 %vm725_vm0, %v10851_v1  ;;  %v2213_v25 = vld [vmem:[#allocation2 + $0xa8] sm:$0xf] }
 0x253   : > { %v9652_v44 = vpop.eup %9651  ;;  %v8347_v39 = vpack.c.bf16 %v1568_v37, %v1568_v37  ;;  %v1569_v34 = vmul.f32 %v9650_v23, %v10719_v19  ;;  %v1977_v61 = vshrl.u32 %v8342_v33, 16  ;;  %v1980_v62 = vshll.u32 %v8342_v33, 16  ;;  %v2206_v33 = vld [vmem:[#allocation2 + $0x9c] sm:$0xf] }
 0x254   : > { %v9654_v49 = vpop.eup %9653  ;;  %v8345_v63 = vpack.c.bf16 %v1566_v0, %v1566_v0  ;;  %v1567_v52 = vmul.f32 %v9652_v44, %v10723_v50  ;;  %8716 = vmatprep.mubr.msk.bf16.mxu0 %vm676_vm1, %v7959_v60  ;;  %v2344_v58 = vshll.u32 %v10811_v5, 16 }
 0x255   : > { %v9656_v10 = vpop.eup %9655  ;;  %v2020_v19 = vshrl.u32 %v8347_v39, 16  ;;  %v2023_v3 = vshll.u32 %v8347_v39, 16  ;;  %v8348_v56 = vpack.c.bf16 %v1569_v34, %v1569_v34  ;;  %v1572_v4 = vmul.f32 %v9654_v49, %v10731_v2  ;;  %v2217_v49 = vld [vmem:[#allocation2 + $0xb0] sm:$0x1] }
 0x256   : > { %v9658_v30 = vpop.eup %9657  ;;  %v1979_v21 = vrot.slane %v1977_v61, 7  ;;  %v2003_v20 = vshrl.u32 %v8345_v63, 16  ;;  %v2006_v12 = vshll.u32 %v8345_v63, 16  ;;  %v8346_v24 = vpack.c.bf16 %v1567_v52, %v1567_v52 }
 0x257   : > { %v2022_v46 = vrot.slane %v2020_v19, 7  ;;  %v2028_v32 = vshrl.u32 %v8348_v56, 16  ;;  %v2031_v11 = vshll.u32 %v8348_v56, 16  ;;  %v8351_v51 = vpack.c.bf16 %v1572_v4, %v1572_v4 }
 0x258   : > { %v1982_v36 = vor.u32 %v1980_v62, %v1979_v21  ;;  %v1984_v50 = vrot.slane %v1979_v21, 4  ;;  %v2005_v37 = vrot.slane %v2003_v20, 7  ;;  %v2011_v15 = vshrl.u32 %v8346_v24, 16 }
 0x259   : > { %v2025_v26 = vor.u32 %v2023_v3, %v2022_v46  ;;  %v2026_v23 = vrot.slane %v2022_v46, 4  ;;  %v2030_v0 = vrot.slane %v2028_v32, 7  ;;  %v2014_v2 = vshll.u32 %v8346_v24, 16 }
 0x25a   : > { %v1983_v60 = vsel %vm10563_vm5, %v1975_v28, %v1982_v36  ;;  %v2197_v44 = vsel %vm10341_vm4, %v1984_v50, %v2196_v14  ;;  %v2008_v39 = vor.u32 %v2006_v12, %v2005_v37  ;;  %v2009_v34 = vrot.slane %v2005_v37, 4  ;;  %v9660_v61 = vpop.eup %9659  ;;  %v2210_v28 = vld [vmem:[#allocation2 + $0xa4] sm:$0x1] }
 0x25b   : > { %2195 = vst.msk [vmem:[#allocation2 + $0x88] sm:$0xf] %vm1691_vm7, %v1983_v60  ;;  %2198 = vst [vmem:[#allocation2 + $0x8c] sm:$0x1] %v2197_v44  ;;  %v2214_v62 = vsel %vm10552_vm15, %v2025_v26, %v2213_v25  ;;  %v2033_v63 = vor.u32 %v2031_v11, %v2030_v0  ;;  %v2035_v52 = vrot.slane %v2030_v0, 4  ;;  %v2013_v19 = vrot.slane %v2011_v15, 7 }
 0x25c   : > { %2215 = vst [vmem:[#allocation2 + $0xa8] sm:$0xf] %v2214_v62  ;;  %v2207_v55 = vsel %vm10552_vm15, %v2008_v39, %v2206_v33  ;;  %v2054_v3 = vshrl.u32 %v8351_v51, 16  ;;  %v2057_v56 = vshll.u32 %v8351_v51, 16  ;;  %v1570_v4 = vmul.f32 %v9656_v10, %v10744_v27  ;;  %v2227_v51 = vld [vmem:[#allocation2 + $0xc0] sm:$0xf] }
 0x25d   : > { %2208 = vst [vmem:[#allocation2 + $0x9c] sm:$0xf] %v2207_v55  ;;  %v2034_v21 = vsel %vm10563_vm5, %v2026_v23, %v2033_v63  ;;  %v2218_v20 = vsel %vm10341_vm4, %v2035_v52, %v2217_v49  ;;  %v2016_v12 = vor.u32 %v2014_v2, %v2013_v19  ;;  %v2018_v24 = vrot.slane %v2013_v19, 4  ;;  %v10910_v15 = vld [vmem:[#allocation2 + $0x24] sm:$0xf] }
 0x25e   : > { %2216 = vst.msk [vmem:[#allocation2 + $0xac] sm:$0xf] %vm1691_vm7, %v2034_v21  ;;  %2219 = vst [vmem:[#allocation2 + $0xb0] sm:$0x1] %v2218_v20  ;;  %v2056_v14 = vrot.slane %v2054_v3, 7  ;;  %v8349_v46 = vpack.c.bf16 %v1570_v4, %v1570_v4  ;;  %v1573_v32 = vmul.f32 %v9658_v30, %v10748_v47  ;;  %v1475_v11 = vadd.f32 1.0, %v9660_v61 }
 0x25f   : > { %v2017_v27 = vsel %vm10563_vm5, %v2009_v34, %v2016_v12  ;;  %v2211_v10 = vsel %vm10341_vm4, %v2018_v24, %v2210_v28  ;;  %v7877_v36 = vcombine.low %v2323_v38, %v2333_v17  ;;  %v2341_v47 = vor.u32 %v10868_v31, %v10846_v42  ;;  %v2220_v26 = vld [vmem:[#allocation2 + $0xb4] sm:$0xf]  ;;  %v10916_v42 = vld [vmem:[#allocation2 + $0x30] sm:$0xf]  ;;  %v2245_v33 = vld [vmem:[#allocation2 + $0x2c] sm:$0x1] }
 0x260   : > { %2209 = vst.msk [vmem:[#allocation2 + $0xa0] sm:$0xf] %vm1691_vm7, %v2017_v27  ;;  %2212 = vst [vmem:[#allocation2 + $0xa4] sm:$0x1] %v2211_v10  ;;  %v2059_v30 = vor.u32 %v2057_v56, %v2056_v14  ;;  %v2060_v50 = vrot.slane %v2056_v14, 4  ;;  %v2037_v25 = vshrl.u32 %v8349_v46, 16  ;;  %v8352_v43 = vpack.c.bf16 %v1573_v32, %v1573_v32 }
 0x261   : > { %v2040_v37 = vshll.u32 %v8349_v46, 16  ;;  %9661 = vrcp.f32 %v1475_v11  ;;  %8645 = vmatmul.mubr.msk.bf16.vlgmr.msra.gmra.mrb[64].mxu1 %vm676_vm1, %v7877_v36  ;;  %v2342_v35 = vrot.slane %v2341_v47, 4  ;;  %v2348_v31 = vshrl.u32 %v10811_v5, 16  ;;  %v10925_v39 = vld [vmem:[#allocation2 + $0x34] sm:$0xf] }
 0x262   : > { %v2228_v38 = vsel %vm10552_vm15, %v2059_v30, %v2227_v51  ;;  %v10920_v17 = vrot.slane %v2037_v25, 7  ;;  %v2354_v23 = vshll.u32 %v10813_v18, 16  ;;  %v2062_v0 = vshrl.u32 %v8352_v43, 16  ;;  %v10932_v19 = vld [vmem:[#allocation2 + $0x38] sm:$0x1] }
 0x263   : > { %2229 = vst [vmem:[#allocation2 + $0xc0] sm:$0xf] %v2228_v38  ;;  %v2065_v2 = vshll.u32 %v8352_v43, 16  ;;  %v2346_v60 = vrot.slane %v2344_v58, 5  ;;  %v7943_v44 = vrot.slane %v10910_v15, 9  ;;  %v2350_v61 = vrot.slane %v2348_v31, 4 }
 0x264   : > { %v2042_v34 = vor.u32 %v2040_v37, %v10920_v17  ;;  %v2043_v49 = vrot.slane %v10920_v17, 4  ;;  %v2356_v62 = vrot.slane %v2354_v23, 5  ;;  %v2064_v63 = vrot.slane %v2062_v0, 7  ;;  %v2231_v28 = vld [vmem:[#allocation2 + $0xc8] sm:$0x1] }
 0x265   : > { %v2347_v5 = vsel %vm10435_vm13, %v2342_v35, %v2346_v60  ;;  %v3266_v18 = vrot.slane %v10914_v16, 5  ;;  %v3269_v52 = vrot.slane %v2245_v33, 5  ;;  %v2351_v3 = vor.u32 %v2350_v61, %v2346_v60 }
 0x266   : > { %v2221_v55 = vsel %vm10552_vm15, %v2042_v34, %v2220_v26  ;;  %v7944_v56 = vrot.slane %v10916_v42, 9  ;;  %v3273_v4 = vrot.slane %v10925_v39, 5  ;;  %v2067_v21 = vor.u32 %v2065_v2, %v2064_v63 }
 0x267   : > { %2222 = vst [vmem:[#allocation2 + $0xb4] sm:$0xf] %v2221_v55  ;;  %v2069_v20 = vrot.slane %v2064_v63, 4  ;;  %v3267_v12 = vsel %vm10410_vm10, %v7943_v44, %v3266_v18  ;;  %v3268_v24 = vrot.slane %v3266_v18, 4  ;;  %v2352_v14 = vrot.slane %v2351_v3, 4 }
 0x268   : > { %v3274_v46 = vsel %vm10410_vm10, %v7944_v56, %v3273_v4  ;;  %v3275_v32 = vrot.slane %v3273_v4, 4  ;;  %v3276_v41 = vrot.slane %v10932_v19, 5  ;;  %v2068_v11 = vsel %vm10563_vm5, %v2060_v50, %v2067_v21  ;;  %v10965_v63 = vld [vmem:[#allocation2 + $0x3c] sm:$0xf]  ;;  %v10968_v55 = vld [vmem:[#allocation2 + $0x40] sm:$0xf] }
 0x269   : > { %v2232_v27 = vsel %vm10341_vm4, %v2069_v20, %v2231_v28  ;;  %v3270_v10 = vsel %vm10410_vm10, %v3268_v24, %v3269_v52  ;;  %v2359_v51 = vshrl.u32 %v10910_v15, 16  ;;  %2230 = vst.msk [vmem:[#allocation2 + $0xc4] sm:$0xf] %vm1691_vm7, %v2068_v11  ;;  %v2357_v36 = vsel %vm10435_vm13, %v2352_v14, %v2356_v62  ;;  %v10970_v21 = vld [vmem:[#allocation2 + $0x44] sm:$0x1] }
 0x26a   : > { %2233 = vst [vmem:[#allocation2 + $0xc8] sm:$0x1] %v2232_v27  ;;  %v7960_v47 = vcombine.low %v3267_v12, %v3270_v10  ;;  %v3277_v30 = vsel %vm10410_vm10, %v3275_v32, %v3276_v41  ;;  %v2362_v50 = vshll.u32 %v10910_v15, 16  ;;  %v7878_v37 = vcombine.low %v2347_v5, %v2357_v36  ;;  %v2224_v20 = vld [vmem:[#allocation2 + $0xbc] sm:$0x1] }
 0x26b   : > { %v9662_v25 = vpop.eup %9661  ;;  %v7961_v26 = vcombine.low %v3274_v46, %v3277_v30  ;;  %v2361_v43 = vrot.slane %v2359_v51, 4  ;;  %v2368_v35 = vshll.u32 %v10914_v16, 16  ;;  %v2372_v31 = vshrl.u32 %v10914_v16, 16  ;;  %v10977_v10 = vld [vmem:[#allocation2 + $0x48] sm:$0xf] }
 0x26c   : > { %v1571_v58 = vmul.f32 %v9662_v25, %v10828_v9  ;;  %8717 = vmatmul.mubr.msk.bf16.gmra.mrb[4].mxu0 %vm676_vm1, %v7960_v47  ;;  %v2364_v38 = vrot.slane %v2362_v50, 5  ;;  %v2378_v23 = vshll.u32 %v2245_v33, 16  ;;  %8648 = vmatprep.mubr.msk.bf16.mxu1 %vm676_vm1, %v7878_v37  ;;  %v2383_v2 = vshrl.u32 %v10916_v42, 16  ;;  %v10980_v50 = vld [vmem:[#allocation2 + $0x4c] sm:$0xf] }
 0x26d   : > { %8720 = vmatprep.mubr.msk.bf16.mxu0 %vm676_vm1, %v7961_v26  ;;  %v2370_v0 = vrot.slane %v2368_v35, 5  ;;  %v2386_v60 = vshll.u32 %v10916_v42, 16  ;;  %v2392_v44 = vshll.u32 %v10925_v39, 16  ;;  %v2374_v9 = vrot.slane %v2372_v31, 4  ;;  %v11175_v40 = vld [vmem:[#allocation2 + $0xa0] sm:$0xf] }
 0x26e   : > { %v8350_v34 = vpack.c.bf16 %v1571_v58, %v1571_v58  ;;  %v2365_v61 = vor.u32 %v2364_v38, %v2361_v43  ;;  %v2380_v62 = vrot.slane %v2378_v23, 5  ;;  %v2385_v5 = vrot.slane %v2383_v2, 4  ;;  %v10986_v43 = vld [vmem:[#allocation2 + $0x50] sm:$0x1]  ;;  %13096 = vst [vmem:[#allocation31_spill] sm:$0xff] %v11175_v40 }
 0x26f   : > { %v2388_v18 = vrot.slane %v2386_v60, 5  ;;  %v2394_v33 = vrot.slane %v2392_v44, 5  ;;  %v2396_v52 = vshrl.u32 %v10925_v39, 16  ;;  %v2375_v4 = vor.u32 %v2374_v9, %v2370_v0 }
 0x270   : > { %v2045_v28 = vshrl.u32 %v8350_v34, 16  ;;  %v2048_v3 = vshll.u32 %v8350_v34, 16  ;;  %v2366_v56 = vrot.slane %v2365_v61, 4  ;;  %v2402_v14 = vshll.u32 %v10932_v19, 16 }
 0x271   : > { %v2389_v12 = vor.u32 %v2388_v18, %v2385_v5  ;;  %v2398_v24 = vrot.slane %v2396_v52, 4  ;;  %v7945_v46 = vrot.slane %v10965_v63, 9  ;;  %v2376_v11 = vrot.slane %v2375_v4, 4 }
 0x272   : > { %v2047_v32 = vrot.slane %v2045_v28, 7  ;;  %v2371_v41 = vsel %vm10435_vm13, %v2366_v56, %v2370_v0  ;;  %v3280_v27 = vrot.slane %v10968_v55, 5  ;;  %v2404_v47 = vrot.slane %v2402_v14, 5 }
 0x273   : > { %v2390_v51 = vrot.slane %v2389_v12, 4  ;;  %v2399_v36 = vor.u32 %v2398_v24, %v2394_v33  ;;  %v3283_v30 = vrot.slane %v10970_v21, 5  ;;  %v2381_v37 = vsel %vm10435_vm13, %v2376_v11, %v2380_v62 }
 0x274   : > { %v2050_v25 = vor.u32 %v2048_v3, %v2047_v32  ;;  %v2052_v19 = vrot.slane %v2047_v32, 4  ;;  %v3281_v26 = vsel %vm10410_vm10, %v7945_v46, %v3280_v27  ;;  %v7879_v35 = vcombine.low %v2371_v41, %v2381_v37  ;;  %v11018_v46 = vld [vmem:[#allocation2 + $0x58] sm:$0xf] }
 0x275   : > { %v2395_v58 = vsel %vm10435_vm13, %v2390_v51, %v2394_v33  ;;  %v2400_v38 = vrot.slane %v2399_v36, 4  ;;  %v3282_v31 = vrot.slane %v3280_v27, 4  ;;  %v7946_v2 = vrot.slane %v10977_v10, 9  ;;  %v11023_v36 = vld [vmem:[#allocation2 + $0x54] sm:$0xf] }
 0x276   : > { %v2051_v23 = vsel %vm10563_vm5, %v2043_v49, %v2050_v25  ;;  %v2225_v0 = vsel %vm10341_vm4, %v2052_v19, %v2224_v20  ;;  %v3287_v60 = vrot.slane %v10980_v50, 5  ;;  %8649 = vmatmul.mubr.msk.bf16.gmra.mrb[68].mxu1 %vm676_vm1, %v7879_v35  ;;  %v3290_v6 = vrot.slane %v10986_v43, 5 }
 0x277   : > { %2223 = vst.msk [vmem:[#allocation2 + $0xb8] sm:$0xf] %vm1691_vm7, %v2051_v23  ;;  %2226 = vst [vmem:[#allocation2 + $0xbc] sm:$0x1] %v2225_v0  ;;  %v2405_v44 = vsel %vm10435_vm13, %v2400_v38, %v2404_v47  ;;  %v3284_v17 = vsel %vm10410_vm10, %v3282_v31, %v3283_v30  ;;  %v2407_v49 = vshrl.u32 %v10965_v63, 16  ;;  %v2410_v18 = vshll.u32 %v10965_v63, 16 }
 0x278   : > { %v7880_v34 = vcombine.low %v2395_v58, %v2405_v44  ;;  %v7962_v61 = vcombine.low %v3281_v26, %v3284_v17  ;;  %v3288_v9 = vsel %vm10410_vm10, %v7946_v2, %v3287_v60  ;;  %v3289_v62 = vrot.slane %v3287_v60, 4  ;;  %v2257_v47 = vld [vmem:[#allocation2 + $0x5c] sm:$0x1]  ;;  %v11028_v2 = vld [vmem:[#allocation2 + $0x10] sm:$0xf] }
 0x279   : > { %v2409_v5 = vrot.slane %v2407_v49, 4  ;;  %v2416_v33 = vshll.u32 %v10968_v55, 16  ;;  %v2420_v52 = vshrl.u32 %v10968_v55, 16  ;;  %v2426_v3 = vshll.u32 %v10970_v21, 16 }
 0x27a   : > { %8652 = vmatprep.mubr.msk.bf16.mxu1 %vm676_vm1, %v7880_v34  ;;  %8721 = vmatmul.mubr.msk.bf16.gmra.mrb[8].mxu0 %vm676_vm1, %v7962_v61  ;;  %v3291_v28 = vsel %vm10410_vm10, %v3289_v62, %v3290_v6  ;;  %v2431_v56 = vshrl.u32 %v10977_v10, 16  ;;  %v2434_v4 = vshll.u32 %v10977_v10, 16  ;;  %v2412_v12 = vrot.slane %v2410_v18, 5  ;;  %v11038_v61 = vld [vmem:[#allocation2 + $0xc] sm:$0xf] }
 0x27b   : > { %v7963_v20 = vcombine.low %v3288_v9, %v3291_v28  ;;  %v2418_v24 = vrot.slane %v2416_v33, 5  ;;  %v2422_v14 = vrot.slane %v2420_v52, 4  ;;  %v2440_v11 = vshll.u32 %v10980_v50, 16  ;;  %v11040_v9 = vld [vmem:[#allocation2 + $0x60] sm:$0xf] }
 0x27c   : > { %v2433_v32 = vrot.slane %v2431_v56, 4  ;;  %v2436_v41 = vrot.slane %v2434_v4, 5  ;;  %v2413_v27 = vor.u32 %v2412_v12, %v2409_v5  ;;  %v2444_v21 = vshrl.u32 %v10980_v50, 16  ;;  %v11054_v12 = vld [vmem:[#allocation2 + $0x64] sm:$0xf] }
 0x27d   : > { %8724 = vmatprep.mubr.msk.bf16.mxu0 %vm676_vm1, %v7963_v20  ;;  %v2423_v51 = vor.u32 %v2422_v14, %v2418_v24  ;;  %v2428_v30 = vrot.slane %v2426_v3, 5  ;;  %v2442_v19 = vrot.slane %v2440_v11, 5  ;;  %v3294_v37 = vrot.slane %v11018_v46, 5 }
 0x27e   : > { %v2437_v25 = vor.u32 %v2436_v41, %v2433_v32  ;;  %v2414_v26 = vrot.slane %v2413_v27, 4  ;;  %v2446_v58 = vrot.slane %v2444_v21, 4  ;;  %v2450_v38 = vshll.u32 %v10986_v43, 16  ;;  %v11331_v57 = vld [vmem:[#allocation2 + $0xb8] sm:$0xf] }
 0x27f   : > { %v2424_v35 = vrot.slane %v2423_v51, 4  ;;  %v7947_v31 = vrot.slane %v11023_v36, 9  ;;  %v3296_v23 = vrot.slane %v3294_v37, 4  ;;  %v3297_v0 = vrot.slane %v2257_v47, 5 }
 0x280   : > { %v2419_v60 = vsel %vm10435_vm13, %v2414_v26, %v2418_v24  ;;  %v2438_v17 = vrot.slane %v2437_v25, 4  ;;  %v2447_v6 = vor.u32 %v2446_v58, %v2442_v19  ;;  %v2452_v5 = vrot.slane %v2450_v38, 5  ;;  %v11062_v58 = vld [vmem:[#allocation2 + $0x1c] sm:$0xf] }
 0x281   : > { %v2429_v44 = vsel %vm10435_vm13, %v2424_v35, %v2428_v30  ;;  %v3295_v34 = vsel %vm10410_vm10, %v7947_v31, %v3294_v37  ;;  %v3298_v43 = vsel %vm10410_vm10, %v3296_v23, %v3297_v0  ;;  %v7990_v33 = vcombine.low %v11038_v61, %v11028_v2  ;;  %v2260_v30 = vld [vmem:[#allocation2 + $0x68] sm:$0x1]  ;;  %v11064_v23 = vld [vmem:[#allocation2 + $0x18] sm:$0xf] }
 0x282   : > { %v7881_v49 = vcombine.low %v2419_v60, %v2429_v44  ;;  %v2448_v62 = vrot.slane %v2447_v6, 4  ;;  %v7964_v18 = vcombine.low %v3295_v34, %v3298_v43  ;;  %v2455_v52 = vshrl.u32 %v11023_v36, 16  ;;  %v11066_v0 = vld [vmem:[#allocation2 + $0x28] sm:$0xf]  ;;  %v11068_v6 = vld [vmem:[#allocation2 + $0x24] sm:$0xf] }
 0x283   : > { %v2458_v28 = vshll.u32 %v11023_v36, 16  ;;  %v2464_v3 = vshll.u32 %v11018_v46, 16  ;;  %v2468_v56 = vshrl.u32 %v11018_v46, 16  ;;  %v2443_v4 = vsel %vm10435_vm13, %v2438_v17, %v2442_v19 }
 0x284   : > { %8653 = vmatmul.mubr.msk.bf16.gmra.mrb[72].mxu1 %vm676_vm1, %v7881_v49  ;;  %v2453_v20 = vsel %vm10435_vm13, %v2448_v62, %v2452_v5  ;;  %8725 = vmatmul.mubr.msk.bf16.gmra.mrb[12].mxu0 %vm676_vm1, %v7964_v18  ;;  %v2479_v24 = vshrl.u32 %v11040_v9, 16  ;;  %v2482_v14 = vshll.u32 %v11040_v9, 16  ;;  %v2457_v41 = vrot.slane %v2455_v52, 4  ;;  %v11072_v62 = vld [vmem:[#allocation2 + $0x6c] sm:$0xf] }
 0x285   : > { %v7882_v32 = vcombine.low %v2443_v4, %v2453_v20  ;;  %8746 = vmatprep.mubr.msk.bf16.mxu0 %vm676_vm1, %v7990_v33  ;;  %v2460_v11 = vrot.slane %v2458_v28, 5  ;;  %v2466_v27 = vrot.slane %v2464_v3, 5  ;;  %v2470_v51 = vrot.slane %v2468_v56, 4  ;;  %v11074_v5 = vld [vmem:[#allocation2 + $0x70] sm:$0xf] }
 0x286   : > { %v2474_v21 = vshll.u32 %v2257_v47, 16  ;;  %v2481_v25 = vrot.slane %v2479_v24, 4  ;;  %v2484_v19 = vrot.slane %v2482_v14, 5  ;;  %v2488_v26 = vshll.u32 %v11054_v12, 16  ;;  %v11080_v3 = vld [vmem:[#allocation2 + $0x74] sm:$0x1] }
 0x287   : > { %8656 = vmatprep.mubr.msk.bf16.mxu1 %vm676_vm1, %v7882_v32  ;;  %v2461_v37 = vor.u32 %v2460_v11, %v2457_v41  ;;  %v2492_v35 = vshrl.u32 %v11054_v12, 16  ;;  %v2471_v38 = vor.u32 %v2470_v51, %v2466_v27  ;;  %v2498_v17 = vshll.u32 %v2260_v30, 16  ;;  %13087 = vst [vmem:[#allocation22_spill] sm:$0xff] %v11080_v3  ;;  %v11085_v56 = vld [vmem:[%s12974_s7 + $0xa] sm:$0x3] }
 0x288   : > { %v2485_v31 = vor.u32 %v2484_v19, %v2481_v25  ;;  %v2490_v47 = vrot.slane %v2488_v26, 5  ;;  %v2476_v34 = vrot.slane %v2474_v21, 5  ;;  %v7991_v43 = vcombine.low %v11064_v23, %v11062_v58  ;;  %v11094_v41 = vld [vmem:[#allocation2 + $0x78] sm:$0xf]  ;;  %v11100_v30 = vld [vmem:[#allocation2 + $0x7c] sm:$0xf] }
 0x289   : > { %v2462_v60 = vrot.slane %v2461_v37, 4  ;;  %v2494_v44 = vrot.slane %v2492_v35, 4  ;;  %v2472_v49 = vrot.slane %v2471_v38, 4  ;;  %v4506_v52 = vsel %vm725_vm0, %v10851_v1, 0  ;;  %13088 = vst [vmem:[#allocation23_spill] sm:$0xff] %v11094_v41 }
 0x28a   : > { %v2486_v18 = vrot.slane %v2485_v31, 4  ;;  %v7992_v28 = vcombine.low %v11068_v6, %v11066_v0  ;;  %v2500_v14 = vrot.slane %v2498_v17, 5  ;;  %v2503_v32 = vshrl.u32 %v11072_v62, 16 }
 0x28b   : > { %v2495_v33 = vor.u32 %v2494_v44, %v2490_v47  ;;  %v2467_v4 = vsel %vm10435_vm13, %v2462_v60, %v2466_v27  ;;  %v2477_v20 = vsel %vm10435_vm13, %v2472_v49, %v2476_v34  ;;  %v2506_v11 = vshll.u32 %v11072_v62, 16  ;;  %v11109_v60 = vld [vmem:[#allocation2 + $0x34] sm:$0xf]  ;;  %v11111_v44 = vld [vmem:[#allocation2 + $0x80] sm:$0x1] }
 0x28c   : > { %8747 = vmatmul.mubr.msk.bf16.vlgmr.msra.gmra.mrb[0].mxu0 %vm676_vm1, %v7991_v43  ;;  %v7883_v24 = vcombine.low %v2467_v4, %v2477_v20  ;;  %v2512_v51 = vshll.u32 %v11074_v5, 16  ;;  %v2516_v27 = vshrl.u32 %v11074_v5, 16  ;;  %v2522_v21 = vshll.u32 %v11080_v3, 16  ;;  %13089 = vst [vmem:[#allocation24_spill] sm:$0xff] %v11111_v44 }
 0x28d   : > { %v2496_v1 = vrot.slane %v2495_v33, 4  ;;  %8779 = vmatpush3.bf16.msra.mxu0 %v4506_v52  ;;  %8750 = vmatprep.mubr.msk.bf16.mxu0 %vm676_vm1, %v7992_v28  ;;  %v2491_v25 = vsel %vm10435_vm13, %v2486_v18, %v2490_v47  ;;  %v2505_v37 = vrot.slane %v2503_v32, 4  ;;  %v2508_v35 = vrot.slane %v2506_v11, 5  ;;  %v11118_v52 = vld [vmem:[#allocation2 + $0x30] sm:$0xf] }
 0x28e   : > { %9314 = vmatprep.subr.msk.bf16.mxu0 %vm725_vm0, %v11085_v56  ;;  %8657 = vmatmul.mubr.msk.bf16.gmra.mrb[76].mxu1 %vm676_vm1, %v7883_v24  ;;  %v2514_v38 = vrot.slane %v2512_v51, 5  ;;  %v2518_v31 = vrot.slane %v2516_v27, 4  ;;  %v2527_v17 = vshrl.u32 %v11094_v41, 16  ;;  %v2530_v49 = vshll.u32 %v11094_v41, 16 }
 0x28f   : > { %v2501_v19 = vsel %vm10435_vm13, %v2496_v1, %v2500_v14  ;;  %v2536_v34 = vshll.u32 %v11100_v30, 16  ;;  %v2509_v47 = vor.u32 %v2508_v35, %v2505_v37  ;;  %v2524_v18 = vrot.slane %v2522_v21, 5  ;;  %v11122_v1 = vld [vmem:[#allocation2 + $0x40] sm:$0xf]  ;;  %v11126_v21 = vld [vmem:[#allocation2 + $0x3c] sm:$0xf] }
 0x290   : > { %v7884_v26 = vcombine.low %v2491_v25, %v2501_v19  ;;  %v2519_v43 = vor.u32 %v2518_v31, %v2514_v38  ;;  %v2540_v33 = vshrl.u32 %v11100_v30, 16  ;;  %v2529_v28 = vrot.slane %v2527_v17, 4  ;;  %v11128_v25 = vld [vmem:[#allocation2 + $0x84] sm:$0xf]  ;;  %v11136_v31 = vld [vmem:[#allocation2 + $0x88] sm:$0xf] }
 0x291   : > { %v2532_v4 = vrot.slane %v2530_v49, 5  ;;  %v2538_v20 = vrot.slane %v2536_v34, 5  ;;  %v7993_v24 = vcombine.low %v11118_v52, %v11109_v60  ;;  %v2510_v14 = vrot.slane %v2509_v47, 4  ;;  %13090 = vst [vmem:[#allocation25_spill] sm:$0xff] %v11128_v25  ;;  %13091 = vst [vmem:[#allocation26_spill] sm:$0xff] %v11136_v31 }
 0x292   : > { %8660 = vmatprep.mubr.msk.bf16.mxu1 %vm676_vm1, %v7884_v26  ;;  %v2520_v32 = vrot.slane %v2519_v43, 4  ;;  %v2542_v11 = vrot.slane %v2540_v33, 4  ;;  %v2546_v51 = vshll.u32 %v11111_v44, 16  ;;  %v7994_v35 = vcombine.low %v11126_v21, %v11122_v1  ;;  %v11138_v34 = vld [vmem:[#allocation2 + $0x90] sm:$0xf] }
 0x293   : > { %v2533_v27 = vor.u32 %v2532_v4, %v2529_v28  ;;  %v2515_v19 = vsel %vm10435_vm13, %v2510_v14, %v2514_v38  ;;  %13092 = vst [vmem:[#allocation27_spill] sm:$0xff] %v11138_v34  ;;  %v2269_v33 = vld [vmem:[#allocation2 + $0x8c] sm:$0x1]  ;;  %v2551_v38 = vshrl.u32 %v11128_v25, 16  ;;  %v2554_v28 = vshll.u32 %v11128_v25, 16 }
 0x294   : > { %8751 = vmatmul.mubr.msk.bf16.gmra.mrb[4].mxu0 %vm676_vm1, %v7993_v24  ;;  %v2525_v37 = vsel %vm10435_vm13, %v2520_v32, %v2524_v18  ;;  %v2543_v26 = vor.u32 %v2542_v11, %v2538_v20  ;;  %v2548_v43 = vrot.slane %v2546_v51, 5  ;;  %v2560_v4 = vshll.u32 %v11136_v31, 16  ;;  %v11148_v14 = vld [vmem:[#allocation2 + $0x94] sm:$0xf]  ;;  %v11336_v25 = vld [vmem:[#allocation2 + $0xa8] sm:$0xf] }
 0x295   : > { %v7885_v17 = vcombine.low %v2515_v19, %v2525_v37  ;;  %v2534_v49 = vrot.slane %v2533_v27, 4  ;;  %8754 = vmatprep.mubr.msk.bf16.mxu0 %vm676_vm1, %v7994_v35  ;;  %v2564_v24 = vshrl.u32 %v11136_v31, 16  ;;  %13093 = vst [vmem:[#allocation28_spill] sm:$0xff] %v11148_v14  ;;  %v2553_v11 = vrot.slane %v2551_v38, 4  ;;  %v11153_v19 = vld [vmem:[#allocation2 + $0x4c] sm:$0xf] }
 0x296   : > { %v2544_v47 = vrot.slane %v2543_v26, 4  ;;  %v2556_v51 = vrot.slane %v2554_v28, 5  ;;  %v2575_v27 = vshrl.u32 %v11138_v34, 16  ;;  %v2562_v26 = vrot.slane %v2560_v4, 5  ;;  %v11165_v28 = vld [vmem:[#allocation2 + $0x58] sm:$0xf] }
 0x297   : > { %8661 = vmatmul.mubr.msk.bf16.gmra.mrb[80].mxu1 %vm676_vm1, %v7885_v17  ;;  %v2539_v18 = vsel %vm10435_vm13, %v2534_v49, %v2538_v20  ;;  %v2566_v35 = vrot.slane %v2564_v24, 4  ;;  %v2570_v17 = vshll.u32 %v2269_v33, 16  ;;  %v11155_v20 = vld [vmem:[#allocation2 + $0x98] sm:$0x1]  ;;  %v2578_v48 = vshll.u32 %v11138_v34, 16 }
 0x298   : > { %v2549_v32 = vsel %vm10435_vm13, %v2544_v47, %v2548_v43  ;;  %13094 = vst [vmem:[#allocation29_spill] sm:$0xff] %v11155_v20  ;;  %v2557_v49 = vor.u32 %v2556_v51, %v2553_v11  ;;  %v2577_v29 = vrot.slane %v2575_v27, 4  ;;  %v2584_v53 = vshll.u32 %v11148_v14, 16 }
 0x299   : > { %v7886_v37 = vcombine.low %v2539_v18, %v2549_v32  ;;  %v2567_v47 = vor.u32 %v2566_v35, %v2562_v26  ;;  %v2588_v43 = vshrl.u32 %v11148_v14, 16  ;;  %v7995_v38 = vcombine.low %v11159_v8, %v11153_v19  ;;  %v11168_v32 = vld [vmem:[#allocation2 + $0x54] sm:$0xf] }
 0x29a   : > { %v2558_v33 = vrot.slane %v2557_v49, 4  ;;  %v2580_v18 = vrot.slane %v2578_v48, 5  ;;  %v2586_v4 = vrot.slane %v2584_v53, 5  ;;  %v2594_v24 = vshll.u32 %v11155_v20, 16  ;;  %v11201_v20 = vld [vmem:[#allocation2 + $0xb0] sm:$0x1] }
 0x29b   : > { %8664 = vmatprep.mubr.msk.bf16.mxu1 %vm676_vm1, %v7886_v37  ;;  %v2568_v11 = vrot.slane %v2567_v47, 4  ;;  %v2572_v51 = vrot.slane %v2570_v17, 5  ;;  %v2590_v27 = vrot.slane %v2588_v43, 4  ;;  %v11171_v37 = vld [vmem:[#allocation2 + $0x9c] sm:$0xf]  ;;  %v7996_v13 = vcombine.low %v11168_v32, %v11165_v28  ;;  %13100 = vst [vmem:[#allocation35_spill] sm:$0xff] %v11201_v20 }
 0x29c   : > { %8755 = vmatmul.mubr.msk.bf16.gmra.mrb[8].mxu0 %vm676_vm1, %v7995_v38  ;;  %13095 = vst [vmem:[#allocation30_spill] sm:$0xff] %v11171_v37  ;;  %v2581_v35 = vor.u32 %v2580_v18, %v2577_v29  ;;  %v2563_v48 = vsel %vm10435_vm13, %v2558_v33, %v2562_v26  ;;  %v11181_v47 = vld [vmem:[#allocation2 + $0xa4] sm:$0x1]  ;;  %v11183_v17 = vld [vmem:[#allocation2 + $0xa8] sm:$0xf]  ;;  %v2596_v45 = vrot.slane %v2594_v24, 5 }
 0x29d   : > { %v2573_v53 = vsel %vm10435_vm13, %v2568_v11, %v2572_v51  ;;  %v2591_v49 = vor.u32 %v2590_v27, %v2586_v4  ;;  %13097 = vst [vmem:[#allocation32_spill] sm:$0xff] %v11181_v47  ;;  %13098 = vst [vmem:[#allocation33_spill] sm:$0xff] %v11183_v17  ;;  %8758 = vmatprep.mubr.msk.bf16.mxu0 %vm676_vm1, %v7996_v13  ;;  %v2599_v29 = vshrl.u32 %v11171_v37, 16  ;;  %v2602_v59 = vshll.u32 %v11171_v37, 16  ;;  %v11190_v11 = vld [vmem:[#allocation2 + $0x64] sm:$0xf] }
 0x29e   : > { %v7887_v43 = vcombine.low %v2563_v48, %v2573_v53  ;;  %v2582_v38 = vrot.slane %v2581_v35, 4  ;;  %v2608_v26 = vshll.u32 %v11175_v40, 16  ;;  %v2612_v33 = vshrl.u32 %v11175_v40, 16  ;;  %v11196_v13 = vld [vmem:[#allocation2 + $0xac] sm:$0xf] }
 0x29f   : > { %v2592_v18 = vrot.slane %v2591_v49, 4  ;;  %v2601_v27 = vrot.slane %v2599_v29, 4  ;;  %v2618_v24 = vshll.u32 %v11181_v47, 16  ;;  %13099 = vst [vmem:[#allocation34_spill] sm:$0xff] %v11196_v13  ;;  %v2623_v35 = vshrl.u32 %v11183_v17, 16 }
 0x2a0   : > { %8665 = vmatmul.mubr.msk.bf16.gmra.mrb[84].mxu1 %vm676_vm1, %v7887_v43  ;;  %v2587_v51 = vsel %vm10435_vm13, %v2582_v38, %v2586_v4  ;;  %v2604_v53 = vrot.slane %v2602_v59, 5  ;;  %v2610_v49 = vrot.slane %v2608_v26, 5  ;;  %v2614_v7 = vrot.slane %v2612_v33, 4  ;;  %v11206_v40 = vld [vmem:[#allocation2 + $0x60] sm:$0xf] }
 0x2a1   : > { %v2597_v48 = vsel %vm10435_vm13, %v2592_v18, %v2596_v45  ;;  %v2625_v43 = vrot.slane %v2623_v35, 4  ;;  %v2626_v37 = vshll.u32 %v11183_v17, 16  ;;  %v2632_v29 = vshll.u32 %v11196_v13, 16  ;;  %v11212_v33 = vld [vmem:[#allocation2 + $0x70] sm:$0xf] }
 0x2a2   : > { %v7888_v44 = vcombine.low %v2587_v51, %v2597_v48  ;;  %v2605_v4 = vor.u32 %v2604_v53, %v2601_v27  ;;  %v2615_v38 = vor.u32 %v2614_v7, %v2610_v49  ;;  %v2636_v47 = vshrl.u32 %v11196_v13, 16  ;;  %v11215_v53 = vld [vmem:[#allocation2 + $0x6c] sm:$0xf]  ;;  %v11217_v17 = vld [vmem:[#allocation2 + $0xb4] sm:$0xf] }
 0x2a3   : > { %v2620_v45 = vrot.slane %v2618_v24, 5  ;;  %v2628_v59 = vrot.slane %v2626_v37, 5  ;;  %v2642_v18 = vshll.u32 %v11201_v20, 16  ;;  %v7997_v26 = vcombine.low %v11206_v40, %v11190_v11  ;;  %13101 = vst [vmem:[#allocation36_spill] sm:$0xff] %v11217_v17 }
 0x2a4   : > { %8668 = vmatprep.mubr.msk.bf16.mxu1 %vm676_vm1, %v7888_v44  ;;  %v2606_v51 = vrot.slane %v2605_v4, 4  ;;  %v2616_v27 = vrot.slane %v2615_v38, 4  ;;  %v2634_v7 = vrot.slane %v2632_v29, 5  ;;  %v2638_v35 = vrot.slane %v2636_v47, 4  ;;  %v11225_v38 = vld [vmem:[#allocation2 + $0xb8] sm:$0xf] }
 0x2a5   : > { %v2629_v48 = vor.u32 %v2628_v59, %v2625_v43  ;;  %8759 = vmatmul.mubr.msk.bf16.gmra.mrb[12].mxu0 %vm676_vm1, %v7997_v26  ;;  %v7998_v4 = vcombine.low %v11215_v53, %v11212_v33  ;;  %13102 = vst [vmem:[#allocation37_spill] sm:$0xff] %v11225_v38  ;;  %v11228_v59 = vld [vmem:[#allocation2 + $0xbc] sm:$0x1]  ;;  %v2644_v20 = vrot.slane %v2642_v18, 5  ;;  %v11241_v18 = vld [vmem:[#allocation2 + $0x78] sm:$0xf] }
 0x2a6   : > { %v2611_v44 = vsel %vm10435_vm13, %v2606_v51, %v2610_v49  ;;  %v2621_v37 = vsel %vm10435_vm13, %v2616_v27, %v2620_v45  ;;  %v2639_v24 = vor.u32 %v2638_v35, %v2634_v7  ;;  %13103 = vst [vmem:[#allocation38_spill] sm:$0xff] %v11228_v59  ;;  %v2647_v49 = vshrl.u32 %v11217_v17, 16  ;;  %v11233_v51 = vld [vmem:[#allocation2 + $0x7c] sm:$0xf]  ;;  %13105 = vst [vmem:[#allocation40_spill] sm:$0xff] %v11241_v18 }
 0x2a7   : > { %v7889_v43 = vcombine.low %v2611_v44, %v2621_v37  ;;  %v2630_v29 = vrot.slane %v2629_v48, 4  ;;  %8762 = vmatprep.mubr.msk.bf16.mxu0 %vm676_vm1, %v7998_v4  ;;  %v2650_v45 = vshll.u32 %v11217_v17, 16  ;;  %13104 = vst [vmem:[#allocation39_spill] sm:$0xff] %v11233_v51  ;;  %v2656_v48 = vshll.u32 %v11225_v38, 16  ;;  %v11246_v17 = vld [vmem:[#allocation2 + $0x88] sm:$0xf] }
 0x2a8   : > { %v2640_v26 = vrot.slane %v2639_v24, 4  ;;  %v2660_v44 = vshrl.u32 %v11225_v38, 16  ;;  %v2649_v24 = vrot.slane %v2647_v49, 4  ;;  %v2666_v47 = vshll.u32 %v11228_v59, 16  ;;  %13106 = vst [vmem:[#allocation41_spill] sm:$0xff] %v11246_v17 }
 0x2a9   : > { %8669 = vmatmul.mubr.msk.bf16.gmra.mrb[88].mxu1 %vm676_vm1, %v7889_v43  ;;  %v2635_v35 = vsel %vm10435_vm13, %v2630_v29, %v2634_v7  ;;  %v2652_v4 = vrot.slane %v2650_v45, 5  ;;  %v2658_v43 = vrot.slane %v2656_v48, 5  ;;  %v7999_v7 = vcombine.low %v11241_v18, %v11233_v51  ;;  %v9920_v45 = vld [vmem:[%s12974_s7] sm:$0x3]  ;;  %v9927_v59 = vld [vmem:[#allocation2 + $0x1c] sm:$0xf] }
 0x2aa   : > { %v2645_v37 = vsel %vm10435_vm13, %v2640_v26, %v2644_v20  ;;  %v2662_v13 = vrot.slane %v2660_v44, 4  ;;  %v4037_v29 = vshrl.u32 %v11028_v2, 16  ;;  %v11253_v20 = vld [vmem:[#allocation2 + $0x84] sm:$0xf]  ;;  %v2668_v34 = vrot.slane %v2666_v47, 5 }
 0x2ab   : > { %v7890_v27 = vcombine.low %v2635_v35, %v2645_v37  ;;  %v2653_v14 = vor.u32 %v2652_v4, %v2649_v24  ;;  %13107 = vst [vmem:[#allocation42_spill] sm:$0xff] %v11253_v20  ;;  %v3061_v35 = vsel %vm725_vm0, %v9920_v45, 0  ;;  %v8000_v48 = vcombine.low %v11253_v20, %v11246_v17  ;;  %v9921_v45 = vld [vmem:[%s12974_s7 + $0x4] sm:$0x3]  ;;  %v11285_v37 = vld [vmem:[#allocation2 + $0xa0] sm:$0xf] }
 0x2ac   : > { %v2663_v49 = vor.u32 %v2662_v13, %v2658_v43  ;;  %8677 = vmatpush3.bf16.msra.mxu1 %v3061_v35  ;;  %v11278_v13 = vld [vmem:[#allocation2 + $0x94] sm:$0xf]  ;;  %v11290_v26 = vld [vmem:[#allocation2 + $0x90] sm:$0xf]  ;;  %v9926_v24 = vld [vmem:[#allocation2 + $0x18] sm:$0xf] }
 0x2ad   : > { %8672 = vmatprep.mubr.msk.bf16.mxu1 %vm676_vm1, %v7890_v27  ;;  %8763 = vmatmul.mubr.msk.bf16.gmra.mrb[16].mxu0 %vm676_vm1, %v7999_v7  ;;  %v2654_v4 = vrot.slane %v2653_v14, 4  ;;  %v9922_v27 = vld [vmem:[#allocation2 + $0x4] sm:$0xf]  ;;  %13108 = vst [vmem:[#allocation43_spill] sm:$0xff] %v11290_v26  ;;  %v11319_v47 = vld [vmem:[#allocation2 + $0x14] sm:$0x1]  ;;  %v7910_v3 = vcombine.low %v9926_v24, %v9927_v59 }
 0x2ae   : > { %v2664_v7 = vrot.slane %v2663_v49, 4  ;;  %8766 = vmatprep.mubr.msk.bf16.mxu0 %vm676_vm1, %v8000_v48  ;;  %9311 = vmatprep.subr.msk.bf16.mxu1 %vm725_vm0, %v9921_v45  ;;  %v9923_v45 = vld [vmem:[#allocation2] sm:$0xf]  ;;  %13112 = vst [vmem:[#allocation45_spill] sm:$0xff] %v11319_v47  ;;  %v13113_v35 = vshrl.u32 %v11062_v58, 16  ;;  %v13115_v31 = vshll.u32 %v11064_v23, 16 }
 0x2af   : > { %v2659_v49 = vsel %vm10435_vm13, %v2654_v4, %v2658_v43  ;;  %v7908_v44 = vcombine.low %v9923_v45, %v9922_v27  ;;  %v8001_v4 = vcombine.low %v11290_v26, %v11278_v13  ;;  %v11297_v27 = vld [vmem:[#allocation2 + $0x9c] sm:$0xf]  ;;  %v11329_v43 = vld [vmem:[#allocation2 + $0xac] sm:$0xf]  ;;  %v4081_v59 = vshll.u32 %v11066_v0, 16 }
 0x2b0   : > { %v2669_v48 = vsel %vm10435_vm13, %v2664_v7, %v2668_v34  ;;  %13109 = vst [vmem:[#allocation44_spill] sm:$0xff] %v11297_v27  ;;  %v4053_v20 = vrot.slane %v13115_v31, 5  ;;  %v8003_v24 = vcombine.low %v11336_v25, %v11329_v43  ;;  %v11367_v51 = vld [vmem:[#allocation2 + $0x2c] sm:$0x1] }
 0x2b1   : > { %v7891_v38 = vcombine.low %v2659_v49, %v2669_v48  ;;  %v8002_v49 = vcombine.low %v11297_v27, %v11285_v37  ;;  %v13111_v48 = vshll.u32 %v11038_v61, 16  ;;  %v4083_v41 = vrot.slane %v4081_v59, 5 }
 0x2b3   : > { %8673 = vmatmul.mubr.msk.bf16.gmra.mrb[92].mxu1 %vm676_vm1, %v7891_v38  ;;  %v13110_v38 = vshrl.u32 %v11038_v61, 16  ;;  %v4029_v34 = vrot.slane %v13111_v48, 5  ;;  %v9924_v61 = vld [vmem:[#allocation2 + $0xc] sm:$0xf]  ;;  %v9925_v48 = vld [vmem:[#allocation2 + $0x10] sm:$0xf] }
 0x2b4   : > { %8678 = vmatprep.mubr.msk.bf16.mxu1 %vm676_vm1, %v7908_v44  ;;  %v4033_v44 = vshll.u32 %v11028_v2, 16  ;;  %v7909_v14 = vcombine.low %v9924_v61, %v9925_v48  ;;  %v13114_v61 = vshrl.u32 %v11064_v23, 16  ;;  %v13117_v23 = vshrl.u32 %v11068_v6, 16 }
 0x2b5   : > { %8767 = vmatmul.mubr.msk.bf16.gmra.mrb[20].mxu0 %vm676_vm1, %v8001_v4  ;;  %v4026_v7 = vrot.slane %v13110_v38, 4  ;;  %v4039_v4 = vrot.slane %v4037_v29, 4  ;;  %v4057_v29 = vshll.u32 %v11062_v58, 16  ;;  %v4043_v38 = vshll.u32 %v11319_v47, 16 }
 0x2b6   : > { %8770 = vmatprep.mubr.msk.bf16.mxu0 %vm676_vm1, %v8002_v49  ;;  %v4035_v2 = vrot.slane %v4033_v44, 5  ;;  %v4063_v49 = vrot.slane %v13113_v35, 4  ;;  %v4050_v48 = vrot.slane %v13114_v61, 4  ;;  %v11346_v44 = vld [vmem:[#allocation2 + $0xb4] sm:$0xf]  ;;  %v4074_v31 = vrot.slane %v13117_v23, 4 }
 0x2b7   : > { %v4030_v45 = vor.u32 %v4029_v34, %v4026_v7  ;;  %13116 = vst [vmem:[#allocation46_spill] sm:$0xff] %v11346_v44  ;;  %v11348_v35 = vrot.slane %v4057_v29, 5  ;;  %v8004_v7 = vcombine.low %v11346_v44, %v11331_v57  ;;  %v11354_v61 = vld [vmem:[#allocation2 + $0x20] sm:$0x1]  ;;  %v13119_v47 = vshrl.u32 %v11066_v0, 16 }
 0x2b8   : > { %v4040_v58 = vor.u32 %v4039_v4, %v4035_v2  ;;  %v4045_v18 = vrot.slane %v4043_v38, 5  ;;  %v4054_v23 = vor.u32 %v4053_v20, %v4050_v48  ;;  %v4067_v0 = vshll.u32 %v11354_v61, 16 }
 0x2b9   : > { %v4064_v29 = vor.u32 %v4063_v49, %v11348_v35  ;;  %v4087_v26 = vrot.slane %v13119_v47, 4  ;;  %v4031_v17 = vrot.slane %v4030_v45, 4  ;;  %v7911_v20 = vcombine.low %v10910_v15, %v10914_v16 }
 0x2ba   : > { %v4041_v4 = vrot.slane %v4040_v58, 4  ;;  %v4091_v58 = vshll.u32 %v11367_v51, 16  ;;  %v4055_v16 = vrot.slane %v4054_v23, 4  ;;  %v13122_v49 = vshll.u32 %v11118_v52, 16 }
 0x2bb   : > { %8679 = vmatmul.mubr.msk.bf16.vlgmr.msra.gmra.mrb[64].mxu1 %vm676_vm1, %v7909_v14  ;;  %v13118_v14 = vshll.u32 %v11068_v6, 16  ;;  %v4088_v38 = vor.u32 %v4087_v26, %v4083_v41  ;;  %v4065_v48 = vrot.slane %v4064_v29, 4  ;;  %v4036_v15 = vsel %vm10435_vm13, %v4031_v17, %v4035_v2 }
 0x2bc   : > { %8682 = vmatprep.mubr.msk.bf16.mxu1 %vm676_vm1, %v7910_v3  ;;  %9017 = vmatpush3.bf16.msra.mxu1 %v10408_v54  ;;  %v4046_v45 = vsel %vm10435_vm13, %v4041_v4, %v4045_v18  ;;  %v11381_v54 = vld [vmem:[#allocation2 + $0xc0] sm:$0xf]  ;;  %v4069_v26 = vrot.slane %v4067_v0, 5  ;;  %v11391_v4 = vld [vmem:[#allocation2 + $0x38] sm:$0x1]  ;;  %v4101_v3 = vrot.slane %v13122_v49, 5 }
 0x2bd   : > { %8771 = vmatmul.mubr.msk.bf16.gmra.mrb[24].mxu0 %vm676_vm1, %v8003_v24  ;;  %v4077_v34 = vrot.slane %v13118_v14, 5  ;;  %v11373_v24 = vld [vmem:[#allocation2 + $0xc4] sm:$0xf]  ;;  %v7912_v14 = vcombine.low %v10916_v42, %v10925_v39  ;;  %v8023_v18 = vcombine.low %v4036_v15, %v4046_v45  ;;  %v4089_v6 = vrot.slane %v4088_v38, 4 }
 0x2be   : > { %8774 = vmatprep.mubr.msk.bf16.mxu0 %vm676_vm1, %v8004_v7  ;;  %v4105_v7 = vshll.u32 %v11109_v60, 16  ;;  %v8005_v47 = vcombine.low %v11381_v54, %v11373_v24  ;;  %v13121_v42 = vshrl.u32 %v11118_v52, 16  ;;  %v4129_v17 = vshll.u32 %v11122_v1, 16 }
 0x2bf   : > { %v4078_v59 = vor.u32 %v4077_v34, %v4074_v31  ;;  %v13120_v34 = vshrl.u32 %v11109_v60, 16  ;;  %v4070_v2 = vsel %vm10435_vm13, %v4065_v48, %v4069_v26  ;;  %v4093_v23 = vrot.slane %v4091_v58, 5 }
 0x2c0   : > { %v11393_v29 = vrot.slane %v4105_v7, 5  ;;  %v4098_v39 = vrot.slane %v13121_v42, 4  ;;  %v13123_v0 = vshrl.u32 %v11122_v1, 16  ;;  %v4115_v45 = vshll.u32 %v11391_v4, 16 }
 0x2c1   : > { %v4111_v31 = vrot.slane %v13120_v34, 4  ;;  %v4079_v60 = vrot.slane %v4078_v59, 4  ;;  %v13124_v52 = vshrl.u32 %v11126_v21, 16  ;;  %v13125_v38 = vshll.u32 %v11126_v21, 16 }
 0x2c2   : > { %v7913_v48 = vcombine.low %v10965_v63, %v10968_v55  ;;  %v7914_v1 = vcombine.low %v10977_v10, %v10980_v50  ;;  %v4060_v58 = vsel %vm10435_vm13, %v4055_v16, %v11348_v35  ;;  %v4094_v21 = vsel %vm10435_vm13, %v4089_v6, %v4093_v23 }
 0x2c3   : > { %8683 = vmatmul.mubr.msk.bf16.gmra.mrb[68].mxu1 %vm676_vm1, %v7911_v20  ;;  %v4135_v20 = vrot.slane %v13123_v0, 4  ;;  %v4122_v49 = vrot.slane %v13124_v52, 4  ;;  %v4125_v7 = vrot.slane %v13125_v38, 5  ;;  %v4112_v59 = vor.u32 %v4111_v31, %v11393_v29 }
 0x2c4   : > { %8686 = vmatprep.mubr.msk.bf16.mxu1 %vm676_vm1, %v7912_v14  ;;  %v11415_v14 = vrot.slane %v4129_v17, 5  ;;  %v4102_v15 = vor.u32 %v4101_v3, %v4098_v39  ;;  %v4153_v26 = vshll.u32 %v11153_v19, 16  ;;  %v8024_v34 = vcombine.low %v4060_v58, %v4070_v2  ;;  %v11441_v17 = vld [vmem:[#allocation2 + $0x50] sm:$0x1] }
 0x2c5   : > { %8775 = vmatmul.mubr.msk.bf16.gmra.mrb[28].mxu0 %vm676_vm1, %v8005_v47  ;;  %v4928_v63 = vsel %vm725_vm0, %v11085_v56, 0  ;;  %v4084_v55 = vsel %vm10435_vm13, %v4079_v60, %v4083_v41  ;;  %v4117_v50 = vrot.slane %v4115_v45, 5  ;;  %v4126_v31 = vor.u32 %v4125_v7, %v4122_v49  ;;  %v11454_v45 = vld [vmem:[%s12974_s7 + $0xc] sm:$0x3] }
 0x2c6   : > { %8780 = vmatprep.mubr.msk.bf16.mxu0 %vm676_vm1, %v8023_v18  ;;  %v11428_v18 = vld [vmem:[#allocation2 + $0x44] sm:$0x1]  ;;  %v4136_v10 = vor.u32 %v4135_v20, %v11415_v14  ;;  %v11436_v35 = vrot.slane %v4153_v26, 5  ;;  %v13126_v6 = vshrl.u32 %v11153_v19, 16  ;;  %v8025_v16 = vcombine.low %v4084_v55, %v4094_v21  ;;  %v11466_v21 = vld [vmem:[#allocation2 + $0x5c] sm:$0x1] }
 0x2c7   : > { %v4113_v42 = vrot.slane %v4112_v59, 4  ;;  %v4139_v39 = vshll.u32 %v11428_v18, 16  ;;  %v4177_v56 = vshll.u32 %v11165_v28, 16  ;;  %v4103_v41 = vrot.slane %v4102_v15, 4 }
 0x2c8   : > { %v4159_v3 = vrot.slane %v13126_v6, 4  ;;  %v13127_v2 = vshrl.u32 %v11159_v8, 16  ;;  %v13128_v23 = vshll.u32 %v11159_v8, 16  ;;  %v13129_v19 = vshrl.u32 %v11165_v28, 16 }
 0x2c9   : > { %v4137_v52 = vrot.slane %v4136_v10, 4  ;;  %v13130_v49 = vshrl.u32 %v11168_v32, 16  ;;  %v13131_v7 = vshll.u32 %v11168_v32, 16  ;;  %v4127_v59 = vrot.slane %v4126_v31, 4 }
 0x2ca   : > { %v4146_v60 = vrot.slane %v13127_v2, 4  ;;  %v4149_v0 = vrot.slane %v13128_v23, 5  ;;  %v4183_v20 = vrot.slane %v13129_v19, 4  ;;  %v4160_v58 = vor.u32 %v4159_v3, %v11436_v35 }
 0x2cb   : > { %8687 = vmatmul.mubr.msk.bf16.gmra.mrb[72].mxu1 %vm676_vm1, %v7913_v48  ;;  %v4170_v38 = vrot.slane %v13130_v49, 4  ;;  %v4173_v8 = vrot.slane %v13131_v7, 5  ;;  %v4179_v48 = vrot.slane %v4177_v56, 5  ;;  %v4118_v26 = vsel %vm10435_vm13, %v4113_v42, %v4117_v50 }
 0x2cc   : > { %8690 = vmatprep.mubr.msk.bf16.mxu1 %vm676_vm1, %v7914_v1  ;;  %v4163_v1 = vshll.u32 %v11441_v17, 16  ;;  %v4141_v32 = vrot.slane %v4139_v39, 5  ;;  %v7916_v55 = vcombine.low %v11040_v9, %v11054_v12  ;;  %v4150_v10 = vor.u32 %v4149_v0, %v4146_v60  ;;  %v11486_v60 = vld [vmem:[#allocation2 + $0x68] sm:$0x1] }
 0x2cd   : > { %8781 = vmatmul.mubr.msk.bf16.vlgmr.msra.gmra.mrb[0].mxu0 %vm676_vm1, %v8024_v34  ;;  %v4184_v34 = vor.u32 %v4183_v20, %v4179_v48  ;;  %v4201_v31 = vshll.u32 %v11190_v11, 16  ;;  %v4108_v6 = vsel %vm10435_vm13, %v4103_v41, %v11393_v29  ;;  %v4174_v3 = vor.u32 %v4173_v8, %v4170_v38 }
 0x2ce   : > { %8813 = vmatpush3.bf16.msra.mxu0 %v4928_v63  ;;  %8784 = vmatprep.mubr.msk.bf16.mxu0 %vm676_vm1, %v8025_v16  ;;  %v4142_v50 = vsel %vm10435_vm13, %v4137_v52, %v4141_v32  ;;  %v4187_v16 = vshll.u32 %v11466_v21, 16  ;;  %v8026_v42 = vcombine.low %v4108_v6, %v4118_v26  ;;  %v4132_v39 = vsel %vm10435_vm13, %v4127_v59, %v11415_v14 }
 0x2cf   : > { %9315 = vmatprep.subr.msk.bf16.mxu0 %vm725_vm0, %v11454_v45  ;;  %v4161_v56 = vrot.slane %v4160_v58, 4  ;;  %v4165_v9 = vrot.slane %v4163_v1, 5  ;;  %v4185_v2 = vrot.slane %v4184_v34, 4  ;;  %v11488_v23 = vrot.slane %v4201_v31, 5  ;;  %v9928_v1 = vld [vmem:[#allocation2 + $0x60] sm:$0xf] }
 0x2d0   : > { %v13132_v29 = vshrl.u32 %v11190_v11, 16  ;;  %v4225_v0 = vshll.u32 %v11212_v33, 16  ;;  %v13133_v19 = vcombine.low %v11023_v36, %v11018_v46  ;;  %v8027_v20 = vcombine.low %v4132_v39, %v4142_v50  ;;  %v11525_v39 = vld [vmem:[#allocation2 + $0x74] sm:$0x1] }
 0x2d1   : > { %v4151_v52 = vrot.slane %v4150_v10, 4  ;;  %v13134_v14 = vshrl.u32 %v11206_v40, 16  ;;  %v13135_v38 = vshll.u32 %v11206_v40, 16  ;;  %v4175_v11 = vrot.slane %v4174_v3, 4  ;;  %v13139_v3 = vld [vmem:[#allocation23_spill] sm:$0xff] }
 0x2d2   : > { %v4207_v41 = vrot.slane %v13132_v29, 4  ;;  %v4189_v8 = vrot.slane %v4187_v16, 5  ;;  %v11503_v59 = vrot.slane %v4225_v0, 5  ;;  %v13136_v46 = vshrl.u32 %v11212_v33, 16 }
 0x2d3   : > { %8691 = vmatmul.mubr.msk.bf16.gmra.mrb[76].mxu1 %vm676_vm1, %v13133_v19  ;;  %v4194_v49 = vrot.slane %v13134_v14, 4  ;;  %v4197_v7 = vrot.slane %v13135_v38, 5  ;;  %v4166_v40 = vsel %vm10435_vm13, %v4161_v56, %v4165_v9  ;;  %v4211_v26 = vshll.u32 %v11486_v60, 16 }
 0x2d4   : > { %8694 = vmatprep.mubr.msk.bf16.mxu1 %vm676_vm1, %v7916_v55  ;;  %v4231_v36 = vrot.slane %v13136_v46, 4  ;;  %v4190_v32 = vsel %vm10435_vm13, %v4185_v2, %v4189_v8  ;;  %v4208_v34 = vor.u32 %v4207_v41, %v11488_v23  ;;  %v13137_v55 = vshrl.u32 %v11215_v53, 16  ;;  %v13140_v2 = vld [vmem:[#allocation39_spill] sm:$0xff] }
 0x2d5   : > { %8785 = vmatmul.mubr.msk.bf16.gmra.mrb[4].mxu0 %vm676_vm1, %v8026_v42  ;;  %v13138_v10 = vshll.u32 %v11215_v53, 16  ;;  %v7917_v50 = vcombine.low %v11072_v62, %v11074_v5  ;;  %v7918_v16 = vcombine.low %v13139_v3, %v11100_v30  ;;  %v4198_v42 = vor.u32 %v4197_v7, %v4194_v49 }
 0x2d6   : > { %8788 = vmatprep.mubr.msk.bf16.mxu0 %vm676_vm1, %v8027_v20  ;;  %v4218_v33 = vrot.slane %v13137_v55, 4  ;;  %v4156_v56 = vsel %vm10435_vm13, %v4151_v52, %v11436_v35  ;;  %v4180_v9 = vsel %vm10435_vm13, %v4175_v11, %v4179_v48  ;;  %v4232_v53 = vor.u32 %v4231_v36, %v11503_v59  ;;  %v13142_v48 = vld [vmem:[#allocation40_spill] sm:$0xff]  ;;  %v13146_v55 = vld [vmem:[#allocation42_spill] sm:$0xff] }
 0x2d7   : > { %v4221_v31 = vrot.slane %v13138_v10, 5  ;;  %v4249_v29 = vshll.u32 %v13140_v2, 16  ;;  %v8028_v41 = vcombine.low %v4156_v56, %v4166_v40  ;;  %v8029_v0 = vcombine.low %v4180_v9, %v4190_v32  ;;  %v13145_v40 = vld [vmem:[#allocation41_spill] sm:$0xff] }
 0x2d8   : > { %v4213_v19 = vrot.slane %v4211_v26, 5  ;;  %v13141_v20 = vshrl.u32 %v13140_v2, 16  ;;  %v4209_v49 = vrot.slane %v4208_v34, 4  ;;  %v4235_v7 = vshll.u32 %v11525_v39, 16  ;;  %v11547_v34 = vld [vmem:[#allocation2 + $0x80] sm:$0x1] }
 0x2d9   : > { %v4222_v38 = vor.u32 %v4221_v31, %v4218_v33  ;;  %v11537_v8 = vrot.slane %v4249_v29, 5  ;;  %v4199_v35 = vrot.slane %v4198_v42, 4  ;;  %v13143_v52 = vshrl.u32 %v13142_v48, 16  ;;  %v13151_v29 = vld [vmem:[#allocation26_spill] sm:$0xff] }
 0x2da   : > { %v4255_v14 = vrot.slane %v13141_v20, 4  ;;  %v13144_v46 = vshll.u32 %v13142_v48, 16  ;;  %v4273_v26 = vshll.u32 %v13145_v40, 16  ;;  %v4233_v32 = vrot.slane %v4232_v53, 4 }
 0x2db   : > { %8695 = vmatmul.mubr.msk.bf16.gmra.mrb[80].mxu1 %vm676_vm1, %v7917_v50  ;;  %v4242_v11 = vrot.slane %v13143_v52, 4  ;;  %v13147_v33 = vshrl.u32 %v13146_v55, 16  ;;  %v13148_v31 = vshll.u32 %v13146_v55, 16  ;;  %v13149_v3 = vshrl.u32 %v13145_v40, 16  ;;  %v11566_v40 = vld [vmem:[#allocation2 + $0x8c] sm:$0x1] }
 0x2dc   : > { %v4245_v36 = vrot.slane %v13144_v46, 5  ;;  %8698 = vmatprep.mubr.msk.bf16.mxu1 %vm676_vm1, %v7918_v16  ;;  %v4256_v56 = vor.u32 %v4255_v14, %v11537_v8  ;;  %v11557_v9 = vrot.slane %v4273_v26, 5  ;;  %v7949_v16 = vrot.slane %v11072_v62, 9  ;;  %v12480_v55 = vld [vmem:[%s12975_s8] ss:$0 sm:$0xff] }
 0x2dd   : > { %8789 = vmatmul.mubr.msk.bf16.gmra.mrb[8].mxu0 %vm676_vm1, %v8028_v41  ;;  %v4266_v10 = vrot.slane %v13147_v33, 4  ;;  %v4269_v50 = vrot.slane %v13148_v31, 5  ;;  %v4279_v42 = vrot.slane %v13149_v3, 4  ;;  %v13150_v53 = vrot.slane %v11074_v5, 5  ;;  %v13152_v41 = vld [vmem:[#allocation25_spill] sm:$0xff]  ;;  %v13155_v33 = vld [vmem:[#allocation22_spill] sm:$0xff] }
 0x2de   : > { %8792 = vmatprep.mubr.msk.bf16.mxu0 %vm676_vm1, %v8029_v0  ;;  %v7919_v20 = vcombine.low %v13152_v41, %v13151_v29  ;;  %v4214_v48 = vsel %vm10435_vm13, %v4209_v49, %v4213_v19  ;;  %v4223_v52 = vrot.slane %v4222_v38, 4  ;;  %v4237_v46 = vrot.slane %v4235_v7, 5  ;;  %v13157_v19 = vld [vmem:[#allocation28_spill] sm:$0xff]  ;;  %v13158_v49 = vld [vmem:[#allocation27_spill] sm:$0xff] }
 0x2df   : > { %v3310_v2 = vrot.slane %v13150_v53, 4  ;;  %v4246_v0 = vor.u32 %v4245_v36, %v4242_v11  ;;  %v4259_v14 = vshll.u32 %v11547_v34, 16  ;;  %v13153_v26 = vmov %v13150_v53  ;;  %v11622_v5 = vld [vmem:[#allocation2 + $0xa4] sm:$0x1] }
 0x2e0   : > { %v11573_v62 = vsel %vm10410_vm10, %v7949_v16, %v13153_v26  ;;  %v13156_v31 = vrot.slane %v13155_v33, 5  ;;  %v7920_v38 = vcombine.low %v13158_v49, %v13157_v19  ;;  %v4238_v7 = vsel %vm10435_vm13, %v4233_v32, %v4237_v46  ;;  %v11609_v49 = vld [vmem:[#allocation2 + $0x98] sm:$0x1] }
 0x2e1   : > { %v4280_v11 = vor.u32 %v4279_v42, %v11557_v9  ;;  %v4204_v36 = vsel %vm10435_vm13, %v4199_v35, %v11488_v23  ;;  %v4257_v16 = vrot.slane %v4256_v56, 4  ;;  %v4270_v53 = vor.u32 %v4269_v50, %v4266_v10  ;;  %v13160_v50 = vld [vmem:[#allocation43_spill] sm:$0xff] }
 0x2e2   : > { %v11579_v3 = vsel %vm10410_vm10, %v3310_v2, %v13156_v31  ;;  %v4283_v2 = vshll.u32 %v11566_v40, 16  ;;  %v8030_v41 = vcombine.low %v4204_v36, %v4214_v48  ;;  %v4228_v26 = vsel %vm10435_vm13, %v4223_v52, %v11503_v59 }
 0x2e3   : > { %v3301_v32 = vrot.slane %v11054_v12, 5  ;;  %v4297_v42 = vshll.u32 %v11278_v13, 16  ;;  %8699 = vmatmul.mubr.msk.bf16.gmra.mrb[84].mxu1 %vm676_vm1, %v7919_v20  ;;  %v8031_v46 = vcombine.low %v4228_v26, %v4238_v7  ;;  %v4247_v33 = vrot.slane %v4246_v0, 4 }
 0x2e4   : > { %v4261_v31 = vrot.slane %v4259_v14, 5  ;;  %v13159_v23 = vshrl.u32 %v11278_v13, 16  ;;  %8702 = vmatprep.mubr.msk.bf16.mxu1 %vm676_vm1, %v7920_v38  ;;  %v4281_v10 = vrot.slane %v4280_v11, 4  ;;  %v13161_v56 = vshrl.u32 %v13160_v50, 16 }
 0x2e5   : > { %8793 = vmatmul.mubr.msk.bf16.gmra.mrb[12].mxu0 %vm676_vm1, %v8030_v41  ;;  %v13162_v12 = vshll.u32 %v13160_v50, 16  ;;  %v4299_v52 = vrot.slane %v4297_v42, 5  ;;  %v4271_v0 = vrot.slane %v4270_v53, 4  ;;  %v4285_v14 = vrot.slane %v4283_v2, 5  ;;  %v13169_v53 = vld [vmem:[#allocation33_spill] sm:$0xff] }
 0x2e6   : > { %v4303_v35 = vrot.slane %v13159_v23, 4  ;;  %v4290_v59 = vrot.slane %v13161_v56, 4  ;;  %8796 = vmatprep.mubr.msk.bf16.mxu0 %vm676_vm1, %v8031_v46  ;;  %v4262_v20 = vsel %vm10435_vm13, %v4257_v16, %v4261_v31  ;;  %v4321_v38 = vshll.u32 %v11285_v37, 16  ;;  %v13166_v46 = vld [vmem:[#allocation31_spill] sm:$0xff]  ;;  %v13167_v56 = vld [vmem:[#allocation30_spill] sm:$0xff] }
 0x2e7   : > { %v4293_v48 = vrot.slane %v13162_v12, 5  ;;  %v13163_v11 = vshrl.u32 %v11297_v27, 16  ;;  %v13164_v41 = vshll.u32 %v11297_v27, 16  ;;  %v13165_v42 = vshrl.u32 %v11285_v37, 16  ;;  %v13168_v16 = vld [vmem:[#allocation34_spill] sm:$0xff] }
 0x2e8   : > { %v4304_v7 = vor.u32 %v4303_v35, %v4299_v52  ;;  %v7921_v12 = vcombine.low %v13167_v56, %v13166_v46  ;;  %v7922_v2 = vcombine.low %v13169_v53, %v13168_v16  ;;  %v3303_v31 = vrot.slane %v3301_v32, 4  ;;  %v9929_v56 = vld [vmem:[#allocation2 + $0x68] sm:$0x1] }
 0x2e9   : > { %v4314_v36 = vrot.slane %v13163_v11, 4  ;;  %v4317_v26 = vrot.slane %v13164_v41, 5  ;;  %v4327_v23 = vrot.slane %v13165_v42, 4  ;;  %v4323_v6 = vrot.slane %v4321_v38, 5 }
 0x2ea   : > { %v4252_v35 = vsel %vm10435_vm13, %v4247_v33, %v11537_v8  ;;  %v4286_v11 = vsel %vm10435_vm13, %v4281_v10, %v4285_v14  ;;  %v4294_v41 = vor.u32 %v4293_v48, %v4290_v59  ;;  %v4307_v42 = vshll.u32 %v11609_v49, 16  ;;  %v13170_v33 = vld [vmem:[#allocation37_spill] sm:$0xff]  ;;  %v13171_v10 = vld [vmem:[#allocation36_spill] sm:$0xff] }
 0x2eb   : > { %v7948_v58 = vrot.slane %v9928_v1, 9  ;;  %v3304_v63 = vrot.slane %v9929_v56, 5  ;;  %v8032_v15 = vcombine.low %v4252_v35, %v4262_v20  ;;  %v4328_v28 = vor.u32 %v4327_v23, %v4323_v6  ;;  %8703 = vmatmul.mubr.msk.bf16.gmra.mrb[88].mxu1 %vm676_vm1, %v7921_v12  ;;  %v11658_v56 = vld [vmem:[#allocation2 + $0xbc] sm:$0x1] }
 0x2ec   : > { %v4276_v38 = vsel %vm10435_vm13, %v4271_v0, %v11557_v9  ;;  %v4305_v47 = vrot.slane %v4304_v7, 4  ;;  %v4318_v27 = vor.u32 %v4317_v26, %v4314_v36  ;;  %v4331_v8 = vshll.u32 %v11622_v5, 16  ;;  %8706 = vmatprep.mubr.msk.bf16.mxu1 %vm676_vm1, %v7922_v2 }
 0x2ed   : > { %v7923_v59 = vcombine.low %v13171_v10, %v13170_v33  ;;  %v3302_v1 = vsel %vm10410_vm10, %v7948_v58, %v3301_v32  ;;  %v8033_v48 = vcombine.low %v4276_v38, %v4286_v11  ;;  %v3315_v20 = vrot.slane %v11100_v30, 5  ;;  %8797 = vmatmul.mubr.msk.bf16.gmra.mrb[16].mxu0 %vm676_vm1, %v8032_v15 }
 0x2ee   : > { %v3305_v9 = vsel %vm10410_vm10, %v3303_v31, %v3304_v63  ;;  %v4295_v0 = vrot.slane %v4294_v41, 4  ;;  %v4309_v14 = vrot.slane %v4307_v42, 5  ;;  %v4329_v7 = vrot.slane %v4328_v28, 4  ;;  %v11654_v31 = vld [vmem:[#allocation2 + $0xb0] sm:$0x1] }
 0x2ef   : > { %8800 = vmatprep.mubr.msk.bf16.mxu0 %vm676_vm1, %v8033_v48  ;;  %v13172_v36 = vshrl.u32 %v11336_v25, 16  ;;  %v13173_v58 = vshll.u32 %v11336_v25, 16  ;;  %v4345_v30 = vshll.u32 %v11329_v43, 16  ;;  %v13174_v23 = vshrl.u32 %v11329_v43, 16 }
 0x2f0   : > { %v4310_v63 = vsel %vm10435_vm13, %v4305_v47, %v4309_v14  ;;  %v4319_v15 = vrot.slane %v4318_v27, 4  ;;  %v4333_v2 = vrot.slane %v4331_v8, 5  ;;  %v13175_v28 = vshrl.u32 %v11346_v44, 16 }
 0x2f1   : > { %v4338_v26 = vrot.slane %v13172_v36, 4  ;;  %v4341_v32 = vrot.slane %v13173_v58, 5  ;;  %v4351_v12 = vrot.slane %v13174_v23, 4  ;;  %v7965_v11 = vcombine.low %v3302_v1, %v3305_v9 }
 0x2f2   : > { %v4362_v35 = vrot.slane %v13175_v28, 4  ;;  %v3317_v41 = vrot.slane %v3315_v20, 4  ;;  %v4347_v42 = vrot.slane %v4345_v30, 5  ;;  %v13176_v38 = vshll.u32 %v11346_v44, 16 }
 0x2f3   : > { %v4300_v36 = vsel %vm10435_vm13, %v4295_v0, %v4299_v52  ;;  %v4334_v27 = vsel %vm10435_vm13, %v4329_v7, %v4333_v2  ;;  %v4369_v47 = vshll.u32 %v11331_v57, 16  ;;  %v13177_v8 = vshrl.u32 %v11331_v57, 16  ;;  %8707 = vmatmul.mubr.msk.bf16.gmra.mrb[92].mxu1 %vm676_vm1, %v7923_v59  ;;  %v13178_v7 = vld [vmem:[#allocation24_spill] sm:$0xff] }
 0x2f4   : > { %v4365_v48 = vrot.slane %v13176_v38, 5  ;;  %v8034_v58 = vcombine.low %v4300_v36, %v4310_v63  ;;  %v4342_v1 = vor.u32 %v4341_v32, %v4338_v26  ;;  %v4352_v9 = vor.u32 %v4351_v12, %v4347_v42  ;;  %8728 = vmatprep.mubr.msk.bf16.mxu1 %vm676_vm1, %v7965_v11  ;;  %v9930_v32 = vld [vmem:[#allocation2 + $0x78] sm:$0xf] }
 0x2f5   : > { %v4375_v14 = vrot.slane %v13177_v8, 4  ;;  %v4355_v30 = vshll.u32 %v11654_v31, 16  ;;  %v4324_v23 = vsel %vm10435_vm13, %v4319_v15, %v4323_v6  ;;  %v4371_v38 = vrot.slane %v4369_v47, 5 }
 0x2f6   : > { %v4366_v28 = vor.u32 %v4365_v48, %v4362_v35  ;;  %v4379_v52 = vshll.u32 %v11658_v56, 16  ;;  %v4387_v0 = vshll.u32 %v11381_v54, 16  ;;  %v3318_v2 = vrot.slane %v13178_v7, 5  ;;  %8801 = vmatmul.mubr.msk.bf16.gmra.mrb[20].mxu0 %vm676_vm1, %v8034_v58 }
 0x2f7   : > { %v8035_v44 = vcombine.low %v4324_v23, %v4334_v27  ;;  %v4353_v8 = vrot.slane %v4352_v9, 4  ;;  %v4397_v26 = vshrl.u32 %v11373_v24, 16  ;;  %v7950_v12 = vrot.slane %v9930_v32, 9  ;;  %v11686_v23 = vld [vmem:[#allocation2 + $0xc8] sm:$0x1] }
 0x2f8   : > { %v3322_v6 = vrot.slane %v13151_v29, 5  ;;  %v4376_v63 = vor.u32 %v4375_v14, %v4371_v38  ;;  %v3319_v15 = vsel %vm10410_vm10, %v3317_v41, %v3318_v2  ;;  %v4343_v59 = vrot.slane %v4342_v1, 4 }
 0x2f9   : > { %8804 = vmatprep.mubr.msk.bf16.mxu0 %vm676_vm1, %v8035_v44  ;;  %v4357_v35 = vrot.slane %v4355_v30, 5  ;;  %v13179_v48 = vshrl.u32 %v11381_v54, 16  ;;  %v3329_v27 = vrot.slane %v13157_v19, 5  ;;  %v4367_v11 = vrot.slane %v4366_v28, 4 }
 0x2fa   : > { %v4377_v47 = vrot.slane %v4376_v63, 4  ;;  %v4381_v9 = vrot.slane %v4379_v52, 5  ;;  %v3316_v29 = vsel %vm10410_vm10, %v7950_v12, %v3315_v20  ;;  %v4389_v14 = vrot.slane %v4387_v0, 5 }
 0x2fb   : > { %v4386_v36 = vrot.slane %v13179_v48, 4  ;;  %v4358_v41 = vsel %vm10435_vm13, %v4353_v8, %v4357_v35  ;;  %v4393_v44 = vshll.u32 %v11373_v24, 16  ;;  %v7967_v58 = vcombine.low %v3316_v29, %v3319_v15  ;;  %v9931_v8 = vld [vmem:[#allocation2 + $0x10] sm:$0xf] }
 0x2fc   : > { %v3324_v1 = vrot.slane %v3322_v6, 4  ;;  %v4382_v30 = vsel %vm10435_vm13, %v4377_v47, %v4381_v9  ;;  %v4399_v19 = vrot.slane %v4397_v26, 4  ;;  %v4348_v28 = vsel %vm10435_vm13, %v4343_v59, %v4347_v42  ;;  %v9932_v26 = vld [vmem:[#allocation2 + $0x8c] sm:$0x1]  ;;  %v9933_v59 = vld [vmem:[#allocation2 + $0x84] sm:$0xf] }
 0x2fd   : > { %v4390_v52 = vor.u32 %v4389_v14, %v4386_v36  ;;  %v4395_v7 = vrot.slane %v4393_v44, 5  ;;  %v4403_v2 = vshll.u32 %v11686_v23, 16  ;;  %v3331_v20 = vrot.slane %v3329_v27, 4  ;;  %v9934_v36 = vld [vmem:[#allocation2 + $0x90] sm:$0xf]  ;;  %v13181_v9 = vld [vmem:[#allocation29_spill] sm:$0xff] }
 0x2fe   : > { %v8036_v32 = vcombine.low %v4348_v28, %v4358_v41  ;;  %v4372_v0 = vsel %vm10435_vm13, %v4367_v11, %v4371_v38  ;;  %v4719_v12 = vrot.slane %v9931_v8, 5  ;;  %v13180_v63 = vcombine.low %v11573_v62, %v11579_v3 }
 0x2ff   : > { %v3325_v15 = vrot.slane %v9932_v26, 5  ;;  %v8037_v35 = vcombine.low %v4372_v0, %v4382_v30  ;;  %v4400_v42 = vor.u32 %v4399_v19, %v4395_v7  ;;  %v7951_v48 = vrot.slane %v9933_v59, 9  ;;  %v13182_v30 = vld [vmem:[#allocation45_spill] sm:$0xff] }
 0x300   : > { %8729 = vmatmul.mubr.msk.bf16.vlgmr.msra.gmra.mrb[80].mxu1 %vm676_vm1, %v13180_v63  ;;  %v7952_v47 = vrot.slane %v9934_v36, 9  ;;  %v3332_v29 = vrot.slane %v13181_v9, 5  ;;  %8805 = vmatmul.mubr.msk.bf16.gmra.mrb[24].mxu0 %vm676_vm1, %v8036_v32  ;;  %v4721_v38 = vrot.slane %v4719_v12, 4  ;;  %v4391_v3 = vrot.slane %v4390_v52, 4  ;;  %v9935_v32 = vld [vmem:[#allocation2 + $0x1c] sm:$0xf] }
 0x301   : > { %8732 = vmatprep.mubr.msk.bf16.mxu1 %vm676_vm1, %v7967_v58  ;;  %v3326_v62 = vsel %vm10410_vm10, %v3324_v1, %v3325_v15  ;;  %8808 = vmatprep.mubr.msk.bf16.mxu0 %vm676_vm1, %v8037_v35  ;;  %v4401_v11 = vrot.slane %v4400_v42, 4  ;;  %v4405_v41 = vrot.slane %v4403_v2, 5  ;;  %v3336_v44 = vrot.slane %v13166_v46, 5  ;;  %v9936_v2 = vld [vmem:[#allocation2 + $0xc] sm:$0xf]  ;;  %v13183_v36 = vld [vmem:[#allocation32_spill] sm:$0xff] }
 0x302   : > { %v3333_v14 = vsel %vm10410_vm10, %v3331_v20, %v3332_v29  ;;  %v3343_v58 = vrot.slane %v13168_v16, 5  ;;  %v4722_v19 = vrot.slane %v13182_v30, 5  ;;  %v4726_v0 = vrot.slane %v9935_v32, 5  ;;  %v9937_v26 = vld [vmem:[#allocation2 + $0x28] sm:$0xf]  ;;  %v13184_v9 = vld [vmem:[#allocation35_spill] sm:$0xff] }
 0x303   : > { %v4406_v28 = vsel %vm10435_vm13, %v4401_v11, %v4405_v41  ;;  %v3323_v1 = vsel %vm10410_vm10, %v7951_v48, %v3322_v6  ;;  %v3330_v52 = vsel %vm10410_vm10, %v7952_v47, %v3329_v27  ;;  %v8055_v8 = vrot.slane %v9936_v2, 9  ;;  %v9941_v2 = vld [vmem:[#allocation2 + $0x24] sm:$0xf] }
 0x304   : > { %v4723_v46 = vsel %vm10410_vm10, %v4721_v38, %v4722_v19  ;;  %v7968_v20 = vcombine.low %v3323_v1, %v3326_v62  ;;  %v7969_v16 = vcombine.low %v3330_v52, %v3333_v14  ;;  %v4396_v63 = vsel %vm10435_vm13, %v4391_v3, %v4395_v7  ;;  %v9938_v38 = vld [vmem:[#allocation2 + $0x9c] sm:$0xf]  ;;  %v9940_v1 = vld [vmem:[#allocation2 + $0x34] sm:$0xf] }
 0x305   : > { %v4733_v15 = vrot.slane %v9937_v26, 5  ;;  %v3338_v35 = vrot.slane %v3336_v44, 4  ;;  %v3345_v42 = vrot.slane %v3343_v58, 4  ;;  %v8038_v59 = vcombine.low %v4396_v63, %v4406_v28  ;;  %v9939_v28 = vld [vmem:[#allocation2 + $0x18] sm:$0xf] }
 0x306   : > { %v4720_v6 = vsel %vm10410_vm10, %v8055_v8, %v4719_v12  ;;  %v4728_v48 = vrot.slane %v4726_v0, 4  ;;  %v3339_v47 = vrot.slane %v13183_v36, 5  ;;  %v3346_v29 = vrot.slane %v13184_v9, 5  ;;  %v9943_v9 = vld [vmem:[#allocation2 + $0x30] sm:$0xf] }
 0x307   : > { %v8072_v27 = vcombine.low %v4720_v6, %v4723_v46  ;;  %v4735_v7 = vrot.slane %v4733_v15, 4  ;;  %v7953_v62 = vrot.slane %v9938_v38, 9  ;;  %v7954_v3 = vrot.slane %v13169_v53, 9  ;;  %v9942_v46 = vld [vmem:[#allocation2 + $0x40] sm:$0xf] }
 0x308   : > { %8733 = vmatmul.mubr.msk.bf16.gmra.mrb[84].mxu1 %vm676_vm1, %v7968_v20  ;;  %8809 = vmatmul.mubr.msk.bf16.gmra.mrb[28].mxu0 %vm676_vm1, %v8038_v59  ;;  %v4729_v12 = vrot.slane %v11354_v61, 5  ;;  %v3340_v11 = vsel %vm10410_vm10, %v3338_v35, %v3339_v47  ;;  %v3347_v41 = vsel %vm10410_vm10, %v3345_v42, %v3346_v29  ;;  %v3350_v14 = vrot.slane %v13170_v33, 5  ;;  %v11759_v6 = vld [vmem:[%s12974_s7 + $0xe] sm:$0x3] }
 0x309   : > { %8736 = vmatprep.mubr.msk.bf16.mxu1 %vm676_vm1, %v7969_v16  ;;  %8814 = vmatprep.mubr.msk.bf16.mxu0 %vm676_vm1, %v8072_v27  ;;  %v4736_v30 = vrot.slane %v11367_v51, 5  ;;  %v3337_v19 = vsel %vm10410_vm10, %v7953_v62, %v3336_v44  ;;  %v8056_v32 = vrot.slane %v9939_v28, 9  ;;  %v4740_v61 = vrot.slane %v9940_v1, 5  ;;  %v9944_v38 = vld [vmem:[#allocation2 + $0x4c] sm:$0xf] }
 0x30a   : > { %v4730_v53 = vsel %vm10410_vm10, %v4728_v48, %v4729_v12  ;;  %v3344_v52 = vsel %vm10410_vm10, %v7954_v3, %v3343_v58  ;;  %v8057_v8 = vrot.slane %v9941_v2, 9  ;;  %v4747_v51 = vrot.slane %v9942_v46, 5  ;;  %v9945_v3 = vld [vmem:[#allocation2 + $0x3c] sm:$0xf]  ;;  %v9947_v2 = vld [vmem:[#allocation2 + $0x48] sm:$0xf] }
 0x30b   : > { %v4737_v33 = vsel %vm10410_vm10, %v4735_v7, %v4736_v30  ;;  %v7970_v20 = vcombine.low %v3337_v19, %v3340_v11  ;;  %v7971_v16 = vcombine.low %v3344_v52, %v3347_v41  ;;  %v4727_v44 = vsel %vm10410_vm10, %v8056_v32, %v4726_v0  ;;  %v13185_v0 = vld [vmem:[#allocation38_spill] sm:$0xff]  ;;  %v9946_v11 = vld [vmem:[#allocation2 + $0x58] sm:$0xf] }
 0x30c   : > { %v3352_v63 = vrot.slane %v3350_v14, 4  ;;  %v8073_v26 = vcombine.low %v4727_v44, %v4730_v53  ;;  %v5303_v35 = vsel %vm725_vm0, %v11454_v45, 0  ;;  %v4734_v58 = vsel %vm10410_vm10, %v8057_v8, %v4733_v15  ;;  %v9950_v44 = vld [vmem:[#allocation2 + $0x70] sm:$0xf] }
 0x30d   : > { %v8074_v42 = vcombine.low %v4734_v58, %v4737_v33  ;;  %v4742_v59 = vrot.slane %v4740_v61, 4  ;;  %v3353_v27 = vrot.slane %v13185_v0, 5  ;;  %v4749_v48 = vrot.slane %v4747_v51, 4  ;;  %v9948_v33 = vld [vmem:[#allocation2 + $0x64] sm:$0xf] }
 0x30e   : > { %v4743_v45 = vrot.slane %v11391_v4, 5  ;;  %v7955_v15 = vrot.slane %v13171_v10, 9  ;;  %v4750_v47 = vrot.slane %v11428_v18, 5  ;;  %v8058_v29 = vrot.slane %v9943_v9, 9 }
 0x30f   : > { %v3354_v36 = vsel %vm10410_vm10, %v3352_v63, %v3353_v27  ;;  %v4754_v62 = vrot.slane %v9944_v38, 5  ;;  %v8059_v10 = vrot.slane %v9945_v3, 9  ;;  %v4761_v18 = vrot.slane %v9946_v11, 5  ;;  %v9951_v27 = vld [vmem:[#allocation2 + $0x60] sm:$0xf] }
 0x310   : > { %8737 = vmatmul.mubr.msk.bf16.gmra.mrb[88].mxu1 %vm676_vm1, %v7970_v20  ;;  %8815 = vmatmul.mubr.msk.bf16.vlgmr.msra.gmra.mrb[0].mxu0 %vm676_vm1, %v8073_v26  ;;  %v4744_v7 = vsel %vm10410_vm10, %v4742_v59, %v4743_v45  ;;  %v3351_v4 = vsel %vm10410_vm10, %v7955_v15, %v3350_v14  ;;  %v4751_v12 = vsel %vm10410_vm10, %v4749_v48, %v4750_v47  ;;  %v4757_v1 = vrot.slane %v11441_v17, 5  ;;  %v9952_v15 = vld [vmem:[#allocation2 + $0x7c] sm:$0xf]  ;;  %v9953_v47 = vld [vmem:[#allocation2 + $0x6c] sm:$0xf] }
 0x311   : > { %8740 = vmatprep.mubr.msk.bf16.mxu1 %vm676_vm1, %v7971_v16  ;;  %8847 = vmatpush3.bf16.msra.mxu0 %v5303_v35  ;;  %v7972_v41 = vcombine.low %v3351_v4, %v3354_v36  ;;  %v4741_v30 = vsel %vm10410_vm10, %v8058_v29, %v4740_v61  ;;  %v4748_v28 = vsel %vm10410_vm10, %v8059_v10, %v4747_v51  ;;  %v4756_v53 = vrot.slane %v4754_v62, 4  ;;  %v9949_v51 = vld [vmem:[#allocation2 + $0x54] sm:$0xf] }
 0x312   : > { %8818 = vmatprep.mubr.msk.bf16.mxu0 %vm676_vm1, %v8074_v42  ;;  %9316 = vmatprep.subr.msk.bf16.mxu0 %vm725_vm0, %v11759_v6  ;;  %v8075_v19 = vcombine.low %v4741_v30, %v4744_v7  ;;  %v8076_v32 = vcombine.low %v4748_v28, %v4751_v12  ;;  %v4763_v14 = vrot.slane %v4761_v18, 4  ;;  %v4764_v52 = vrot.slane %v11466_v21, 5  ;;  %v9954_v7 = vld [vmem:[#allocation2 + $0x88] sm:$0xf] }
 0x313   : > { %v8060_v8 = vrot.slane %v9947_v2, 9  ;;  %v4758_v61 = vsel %vm10410_vm10, %v4756_v53, %v4757_v1  ;;  %v4768_v46 = vrot.slane %v9948_v33, 5  ;;  %v8061_v20 = vrot.slane %v9949_v51, 9 }
 0x314   : > { %v4765_v16 = vsel %vm10410_vm10, %v4763_v14, %v4764_v52  ;;  %v4775_v63 = vrot.slane %v9950_v44, 5  ;;  %v4771_v59 = vrot.slane %v11486_v60, 5  ;;  %v4778_v0 = vrot.slane %v11525_v39, 5 }
 0x315   : > { %v4755_v26 = vsel %vm10410_vm10, %v8060_v8, %v4754_v62  ;;  %v4762_v21 = vsel %vm10410_vm10, %v8061_v20, %v4761_v18  ;;  %v4770_v58 = vrot.slane %v4768_v46, 4  ;;  %v8062_v48 = vrot.slane %v9951_v27, 9  ;;  %v1628_v18 = vld [vmem:[#allocation2 + $0xcc] sm:$0x1] }
 0x316   : > { %v8077_v17 = vcombine.low %v4755_v26, %v4758_v61  ;;  %v8078_v35 = vcombine.low %v4762_v21, %v4765_v16  ;;  %v4777_v42 = vrot.slane %v4775_v63, 4  ;;  %v4782_v36 = vrot.slane %v9952_v15, 5 }
 0x317   : > { %v4772_v45 = vsel %vm10410_vm10, %v4770_v58, %v4771_v59  ;;  %v8063_v9 = vrot.slane %v9953_v47, 9  ;;  %v4789_v38 = vrot.slane %v9954_v7, 5  ;;  %v4769_v62 = vsel %vm10410_vm10, %v8062_v48, %v4768_v46  ;;  %v13189_v48 = vld [vmem:[#allocation46_spill] sm:$0xff]  ;;  %v11862_v7 = vld [vmem:[#allocation2 + $0x1c] sm:$0xf] }
 0x318   : > { %8741 = vmatmul.mubr.msk.bf16.gmra.mrb[92].mxu1 %vm676_vm1, %v7972_v41  ;;  %8819 = vmatmul.mubr.msk.bf16.gmra.mrb[4].mxu0 %vm676_vm1, %v8075_v19  ;;  %v4779_v29 = vsel %vm10410_vm10, %v4777_v42, %v4778_v0  ;;  %v8079_v60 = vcombine.low %v4769_v62, %v4772_v45  ;;  %v4784_v3 = vrot.slane %v4782_v36, 4  ;;  %v4785_v12 = vrot.slane %v11547_v34, 5  ;;  %v9955_v41 = vld [vmem:[#allocation2 + $0x78] sm:$0xf] }
 0x319   : > { %8822 = vmatprep.mubr.msk.bf16.mxu0 %vm676_vm1, %v8076_v32  ;;  %v4776_v39 = vsel %vm10410_vm10, %v8063_v9, %v4775_v63  ;;  %v4791_v10 = vrot.slane %v4789_v38, 4  ;;  %v4792_v11 = vrot.slane %v11566_v40, 5  ;;  %v8064_v30 = vrot.slane %v9955_v41, 9  ;;  %v9956_v32 = vld [vmem:[#allocation2 + $0x84] sm:$0xf] }
 0x31a   : > { %v8080_v4 = vcombine.low %v4776_v39, %v4779_v29  ;;  %v4786_v19 = vsel %vm10410_vm10, %v4784_v3, %v4785_v12  ;;  %v4796_v28 = vrot.slane %v11278_v13, 5  ;;  %v8065_v53 = vrot.slane %v9956_v32, 9  ;;  %v13188_v63 = vld [vmem:[#allocation44_spill] sm:$0xff]  ;;  %v11882_v12 = vld [vmem:[#allocation2 + $0x30] sm:$0xf] }
 0x31b   : > { %v4793_v14 = vsel %vm10410_vm10, %v4791_v10, %v4792_v11  ;;  %v4803_v1 = vrot.slane %v11285_v37, 5  ;;  %v4783_v34 = vsel %vm10410_vm10, %v8064_v30, %v4782_v36  ;;  %v1629_v40 = vsel %vm10341_vm4, 0, %v1628_v18  ;;  %13191 = vst [vmem:[#allocation39_spill] sm:$0xff] %v11882_v12  ;;  %v11889_v18 = vld [vmem:[%s12974_s7 + $0x10] sm:$0x3] }
 0x31c   : > { %v8081_v2 = vcombine.low %v4783_v34, %v4786_v19  ;;  %v4790_v8 = vsel %vm10410_vm10, %v8065_v53, %v4789_v38  ;;  %1630 = vst [vmem:[#allocation2 + $0xcc] sm:$0x1] %v1629_v40  ;;  %v4798_v13 = vrot.slane %v4796_v28, 4  ;;  %v13187_v33 = vmov 0   ;;  %v11895_v41 = vld [vmem:[#allocation2 + $0x40] sm:$0xf] }
 0x31d   : > { %v8082_v61 = vcombine.low %v4790_v8, %v4793_v14  ;;  %1697 = vst.msk [vmem:[#allocation2 + $0xcc] sm:$0xf] %vm1691_vm7, %v13187_v33  ;;  %v4805_v46 = vrot.slane %v4803_v1, 4  ;;  %v4799_v37 = vrot.slane %v11609_v49, 5  ;;  %v4806_v51 = vrot.slane %v11622_v5, 5  ;;  %13192 = vst [vmem:[#allocation40_spill] sm:$0xff] %v11895_v41 }
 0x31e   : > { %v8066_v20 = vrot.slane %v13160_v50, 9  ;;  %v4810_v44 = vrot.slane %v11329_v43, 5  ;;  %v8067_v26 = vrot.slane %v13188_v63, 9  ;;  %v4817_v21 = vrot.slane %v11331_v57, 5  ;;  %v11899_v30 = vld [vmem:[#allocation2 + $0x3c] sm:$0xf] }
 0x31f   : > { %v4800_v16 = vsel %vm10410_vm10, %v4798_v13, %v4799_v37  ;;  %v4813_v43 = vrot.slane %v11654_v31, 5  ;;  %v4820_v59 = vrot.slane %v11658_v56, 5  ;;  %v8068_v57 = vrot.slane %v11336_v25, 9  ;;  %13194 = vst [vmem:[#allocation42_spill] sm:$0xff] %v11899_v30  ;;  %v11909_v53 = vld [vmem:[#allocation2 + $0x58] sm:$0xf] }
 0x320   : > { %8823 = vmatmul.mubr.msk.bf16.gmra.mrb[8].mxu0 %vm676_vm1, %v8077_v17  ;;  %v4807_v17 = vsel %vm10410_vm10, %v4805_v46, %v4806_v51  ;;  %v4804_v5 = vsel %vm10410_vm10, %v8067_v26, %v4803_v1  ;;  %v4812_v58 = vrot.slane %v4810_v44, 4  ;;  %v4819_v42 = vrot.slane %v4817_v21, 4  ;;  %v11911_v14 = vld [vmem:[#allocation2 + $0x64] sm:$0xf]  ;;  %v1684_v1 = vld [vmem:[#allocation2 + $0xd4] sm:$0x1] }
 0x321   : > { %8826 = vmatprep.mubr.msk.bf16.mxu0 %vm676_vm1, %v8078_v35  ;;  %v4797_v35 = vsel %vm10410_vm10, %v8066_v20, %v4796_v28  ;;  %v8084_v50 = vcombine.low %v4804_v5, %v4807_v17  ;;  %v4824_v27 = vrot.slane %v11373_v24, 5  ;;  %v8069_v45 = vrot.slane %v13189_v48, 9  ;;  %v11903_v28 = vld [vmem:[#allocation2 + $0x48] sm:$0xf]  ;;  %v11913_v34 = vld [vmem:[#allocation2 + $0x54] sm:$0xf] }
 0x322   : > { %v8083_v49 = vcombine.low %v4797_v35, %v4800_v16  ;;  %v4814_v0 = vsel %vm10410_vm10, %v4812_v58, %v4813_v43  ;;  %v4821_v15 = vsel %vm10410_vm10, %v4819_v42, %v4820_v59  ;;  %v4811_v36 = vsel %vm10410_vm10, %v8068_v57, %v4810_v44  ;;  %v11917_v40 = vld [vmem:[#allocation2 + $0x60] sm:$0xf]  ;;  %v11927_v13 = vld [vmem:[#allocation2 + $0x70] sm:$0xf]  ;;  %v11929_v46 = vld [vmem:[#allocation2 + $0x7c] sm:$0xf] }
 0x323   : > { %v8085_v47 = vcombine.low %v4811_v36, %v4814_v0  ;;  %v4818_v31 = vsel %vm10410_vm10, %v8069_v45, %v4817_v21  ;;  %v4826_v9 = vrot.slane %v4824_v27, 4  ;;  %v4827_v25 = vrot.slane %v11686_v23, 5  ;;  %v11872_v23 = vld [vmem:[#allocation2 + $0x28] sm:$0xf]  ;;  %v11931_v37 = vld [vmem:[#allocation2 + $0x6c] sm:$0xf] }
 0x324   : > { %v8086_v56 = vcombine.low %v4818_v31, %v4821_v15  ;;  %v8070_v24 = vrot.slane %v11381_v54, 9  ;;  %v11874_v54 = vld [vmem:[#allocation2 + $0x34] sm:$0xf]  ;;  %v5981_v10 = vsel %vm725_vm0, %v11759_v6, 0  ;;  %v11897_v6 = vld [vmem:[#allocation2 + $0x4c] sm:$0xf]  ;;  %v8108_v19 = vcombine.low %v11899_v30, %v11895_v41 }
 0x325   : > { %v4828_v29 = vsel %vm10410_vm10, %v4826_v9, %v4827_v25  ;;  %v8107_v11 = vcombine.low %v11882_v12, %v11874_v54  ;;  %13193 = vst [vmem:[#allocation41_spill] sm:$0xff] %v11897_v6  ;;  %v8109_v32 = vcombine.low %v11903_v28, %v11897_v6  ;;  %v8110_v52 = vcombine.low %v11913_v34, %v11909_v53  ;;  %v11935_v20 = vld [vmem:[#allocation2 + $0x78] sm:$0xf]  ;;  %v11941_v44 = vld [vmem:[#allocation2 + $0x88] sm:$0xf] }
 0x326   : > { %v4825_v38 = vsel %vm10410_vm10, %v8070_v24, %v4824_v27  ;;  %13196 = vst [vmem:[#allocation26_spill] sm:$0xff] %v11931_v37  ;;  %v8112_v51 = vcombine.low %v11931_v37, %v11927_v13  ;;  %13197 = vst [vmem:[#allocation25_spill] sm:$0xff] %v11935_v20  ;;  %v8113_v16 = vcombine.low %v11935_v20, %v11929_v46  ;;  %v11945_v63 = vld [vmem:[#allocation2 + $0x84] sm:$0xf]  ;;  %v11949_v17 = vld [vmem:[#allocation2 + $0x90] sm:$0xf] }
 0x327   : > { %v8087_v62 = vcombine.low %v4825_v38, %v4828_v29  ;;  %13199 = vst [vmem:[#allocation22_spill] sm:$0xff] %v11945_v63  ;;  %v8114_v26 = vcombine.low %v11945_v63, %v11941_v44  ;;  %13200 = vst [vmem:[#allocation28_spill] sm:$0xff] %v11949_v17  ;;  %v11955_v35 = vld [vmem:[#allocation2 + $0xa0] sm:$0xf]  ;;  %v11958_v5 = vld [vmem:[#allocation2 + $0xac] sm:$0xf] }
 0x328   : > { %8827 = vmatmul.mubr.msk.bf16.gmra.mrb[12].mxu0 %vm676_vm1, %v8079_v60  ;;  %v11866_v60 = vld [vmem:[#allocation2 + $0x18] sm:$0xf]  ;;  %13201 = vst [vmem:[#allocation27_spill] sm:$0xff] %v11955_v35  ;;  %13202 = vst [vmem:[#allocation43_spill] sm:$0xff] %v11958_v5  ;;  %v11963_v43 = vld [vmem:[#allocation2 + $0x9c] sm:$0xf] }
 0x329   : > { %8830 = vmatprep.mubr.msk.bf16.mxu0 %vm676_vm1, %v8080_v4  ;;  %v8105_v39 = vcombine.low %v11866_v60, %v11862_v7  ;;  %v11876_v4 = vld [vmem:[#allocation2 + $0x24] sm:$0xf]  ;;  %v5499_v58 = vshrl.u32 %v11866_v60, 16  ;;  %v5502_v42 = vshll.u32 %v11866_v60, 16  ;;  %v8116_v59 = vcombine.low %v11963_v43, %v11955_v35  ;;  %v11967_v57 = vld [vmem:[#allocation2 + $0xa8] sm:$0xf] }
 0x32a   : > { %13190 = vst [vmem:[#allocation23_spill] sm:$0xff] %v11876_v4  ;;  %v8106_v3 = vcombine.low %v11876_v4, %v11872_v23  ;;  %13203 = vst [vmem:[#allocation31_spill] sm:$0xff] %v11967_v57  ;;  %v8117_v0 = vcombine.low %v11967_v57, %v11958_v5  ;;  %v5523_v27 = vshrl.u32 %v11876_v4, 16  ;;  %v5526_v15 = vshll.u32 %v11876_v4, 16  ;;  %v11981_v24 = vld [vmem:[#allocation2 + $0x20] sm:$0x1] }
 0x32b   : > { %v5536_v36 = vshrl.u32 %v11872_v23, 16  ;;  %v5504_v31 = vrot.slane %v5502_v42, 5  ;;  %v5550_v9 = vshll.u32 %v11882_v12, 16  ;;  %v5560_v25 = vshrl.u32 %v11874_v54, 16  ;;  %v12021_v42 = vld [vmem:[#allocation2 + $0xcc] sm:$0xf] }
 0x32c   : > { %v5532_v29 = vshll.u32 %v11872_v23, 16  ;;  %v5571_v38 = vshrl.u32 %v11899_v30, 16  ;;  %v5528_v8 = vrot.slane %v5526_v15, 5 }
 0x330   : > { %8831 = vmatmul.mubr.msk.bf16.gmra.mrb[16].mxu0 %vm676_vm1, %v8081_v2  ;;  %v8111_v2 = vcombine.low %v11917_v40, %v11911_v14 }
 0x331   : > { %8834 = vmatprep.mubr.msk.bf16.mxu0 %vm676_vm1, %v8082_v61  ;;  %v1685_v61 = vsel %vm10351_vm6, 0, %v1684_v1 }
 0x332   : > { %1686 = vst [vmem:[#allocation2 + $0xd4] sm:$0x1] %v1685_v61 }
 0x333   : > { %1699 = vst.msk [vmem:[#allocation2 + $0xd4] sm:$0x1] %vm1574_vm2, %v13187_v33  ;;  %v11943_v33 = vld [vmem:[#allocation2 + $0x94] sm:$0xf]  ;;  %vm7123_vm2 = vcmask 1043456  }
 0x334   : > { %13198 = vst [vmem:[#allocation21_spill] sm:$0xff] %v11943_v33  ;;  %v8115_v21 = vcombine.low %v11949_v17, %v11943_v33 }
 0x338   : > { %8835 = vmatmul.mubr.msk.bf16.gmra.mrb[20].mxu0 %vm676_vm1, %v8083_v49  ;;  %v5512_v49 = vshrl.u32 %v11862_v7, 16 }
 0x339   : > { %8838 = vmatprep.mubr.msk.bf16.mxu0 %vm676_vm1, %v8084_v50  ;;  %v5508_v50 = vshll.u32 %v11862_v7, 16 }
 0x33a   : > { %v5514_v45 = vrot.slane %v5512_v49, 4  ;;  %v5518_v49 = vshll.u32 %v11981_v24, 16 }
 0x33b   : > { %v11973_v48 = vrot.slane %v5508_v50, 5  ;;  %v12006_v50 = vrot.slane %v5532_v29, 5  ;;  %v5562_v29 = vrot.slane %v5560_v25, 4 }
 0x33d   : > { %v5515_v1 = vor.u32 %v5514_v45, %v11973_v48  ;;  %v5525_v45 = vrot.slane %v5523_v27, 4  ;;  %v5552_v27 = vrot.slane %v5550_v9, 5 }
 0x340   : > { %8839 = vmatmul.mubr.msk.bf16.gmra.mrb[24].mxu0 %vm676_vm1, %v8085_v47  ;;  %v5501_v47 = vrot.slane %v5499_v58, 4  ;;  %v5538_v58 = vrot.slane %v5536_v36, 4 }
 0x341   : > { %8842 = vmatprep.mubr.msk.bf16.mxu0 %vm676_vm1, %v8086_v56  ;;  %v5547_v56 = vshrl.u32 %v11882_v12, 16 }
 0x348   : > { %8843 = vmatmul.mubr.msk.bf16.gmra.mrb[28].mxu0 %vm676_vm1, %v8087_v62  ;;  %v5574_v62 = vshll.u32 %v11899_v30, 16  ;;  %v5580_v30 = vshll.u32 %v11895_v41, 16 }
 0x349   : > { %8848 = vmatprep.mubr.msk.bf16.mxu0 %vm676_vm1, %v8105_v39  ;;  %v5584_v39 = vshrl.u32 %v11895_v41, 16 }
 0x34a   : > { %v12043_v12 = vrot.slane %v5580_v30, 5  ;;  %v5576_v4 = vrot.slane %v5574_v62, 5  ;;  %v13208_v30 = vshrl.u32 %v11903_v28, 16 }
 0x34b   : > { %v5586_v41 = vrot.slane %v5584_v39, 4 }
 0x34c   : > { %v5597_v39 = vrot.slane %v13208_v30, 4 }
 0x350   : > { %8849 = vmatmul.mubr.msk.bf16.vlgmr.msra.gmra.mrb[0].mxu0 %vm676_vm1, %v8106_v3  ;;  %v5549_v3 = vrot.slane %v5547_v56, 4 }
 0x351   : > { %8881 = vmatpush3.bf16.msra.mxu0 %v5981_v10  ;;  %8852 = vmatprep.mubr.msk.bf16.mxu0 %vm676_vm1, %v8107_v11  ;;  %v11988_v10 = vld [vmem:[#allocation2 + $0xb8] sm:$0xf] }
 0x352   : > { %9317 = vmatprep.subr.msk.bf16.mxu0 %vm725_vm0, %v11889_v18 }
 0x358   : > { %8853 = vmatmul.mubr.msk.bf16.gmra.mrb[4].mxu0 %vm676_vm1, %v8108_v19  ;;  %v5608_v19 = vshrl.u32 %v11897_v6, 16 }
 0x359   : > { %8856 = vmatprep.mubr.msk.bf16.mxu0 %vm676_vm1, %v8109_v32  ;;  %v11992_v32 = vld [vmem:[#allocation2 + $0xc4] sm:$0xf] }
 0x35a   : > { %13204 = vst [vmem:[#allocation30_spill] sm:$0xff] %v11992_v32 }
 0x360   : > { %8857 = vmatmul.mubr.msk.bf16.gmra.mrb[8].mxu0 %vm676_vm1, %v8110_v52  ;;  %v5556_v52 = vshll.u32 %v11874_v54, 16 }
 0x361   : > { %8860 = vmatprep.mubr.msk.bf16.mxu0 %vm676_vm1, %v8111_v2  ;;  %v5516_v2 = vrot.slane %v5515_v1, 4 }
 0x362   : > { %v12017_v61 = vrot.slane %v5556_v52, 5  ;;  %v5529_v52 = vor.u32 %v5528_v8, %v5525_v45  ;;  %v5553_v45 = vor.u32 %v5552_v27, %v5549_v3 }
 0x364   : > { %v5554_v3 = vrot.slane %v5553_v45, 4  ;;  %v6403_v45 = vsel %vm725_vm0, %v11889_v18, 0  ;;  %v13212_v18 = vshll.u32 %v11913_v34, 16 }
 0x368   : > { %8861 = vmatmul.mubr.msk.bf16.gmra.mrb[12].mxu0 %vm676_vm1, %v8112_v51  ;;  %v11999_v51 = vld [vmem:[#allocation2 + $0xb4] sm:$0xf] }
 0x369   : > { %8864 = vmatprep.mubr.msk.bf16.mxu0 %vm676_vm1, %v8113_v16  ;;  %13205 = vst [vmem:[#allocation34_spill] sm:$0xff] %v11999_v51  ;;  %v5505_v16 = vor.u32 %v5504_v31, %v5501_v47  ;;  %v12015_v31 = vld [vmem:[#allocation2 + $0xd0] sm:$0xf]  ;;  %v5520_v47 = vrot.slane %v5518_v49, 5  ;;  %v5604_v49 = vshll.u32 %v11897_v6, 16 }
 0x36a   : > { %v8120_v56 = vcombine.low %v12021_v42, %v12015_v31 }
 0x36b   : > { %v5506_v11 = vrot.slane %v5505_v16, 4  ;;  %v5521_v9 = vsel %vm10435_vm13, %v5516_v2, %v5520_v47  ;;  %v5563_v16 = vor.u32 %v5562_v29, %v12017_v61  ;;  %v5530_v47 = vrot.slane %v5529_v52, 4 }
 0x36c   : > { %v5573_v29 = vrot.slane %v5571_v38, 4  ;;  %v12046_v1 = vrot.slane %v5604_v49, 5  ;;  %v13209_v38 = vshll.u32 %v11903_v28, 16  ;;  %v12065_v49 = vld [vmem:[#allocation2 + $0x50] sm:$0x1] }
 0x36d   : > { %v5511_v8 = vsel %vm10435_vm13, %v5506_v11, %v11973_v48  ;;  %v5564_v6 = vrot.slane %v5563_v16, 4  ;;  %v12050_v11 = vld [vmem:[#allocation2 + $0x44] sm:$0x1] }
 0x36e   : > { %v8138_v2 = vcombine.low %v5511_v8, %v5521_v9  ;;  %v5600_v62 = vrot.slane %v13209_v38, 5  ;;  %v5535_v9 = vsel %vm10435_vm13, %v5530_v47, %v12006_v50  ;;  %v5577_v16 = vor.u32 %v5576_v4, %v5573_v29 }
 0x36f   : > { %v5614_v47 = vshll.u32 %v12065_v49, 16 }
 0x370   : > { %8865 = vmatmul.mubr.msk.bf16.gmra.mrb[16].mxu0 %vm676_vm1, %v8114_v26  ;;  %v8118_v26 = vcombine.low %v11999_v51, %v11988_v10  ;;  %v5601_v4 = vor.u32 %v5600_v62, %v5597_v39  ;;  %v5578_v38 = vrot.slane %v5577_v16, 4  ;;  %v13213_v62 = vshrl.u32 %v11911_v14, 16 }
 0x371   : > { %8868 = vmatprep.mubr.msk.bf16.mxu0 %vm676_vm1, %v8115_v21  ;;  %v12003_v21 = vld [vmem:[#allocation2 + $0xc0] sm:$0xf] }
 0x372   : > { %13206 = vst [vmem:[#allocation33_spill] sm:$0xff] %v12003_v21  ;;  %v5602_v16 = vrot.slane %v5601_v4, 4 }
 0x378   : > { %8869 = vmatmul.mubr.msk.bf16.gmra.mrb[20].mxu0 %vm676_vm1, %v8116_v59  ;;  %v8119_v59 = vcombine.low %v12003_v21, %v11992_v32 }
 0x379   : > { %8872 = vmatprep.mubr.msk.bf16.mxu0 %vm676_vm1, %v8117_v0  ;;  %v12011_v0 = vld [vmem:[#allocation2 + $0x2c] sm:$0x1] }
 0x37a   : > { %13207 = vst [vmem:[#allocation37_spill] sm:$0xff] %v12011_v0  ;;  %v5542_v36 = vshll.u32 %v12011_v0, 16  ;;  %v5610_v0 = vrot.slane %v5608_v19, 4  ;;  %v5628_v19 = vshll.u32 %v11909_v53, 16 }
 0x37c   : > { %v12078_v29 = vrot.slane %v5628_v19, 5 }
 0x380   : > { %8873 = vmatmul.mubr.msk.bf16.gmra.mrb[24].mxu0 %vm676_vm1, %v8118_v26  ;;  %v5539_v26 = vor.u32 %v5538_v58, %v12006_v50  ;;  %v5544_v58 = vrot.slane %v5542_v36, 5  ;;  %v5559_v50 = vsel %vm10435_vm13, %v5554_v3, %v12017_v61 }
 0x381   : > { %8876 = vmatprep.mubr.msk.bf16.mxu0 %vm676_vm1, %v8119_v59  ;;  %v12029_v59 = vld [vmem:[#allocation2 + $0x38] sm:$0x1] }
 0x382   : > { %v5540_v15 = vrot.slane %v5539_v26, 4  ;;  %v5566_v25 = vshll.u32 %v12029_v59, 16  ;;  %v5587_v26 = vor.u32 %v5586_v41, %v12043_v12  ;;  %v5611_v41 = vor.u32 %v5610_v0, %v12046_v1 }
 0x384   : > { %v5545_v36 = vsel %vm10435_vm13, %v5540_v15, %v5544_v58  ;;  %v5568_v27 = vrot.slane %v5566_v25, 5  ;;  %v5590_v15 = vshll.u32 %v12050_v11, 16  ;;  %v5652_v25 = vshll.u32 %v11911_v14, 16 }
 0x385   : > { %v8139_v58 = vcombine.low %v5535_v9, %v5545_v36  ;;  %v13211_v36 = vshrl.u32 %v11913_v34, 16  ;;  %v5624_v9 = vrot.slane %v13212_v18, 5  ;;  %v5612_v3 = vrot.slane %v5611_v41, 4 }
 0x386   : > { %v5569_v8 = vsel %vm10435_vm13, %v5564_v6, %v5568_v27  ;;  %v13210_v6 = vshrl.u32 %v11909_v53, 16  ;;  %v5592_v61 = vrot.slane %v5590_v15, 5  ;;  %v12087_v39 = vrot.slane %v5652_v25, 5 }
 0x387   : > { %v8140_v0 = vcombine.low %v5559_v50, %v5569_v8  ;;  %v5621_v27 = vrot.slane %v13211_v36, 4  ;;  %v12093_v8 = vld [vmem:[#allocation2 + $0x5c] sm:$0x1]  ;;  %v13214_v50 = vshrl.u32 %v11917_v40, 16  ;;  %v5616_v36 = vrot.slane %v5614_v47, 5 }
 0x388   : > { %8877 = vmatmul.mubr.msk.bf16.gmra.mrb[28].mxu0 %vm676_vm1, %v8120_v56  ;;  %v5634_v30 = vrot.slane %v13210_v6, 4  ;;  %v12112_v56 = vld [vmem:[#allocation2 + $0x68] sm:$0x1]  ;;  %v5638_v47 = vshll.u32 %v12093_v8, 16 }
 0x389   : > { %8882 = vmatprep.mubr.msk.bf16.mxu0 %vm676_vm1, %v8138_v2  ;;  %v5588_v2 = vrot.slane %v5587_v26, 4  ;;  %v5658_v26 = vrot.slane %v13213_v62, 4  ;;  %v5645_v6 = vrot.slane %v13214_v50, 4  ;;  %v5583_v50 = vsel %vm10435_vm13, %v5578_v38, %v12043_v12 }
 0x38a   : > { %v5635_v18 = vor.u32 %v5634_v30, %v12078_v29  ;;  %v5607_v12 = vsel %vm10435_vm13, %v5602_v16, %v12046_v1  ;;  %v5640_v1 = vrot.slane %v5638_v47, 5 }
 0x38b   : > { %v5593_v25 = vsel %vm10435_vm13, %v5588_v2, %v5592_v61  ;;  %v5617_v2 = vsel %vm10435_vm13, %v5612_v3, %v5616_v36  ;;  %v5659_v30 = vor.u32 %v5658_v26, %v12087_v39  ;;  %v5700_v61 = vshll.u32 %v11929_v46, 16 }
 0x38c   : > { %v8141_v19 = vcombine.low %v5583_v50, %v5593_v25  ;;  %v13220_v36 = vshrl.u32 %v11927_v13, 16  ;;  %v8142_v48 = vcombine.low %v5607_v12, %v5617_v2  ;;  %v13222_v25 = vshll.u32 %v11931_v37, 16 }
 0x38d   : > { %v5660_v16 = vrot.slane %v5659_v30, 4  ;;  %v5766_v2 = vshll.u32 %v11963_v43, 16 }
 0x38e   : > { %v12099_v41 = vpop.f32.mrb[64].mxu1  ;;  %v5682_v26 = vrot.slane %v13220_v36, 4  ;;  %v5672_v50 = vrot.slane %v13222_v25, 5  ;;  %v13226_v36 = vshll.u32 %v11935_v20, 16 }
 0x38f   : > { %13216 = vst [vmem:[#allocation36_spill] sm:$0xff] %v12099_v41  ;;  %v12107_v62 = vpop.f32.mrb[65].mxu1 }
 0x390   : > { %8883 = vmatmul.mubr.msk.bf16.vlgmr.msra.gmra.mrb[0].mxu0 %vm676_vm1, %v8139_v58  ;;  %v13215_v58 = vshll.u32 %v11917_v40, 16  ;;  %13217 = vst [vmem:[#allocation24_spill] sm:$0xff] %v12107_v62  ;;  %v12114_v52 = vpop.f32.mrb[66].mxu1  ;;  %v13221_v62 = vshrl.u32 %v11931_v37, 16 }
 0x391   : > { %8915 = vmatpush3.bf16.msra.mxu0 %v6403_v45  ;;  %8886 = vmatprep.mubr.msk.bf16.mxu0 %vm676_vm1, %v8140_v0  ;;  %v5676_v45 = vshll.u32 %v11927_v13, 16  ;;  %13218 = vst [vmem:[#allocation29_spill] sm:$0xff] %v12114_v52  ;;  %v5752_v0 = vshrl.u32 %v11943_v33, 16  ;;  %v12122_v4 = vpop.f32.mrb[67].mxu1 }
 0x392   : > { %v5648_v15 = vrot.slane %v13215_v58, 5  ;;  %v5625_v58 = vor.u32 %v5624_v9, %v5621_v27  ;;  %13219 = vst [vmem:[#allocation45_spill] sm:$0xff] %v12122_v4  ;;  %v5636_v27 = vrot.slane %v5635_v18, 4  ;;  %v5662_v9 = vshll.u32 %v12112_v56, 16 }
 0x393   : > { %v12128_v3 = vrot.slane %v5676_v45, 5  ;;  %v5669_v41 = vrot.slane %v13221_v62, 4  ;;  %v13224_v18 = vshrl.u32 %v11929_v46, 16  ;;  %v13225_v62 = vshrl.u32 %v11935_v20, 16 }
 0x394   : > { %v5649_v38 = vor.u32 %v5648_v15, %v5645_v6  ;;  %v5626_v52 = vrot.slane %v5625_v58, 4  ;;  %v12137_v6 = vld [vmem:[#allocation2 + $0x74] sm:$0x1]  ;;  %v12139_v15 = vrot.slane %v5700_v61, 5  ;;  %v5641_v30 = vsel %vm10435_vm13, %v5636_v27, %v5640_v1 }
 0x395   : > { %13223 = vst [vmem:[#allocation32_spill] sm:$0xff] %v12137_v6  ;;  %v5706_v45 = vrot.slane %v13224_v18, 4  ;;  %v5693_v12 = vrot.slane %v13225_v62, 4  ;;  %v5664_v61 = vrot.slane %v5662_v9, 5  ;;  %v5683_v25 = vor.u32 %v5682_v26, %v12128_v3 }
 0x396   : > { %v5650_v58 = vrot.slane %v5649_v38, 4  ;;  %v12149_v47 = vpop.f32.mrb[68].mxu1  ;;  %v5724_v18 = vshll.u32 %v11941_v44, 16  ;;  %v5673_v62 = vor.u32 %v5672_v50, %v5669_v41  ;;  %v5686_v4 = vshll.u32 %v12137_v6, 16 }
 0x397   : > { %13227 = vst [vmem:[#allocation35_spill] sm:$0xff] %v12149_v47  ;;  %v12157_v38 = vpop.f32.mrb[69].mxu1  ;;  %v5631_v27 = vsel %vm10435_vm13, %v5626_v52, %v12078_v29  ;;  %v5665_v9 = vsel %vm10435_vm13, %v5660_v16, %v5664_v61  ;;  %v5707_v26 = vor.u32 %v5706_v45, %v12139_v15  ;;  %v5748_v1 = vshll.u32 %v11943_v33, 16 }
 0x398   : > { %8887 = vmatmul.mubr.msk.bf16.gmra.mrb[4].mxu0 %vm676_vm1, %v8141_v19  ;;  %v5696_v19 = vrot.slane %v13226_v36, 5  ;;  %13228 = vst [vmem:[#allocation38_spill] sm:$0xff] %v12157_v38  ;;  %v12160_v36 = vld [vmem:[#allocation2 + $0x80] sm:$0x1]  ;;  %v12162_v47 = vpop.f32.mrb[70].mxu1  ;;  %v8143_v50 = vcombine.low %v5631_v27, %v5641_v30  ;;  %v5684_v37 = vrot.slane %v5683_v25, 4 }
 0x399   : > { %8890 = vmatprep.mubr.msk.bf16.mxu0 %vm676_vm1, %v8142_v48  ;;  %v5776_v48 = vshrl.u32 %v11955_v35, 16  ;;  %13229 = vst [vmem:[#allocation19_spill] sm:$0xff] %v12162_v47  ;;  %v12172_v41 = vpop.f32.mrb[71].mxu1  ;;  %v5655_v47 = vsel %vm10435_vm13, %v5650_v58, %v12087_v39  ;;  %v5710_v52 = vshll.u32 %v12160_v36, 16  ;;  %v12178_v29 = vrot.slane %v5724_v18, 5 }
 0x39a   : > { %13230 = vst [vmem:[#allocation44_spill] sm:$0xff] %v12172_v41  ;;  %v5697_v20 = vor.u32 %v5696_v19, %v5693_v12  ;;  %v13231_v16 = vshrl.u32 %v11941_v44, 16  ;;  %v8144_v61 = vcombine.low %v5655_v47, %v5665_v9  ;;  %v5674_v33 = vrot.slane %v5673_v62, 4  ;;  %v12185_v27 = vld [vmem:[#allocation2 + $0x8c] sm:$0x1] }
 0x39b   : > { %v5688_v6 = vrot.slane %v5686_v4, 5  ;;  %v13232_v38 = vshrl.u32 %v11945_v63, 16  ;;  %v5708_v30 = vrot.slane %v5707_v26, 4  ;;  %v13233_v39 = vshll.u32 %v11945_v63, 16 }
 0x39c   : > { %v5730_v45 = vrot.slane %v13231_v16, 4  ;;  %v12189_v12 = vrot.slane %v5748_v1, 5  ;;  %v5754_v19 = vrot.slane %v5752_v0, 4  ;;  %v5790_v25 = vshll.u32 %v11967_v57, 16  ;;  %v12203_v16 = vld [vmem:[#allocation2 + $0x98] sm:$0x1] }
 0x39d   : > { %v5717_v41 = vrot.slane %v13232_v38, 4  ;;  %v5720_v58 = vrot.slane %v13233_v39, 5  ;;  %v5800_v47 = vshrl.u32 %v11958_v5, 16  ;;  %v13234_v4 = vshrl.u32 %v11949_v17, 16 }
 0x39e   : > { %v13235_v38 = vshll.u32 %v11949_v17, 16  ;;  %v12198_v9 = vpop.f32.mrb[72].mxu1  ;;  %v5689_v26 = vsel %vm10435_vm13, %v5684_v37, %v5688_v6  ;;  %v5698_v1 = vrot.slane %v5697_v20, 4  ;;  %v5731_v0 = vor.u32 %v5730_v45, %v12178_v29 }
 0x39f   : > { %v5741_v18 = vrot.slane %v13234_v4, 4  ;;  %13236 = vst [vmem:[#allocation46_spill] sm:$0xff] %v12198_v9  ;;  %v5811_v39 = vshrl.u32 %v11999_v51, 16  ;;  %v5679_v4 = vsel %vm10435_vm13, %v5674_v33, %v12128_v3  ;;  %v5772_v9 = vshll.u32 %v11955_v35, 16 }
 0x3a0   : > { %8891 = vmatmul.mubr.msk.bf16.gmra.mrb[8].mxu0 %vm676_vm1, %v8143_v50  ;;  %v5744_v62 = vrot.slane %v13235_v38, 5  ;;  %v5712_v50 = vrot.slane %v5710_v52, 5  ;;  %v5734_v38 = vshll.u32 %v12185_v27, 16  ;;  %v5721_v20 = vor.u32 %v5720_v58, %v5717_v41 }
 0x3a1   : > { %8894 = vmatprep.mubr.msk.bf16.mxu0 %vm676_vm1, %v8144_v61  ;;  %v12206_v61 = vpop.f32.mrb[73].mxu1  ;;  %v5755_v6 = vor.u32 %v5754_v19, %v12189_v12  ;;  %v5796_v52 = vshll.u32 %v11958_v5, 16  ;;  %v5814_v45 = vshll.u32 %v11999_v51, 16  ;;  %v8145_v63 = vcombine.low %v5679_v4, %v5689_v26 }
 0x3a2   : > { %13237 = vst [vmem:[#allocation20_spill] sm:$0xff] %v12206_v61  ;;  %v12213_v17 = vpop.f32.mrb[74].mxu1  ;;  %v5713_v37 = vsel %vm10435_vm13, %v5708_v30, %v5712_v50  ;;  %v5745_v33 = vor.u32 %v5744_v62, %v5741_v18  ;;  %v5758_v3 = vshll.u32 %v12203_v16, 16  ;;  %v5732_v35 = vrot.slane %v5731_v0, 4 }
 0x3a3   : > { %13238 = vst [vmem:[#allocation47_spill] sm:$0xff] %v12213_v17  ;;  %v12220_v61 = vpop.f32.mrb[75].mxu1  ;;  %v5703_v17 = vsel %vm10435_vm13, %v5698_v1, %v12139_v15  ;;  %v13240_v30 = vshrl.u32 %v11963_v43, 16  ;;  %v5768_v58 = vrot.slane %v5766_v2, 5  ;;  %v5736_v50 = vrot.slane %v5734_v38, 5 }
 0x3a4   : > { %13239 = vst [vmem:[#allocation48_spill] sm:$0xff] %v12220_v61  ;;  %v8146_v19 = vcombine.low %v5703_v17, %v5713_v37  ;;  %v12228_v5 = vrot.slane %v5772_v9, 5  ;;  %v5778_v51 = vrot.slane %v5776_v48, 4  ;;  %v5722_v26 = vrot.slane %v5721_v20, 4  ;;  %v12240_v9 = vld [vmem:[#allocation2 + $0xa4] sm:$0x1] }
 0x3a5   : > { %v5765_v41 = vrot.slane %v13240_v30, 4  ;;  %v5756_v18 = vrot.slane %v5755_v6, 4  ;;  %v12231_v62 = vrot.slane %v5796_v52, 5  ;;  %v5802_v4 = vrot.slane %v5800_v47, 4 }
 0x3a6   : > { %v5824_v61 = vshrl.u32 %v11988_v10, 16  ;;  %v5835_v15 = vshrl.u32 %v12003_v21, 16  ;;  %v5746_v1 = vrot.slane %v5745_v33, 4  ;;  %v5760_v2 = vrot.slane %v5758_v3, 5  ;;  %v12236_v17 = vpop.f32.mrb[76].mxu1 }
 0x3a7   : > { %13241 = vst [vmem:[#allocation49_spill] sm:$0xff] %v12236_v17  ;;  %v5737_v48 = vsel %vm10435_vm13, %v5732_v35, %v5736_v50  ;;  %v13242_v0 = vshrl.u32 %v11967_v57, 16  ;;  %v5792_v47 = vrot.slane %v5790_v25, 5  ;;  %v5838_v37 = vshll.u32 %v12003_v21, 16  ;;  %v12246_v6 = vpop.f32.mrb[77].mxu1 }
 0x3a8   : > { %8895 = vmatmul.mubr.msk.bf16.gmra.mrb[12].mxu0 %vm676_vm1, %v8145_v63  ;;  %v5769_v63 = vor.u32 %v5768_v58, %v5765_v41  ;;  %v5848_v20 = vshrl.u32 %v11992_v32, 16  ;;  %13243 = vst [vmem:[#allocation50_spill] sm:$0xff] %v12246_v6  ;;  %v5779_v52 = vor.u32 %v5778_v51, %v12228_v5  ;;  %v12249_v33 = vld [vmem:[#allocation2 + $0xb0] sm:$0x1]  ;;  %v5820_v3 = vshll.u32 %v11988_v10, 16  ;;  %v12252_v35 = vpop.f32.mrb[78].mxu1 }
 0x3a9   : > { %8898 = vmatprep.mubr.msk.bf16.mxu0 %vm676_vm1, %v8146_v19  ;;  %v5789_v38 = vrot.slane %v13242_v0, 4  ;;  %13244 = vst [vmem:[#allocation51_spill] sm:$0xff] %v12252_v35  ;;  %v5727_v30 = vsel %vm10435_vm13, %v5722_v26, %v12178_v29  ;;  %v5761_v25 = vsel %vm10435_vm13, %v5756_v18, %v5760_v2  ;;  %v5803_v41 = vor.u32 %v5802_v4, %v12231_v62  ;;  %v12262_v51 = vpop.f32.mrb[79].mxu1 }
 0x3aa   : > { %v5844_v58 = vshll.u32 %v11992_v32, 16  ;;  %v5872_v19 = vshrl.u32 %v12015_v31, 16  ;;  %13245 = vst [vmem:[#allocation52_spill] sm:$0xff] %v12262_v51  ;;  %v8147_v50 = vcombine.low %v5727_v30, %v5737_v48  ;;  %v5751_v0 = vsel %vm10435_vm13, %v5746_v1, %v12189_v12 }
 0x3ab   : > { %v5782_v35 = vshll.u32 %v12240_v9, 16  ;;  %v5770_v6 = vrot.slane %v5769_v63, 4  ;;  %v5793_v29 = vor.u32 %v5792_v47, %v5789_v38  ;;  %v5806_v26 = vshll.u32 %v12249_v33, 16  ;;  %v12273_v63 = vld [vmem:[#allocation2 + $0xbc] sm:$0x1] }
 0x3ac   : > { %v5813_v18 = vrot.slane %v5811_v39, 4  ;;  %v8148_v2 = vcombine.low %v5751_v0, %v5761_v25  ;;  %v5780_v4 = vrot.slane %v5779_v52, 4  ;;  %v5822_v17 = vrot.slane %v5820_v3, 5  ;;  %v12281_v25 = vld [vmem:[#allocation2 + $0xc8] sm:$0x1] }
 0x3ad   : > { %v5826_v21 = vrot.slane %v5824_v61, 4  ;;  %v5804_v32 = vrot.slane %v5803_v41, 4  ;;  %v5816_v51 = vrot.slane %v5814_v45, 5  ;;  %v5846_v48 = vrot.slane %v5844_v58, 5 }
 0x3ae   : > { %v5850_v30 = vrot.slane %v5848_v20, 4  ;;  %v5859_v57 = vshrl.u32 %v12021_v42, 16  ;;  %v5862_v12 = vshll.u32 %v12021_v42, 16  ;;  %v5784_v1 = vrot.slane %v5782_v35, 5 }
 0x3af   : > { %v5868_v39 = vshll.u32 %v12015_v31, 16  ;;  %v5794_v38 = vrot.slane %v5793_v29, 4  ;;  %v5808_v47 = vrot.slane %v5806_v26, 5  ;;  %v5837_v61 = vrot.slane %v5835_v15, 4 }
 0x3b0   : > { %8899 = vmatmul.mubr.msk.bf16.gmra.mrb[16].mxu0 %vm676_vm1, %v8147_v50  ;;  %v5840_v52 = vrot.slane %v5838_v37, 5  ;;  %v5775_v45 = vsel %vm10435_vm13, %v5770_v6, %v12228_v5  ;;  %v5785_v20 = vsel %vm10435_vm13, %v5780_v4, %v5784_v1  ;;  %v5827_v3 = vor.u32 %v5826_v21, %v5822_v17 }
 0x3b1   : > { %8902 = vmatprep.mubr.msk.bf16.mxu0 %vm676_vm1, %v8148_v2  ;;  %v5809_v35 = vsel %vm10435_vm13, %v5804_v32, %v5808_v47  ;;  %v5817_v41 = vor.u32 %v5816_v51, %v5813_v18  ;;  %v5830_v58 = vshll.u32 %v12273_v63, 16  ;;  %v5851_v50 = vor.u32 %v5850_v30, %v5846_v48  ;;  %v12290_v2 = vld [vmem:[#allocation2 + $0xd4] sm:$0x1] }
 0x3b2   : > { %v5861_v0 = vrot.slane %v5859_v57, 4  ;;  %v5864_v15 = vrot.slane %v5862_v12, 5  ;;  %v5870_v37 = vrot.slane %v5868_v39, 5  ;;  %v5874_v29 = vrot.slane %v5872_v19, 4 }
 0x3b3   : > { %v8149_v26 = vcombine.low %v5775_v45, %v5785_v20  ;;  %v5799_v5 = vsel %vm10435_vm13, %v5794_v38, %v12231_v62  ;;  %v5841_v6 = vor.u32 %v5840_v52, %v5837_v61  ;;  %v5854_v21 = vshll.u32 %v12281_v25, 16 }
 0x3b4   : > { %v8150_v4 = vcombine.low %v5799_v5, %v5809_v35  ;;  %v5828_v32 = vrot.slane %v5827_v3, 4  ;;  %v5832_v51 = vrot.slane %v5830_v58, 5  ;;  %v5852_v18 = vrot.slane %v5851_v50, 4 }
 0x3b5   : > { %v5818_v57 = vrot.slane %v5817_v41, 4  ;;  %v5865_v19 = vor.u32 %v5864_v15, %v5861_v0  ;;  %v5875_v30 = vor.u32 %v5874_v29, %v5870_v37  ;;  %v5878_v12 = vshll.u32 %v12290_v2, 16 }
 0x3b6   : > { %v5842_v1 = vrot.slane %v5841_v6, 4  ;;  %v5856_v62 = vrot.slane %v5854_v21, 5  ;;  %v5833_v39 = vsel %vm10435_vm13, %v5828_v32, %v5832_v51  ;;  %v6194_v47 = vrot.slane %v11862_v7, 5 }
 0x3b7   : > { %v5823_v61 = vsel %vm10435_vm13, %v5818_v57, %v5822_v17  ;;  %v5866_v52 = vrot.slane %v5865_v19, 4  ;;  %v5876_v45 = vrot.slane %v5875_v30, 4  ;;  %v5880_v20 = vrot.slane %v5878_v12, 5  ;;  %v13250_v30 = vld [vmem:[#allocation41_spill] sm:$0xff] }
 0x3b8   : > { %8903 = vmatmul.mubr.msk.bf16.gmra.mrb[20].mxu0 %vm676_vm1, %v8149_v26  ;;  %v5857_v38 = vsel %vm10435_vm13, %v5852_v18, %v5856_v62  ;;  %v8151_v3 = vcombine.low %v5823_v61, %v5833_v39  ;;  %v5847_v35 = vsel %vm10435_vm13, %v5842_v1, %v5846_v48  ;;  %v6196_v58 = vrot.slane %v6194_v47, 4  ;;  %v13249_v18 = vld [vmem:[#allocation39_spill] sm:$0xff] }
 0x3b9   : > { %8906 = vmatprep.mubr.msk.bf16.mxu0 %vm676_vm1, %v8150_v4  ;;  %v8152_v41 = vcombine.low %v5847_v35, %v5857_v38  ;;  %v5871_v50 = vsel %vm10435_vm13, %v5866_v52, %v5870_v37  ;;  %v5881_v7 = vsel %vm10435_vm13, %v5876_v45, %v5880_v20  ;;  %v6197_v17 = vrot.slane %v11981_v24, 5  ;;  %v13246_v24 = vld [vmem:[#allocation37_spill] sm:$0xff] }
 0x3ba   : > { %v6201_v0 = vrot.slane %v11872_v23, 5  ;;  %v8153_v15 = vcombine.low %v5871_v50, %v5881_v7  ;;  %v8170_v29 = vrot.slane %v11866_v60, 9  ;;  %v6208_v26 = vrot.slane %v11874_v54, 5  ;;  %v13247_v60 = vld [vmem:[#allocation23_spill] sm:$0xff]  ;;  %v13248_v54 = vld [vmem:[#allocation40_spill] sm:$0xff] }
 0x3bb   : > { %v6198_v48 = vsel %vm10410_vm10, %v6196_v58, %v6197_v17  ;;  %v6204_v23 = vrot.slane %v13246_v24, 5  ;;  %v6211_v21 = vrot.slane %v12029_v59, 5  ;;  %v8171_v4 = vrot.slane %v13247_v60, 9 }
 0x3bc   : > { %v6195_v5 = vsel %vm10410_vm10, %v8170_v29, %v6194_v47  ;;  %v6203_v37 = vrot.slane %v6201_v0, 4  ;;  %v6210_v22 = vrot.slane %v6208_v26, 4  ;;  %v6215_v51 = vrot.slane %v13248_v54, 5 }
 0x3bd   : > { %v8187_v6 = vcombine.low %v6195_v5, %v6198_v48  ;;  %v8172_v57 = vrot.slane %v13249_v18, 9  ;;  %v6222_v12 = vrot.slane %v13250_v30, 5  ;;  %v6202_v1 = vsel %vm10410_vm10, %v8171_v4, %v6201_v0  ;;  %v13253_v30 = vld [vmem:[#allocation26_spill] sm:$0xff] }
 0x3be   : > { %v6205_v32 = vsel %vm10410_vm10, %v6203_v37, %v6204_v23  ;;  %v6212_v19 = vsel %vm10410_vm10, %v6210_v22, %v6211_v21  ;;  %v6217_v38 = vrot.slane %v6215_v51, 4  ;;  %v6218_v61 = vrot.slane %v12050_v11, 5 }
 0x3bf   : > { %v8188_v62 = vcombine.low %v6202_v1, %v6205_v32  ;;  %v6209_v59 = vsel %vm10410_vm10, %v8172_v57, %v6208_v26  ;;  %v6224_v47 = vrot.slane %v6222_v12, 4  ;;  %v6225_v45 = vrot.slane %v12065_v49, 5 }
 0x3c0   : > { %8907 = vmatmul.mubr.msk.bf16.gmra.mrb[24].mxu0 %vm676_vm1, %v8151_v3  ;;  %v8189_v39 = vcombine.low %v6209_v59, %v6212_v19  ;;  %v13251_v3 = vld [vmem:[#allocation42_spill] sm:$0xff]  ;;  %v6229_v58 = vrot.slane %v11909_v53, 5  ;;  %v8174_v7 = vrot.slane %v11903_v28, 9  ;;  %v6236_v17 = vrot.slane %v11911_v14, 5 }
 0x3c1   : > { %8910 = vmatprep.mubr.msk.bf16.mxu0 %vm676_vm1, %v8152_v41  ;;  %v8173_v35 = vrot.slane %v13251_v3, 9  ;;  %v6219_v41 = vsel %vm10410_vm10, %v6217_v38, %v6218_v61  ;;  %v6226_v11 = vsel %vm10410_vm10, %v6224_v47, %v6225_v45  ;;  %v6232_v28 = vrot.slane %v12093_v8, 5  ;;  %v13255_v61 = vld [vmem:[#allocation21_spill] sm:$0xff] }
 0x3c2   : > { %v6223_v29 = vsel %vm10410_vm10, %v8174_v7, %v6222_v12  ;;  %v6231_v53 = vrot.slane %v6229_v58, 4  ;;  %v6238_v26 = vrot.slane %v6236_v17, 4  ;;  %v6239_v14 = vrot.slane %v12112_v56, 5 }
 0x3c3   : > { %v6216_v49 = vsel %vm10410_vm10, %v8173_v35, %v6215_v51  ;;  %v8191_v48 = vcombine.low %v6223_v29, %v6226_v11  ;;  %v8175_v37 = vrot.slane %v11913_v34, 9  ;;  %v6243_v24 = vrot.slane %v11927_v13, 5  ;;  %v13256_v29 = vld [vmem:[#allocation22_spill] sm:$0xff] }
 0x3c4   : > { %v6233_v22 = vsel %vm10410_vm10, %v6231_v53, %v6232_v28  ;;  %v8176_v21 = vrot.slane %v11917_v40, 9  ;;  %v6240_v8 = vsel %vm10410_vm10, %v6238_v26, %v6239_v14  ;;  %v6250_v60 = vrot.slane %v11929_v46, 5  ;;  %v13252_v40 = vld [vmem:[#allocation32_spill] sm:$0xff]  ;;  %v13257_v26 = vld [vmem:[#allocation27_spill] sm:$0xff] }
 0x3c5   : > { %v6230_v56 = vsel %vm10410_vm10, %v8175_v37, %v6229_v58  ;;  %v6245_v13 = vrot.slane %v6243_v24, 4  ;;  %v6246_v18 = vrot.slane %v13252_v40, 5  ;;  %v6253_v46 = vrot.slane %v12160_v36, 5  ;;  %v13258_v37 = vld [vmem:[#allocation28_spill] sm:$0xff] }
 0x3c6   : > { %v8192_v34 = vcombine.low %v6230_v56, %v6233_v22  ;;  %v6237_v32 = vsel %vm10410_vm10, %v8176_v21, %v6236_v17  ;;  %v6252_v51 = vrot.slane %v6250_v60, 4  ;;  %v8177_v12 = vrot.slane %v13253_v30, 9  ;;  %v13260_v30 = vld [vmem:[#allocation31_spill] sm:$0xff] }
 0x3c7   : > { %v8193_v54 = vcombine.low %v6237_v32, %v6240_v8  ;;  %v6247_v1 = vsel %vm10410_vm10, %v6245_v13, %v6246_v18  ;;  %v6264_v45 = vrot.slane %v13255_v61, 5  ;;  %v6260_v11 = vrot.slane %v12185_v27, 5 }
 0x3c8   : > { %8911 = vmatmul.mubr.msk.bf16.gmra.mrb[28].mxu0 %vm676_vm1, %v8153_v15  ;;  %v8190_v15 = vcombine.low %v6216_v49, %v6219_v41  ;;  %v6254_v47 = vsel %vm10410_vm10, %v6252_v51, %v6253_v46  ;;  %v6244_v36 = vsel %vm10410_vm10, %v8177_v12, %v6243_v24  ;;  %v6267_v49 = vrot.slane %v12203_v16, 5  ;;  %v13259_v24 = vld [vmem:[#allocation43_spill] sm:$0xff] }
 0x3c9   : > { %8916 = vmatprep.mubr.msk.bf16.mxu0 %vm676_vm1, %v8187_v6  ;;  %v8194_v35 = vcombine.low %v6244_v36, %v6247_v1  ;;  %v6266_v7 = vrot.slane %v6264_v45, 4  ;;  %v6271_v28 = vrot.slane %v13257_v26, 5  ;;  %v8180_v22 = vrot.slane %v13258_v37, 9 }
 0x3ca   : > { %v6278_v21 = vrot.slane %v13259_v24, 5  ;;  %v6274_v13 = vrot.slane %v12240_v9, 5  ;;  %v6281_v51 = vrot.slane %v12249_v33, 5  ;;  %v8181_v40 = vrot.slane %v11963_v43, 9  ;;  %v13264_v24 = vld [vmem:[#allocation36_spill] sm:$0xff] }
 0x3cb   : > { %v6268_v27 = vsel %vm10410_vm10, %v6266_v7, %v6267_v49  ;;  %v6265_v56 = vsel %vm10410_vm10, %v8180_v22, %v6264_v45  ;;  %v6273_v32 = vrot.slane %v6271_v28, 4  ;;  %v6285_v46 = vrot.slane %v11988_v10, 5 }
 0x3cc   : > { %v8182_v12 = vrot.slane %v13260_v30, 9  ;;  %v6288_v10 = vrot.slane %v12273_v63, 5  ;;  %v6299_v45 = vrot.slane %v12015_v31, 5  ;;  %v6295_v36 = vrot.slane %v12281_v25, 5 }
 0x3cd   : > { %v6275_v18 = vsel %vm10410_vm10, %v6273_v32, %v6274_v13  ;;  %v6302_v31 = vrot.slane %v12290_v2, 5 }
 0x3ce   : > { %v6279_v33 = vsel %vm10410_vm10, %v8182_v12, %v6278_v21  ;;  %v6301_v63 = vrot.slane %v6299_v45, 4 }
 0x3d0   : > { %8917 = vmatmul.mubr.msk.bf16.vlgmr.msra.gmra.mrb[0].mxu0 %vm676_vm1, %v8188_v62  ;;  %v6257_v62 = vrot.slane %v11941_v44, 5 }
 0x3d1   : > { %8920 = vmatprep.mubr.msk.bf16.mxu0 %vm676_vm1, %v8189_v39  ;;  %v13254_v39 = vld [vmem:[#allocation25_spill] sm:$0xff] }
 0x3d2   : > { %v8178_v38 = vrot.slane %v13254_v39, 9  ;;  %v6259_v44 = vrot.slane %v6257_v62, 4 }
 0x3d3   : > { %v12337_v52 = vpop.f32.mrb[80].mxu1 }
 0x3d4   : > { %v12340_v20 = vpop.f32.mrb[81].mxu1  ;;  %v6251_v41 = vsel %vm10410_vm10, %v8178_v38, %v6250_v60  ;;  %v6261_v53 = vsel %vm10410_vm10, %v6259_v44, %v6260_v11  ;;  %v6272_v38 = vsel %vm10410_vm10, %v8181_v40, %v6271_v28  ;;  %v13263_v44 = vld [vmem:[#allocation33_spill] sm:$0xff]  ;;  %v6303_v28 = vsel %vm10410_vm10, %v6301_v63, %v6302_v31 }
 0x3d5   : > { %v12346_v50 = vpop.f32.mrb[82].mxu1  ;;  %v8195_v58 = vcombine.low %v6251_v41, %v6254_v47  ;;  %v8198_v9 = vcombine.low %v6272_v38, %v6275_v18  ;;  %v6287_v47 = vrot.slane %v6285_v46, 4  ;;  %v8184_v7 = vrot.slane %v13263_v44, 9  ;;  %v13267_v18 = vld [vmem:[#allocation45_spill] sm:$0xff] }
 0x3d6   : > { %v12352_v0 = vpop.f32.mrb[83].mxu1 }
 0x3d8   : > { %8921 = vmatmul.mubr.msk.bf16.gmra.mrb[4].mxu0 %vm676_vm1, %v8190_v15 }
 0x3d9   : > { %8924 = vmatprep.mubr.msk.bf16.mxu0 %vm676_vm1, %v8191_v48  ;;  %v8179_v48 = vrot.slane %v13256_v29, 9  ;;  %v8185_v29 = vrot.slane %v12021_v42, 9  ;;  %v6877_v42 = vld [vmem:[%s12976_s9] sm:$0xf] }
 0x3da   : > { %9318 = vmatprep.subr.msk.bf16.mxu1 %vm725_vm0, %v6877_v42  ;;  %v6927_v2 = vsel %vm725_vm0, %v6877_v42, 0  ;;  %v12475_v22 = vsel %vm7123_vm2, %v6877_v42, 0  ;;  %vm7090_vm0 = vcmask 64512  }
 0x3db   : > { %v12361_v5 = vpop.f32.mrb[84].mxu1  ;;  %v6258_v16 = vsel %vm10410_vm10, %v8179_v48, %v6257_v62  ;;  %v13261_v62 = vld [vmem:[#allocation30_spill] sm:$0xff]  ;;  %v6300_v26 = vsel %vm10410_vm10, %v8185_v29, %v6299_v45  ;;  %8949 = vmatpush3.bf16.msra.mxu1 %v6927_v2 }
 0x3dc   : > { %v12364_v6 = vpop.f32.mrb[85].mxu1  ;;  %v8196_v60 = vcombine.low %v6258_v16, %v6261_v53  ;;  %v6292_v39 = vrot.slane %v13261_v62, 5  ;;  %v8202_v37 = vcombine.low %v6300_v26, %v6303_v28  ;;  %9319 = vmatprep.subr.msk.bf16.mxu1 %vm7123_vm2, %v6877_v42  ;;  %v13272_v28 = vld [vmem:[#allocation46_spill] sm:$0xff] }
 0x3dd   : > { %v12370_v23 = vpop.f32.mrb[86].mxu1 }
 0x3de   : > { %v12376_v4 = vpop.f32.mrb[87].mxu1  ;;  %v6294_v61 = vrot.slane %v6292_v39, 4  ;;  %v6293_v25 = vsel %vm10410_vm10, %v8184_v7, %v6292_v39  ;;  %v13271_v7 = vld [vmem:[#allocation44_spill] sm:$0xff] }
 0x3e0   : > { %8925 = vmatmul.mubr.msk.bf16.gmra.mrb[8].mxu0 %vm676_vm1, %v8192_v34  ;;  %v8197_v34 = vcombine.low %v6265_v56, %v6268_v27  ;;  %v6296_v11 = vsel %vm10410_vm10, %v6294_v61, %v6295_v36  ;;  %v13269_v61 = vld [vmem:[#allocation38_spill] sm:$0xff] }
 0x3e1   : > { %8928 = vmatprep.mubr.msk.bf16.mxu0 %vm676_vm1, %v8193_v54  ;;  %v6280_v54 = vrot.slane %v6278_v21, 4  ;;  %v8201_v53 = vcombine.low %v6293_v25, %v6296_v11 }
 0x3e3   : > { %v12385_v57 = vpop.f32.mrb[88].mxu1  ;;  %v6282_v1 = vsel %vm10410_vm10, %v6280_v54, %v6281_v51  ;;  %v13266_v54 = vld [vmem:[#allocation29_spill] sm:$0xff] }
 0x3e4   : > { %v12388_v19 = vpop.f32.mrb[89].mxu1  ;;  %v8199_v43 = vcombine.low %v6279_v33, %v6282_v1  ;;  %v13268_v33 = vld [vmem:[#allocation35_spill] sm:$0xff] }
 0x3e5   : > { %v12394_v59 = vpop.f32.mrb[90].mxu1 }
 0x3e6   : > { %v12400_v3 = vpop.f32.mrb[91].mxu1 }
 0x3e8   : > { %8929 = vmatmul.mubr.msk.bf16.gmra.mrb[12].mxu0 %vm676_vm1, %v8194_v35  ;;  %v13262_v35 = vld [vmem:[#allocation34_spill] sm:$0xff] }
 0x3e9   : > { %8932 = vmatprep.mubr.msk.bf16.mxu0 %vm676_vm1, %v8195_v58  ;;  %v8183_v41 = vrot.slane %v13262_v35, 9  ;;  %v6289_v58 = vsel %vm10410_vm10, %v6287_v47, %v6288_v10  ;;  %v13270_v35 = vld [vmem:[#allocation19_spill] sm:$0xff] }
 0x3eb   : > { %v12409_v17 = vpop.f32.mrb[92].mxu1  ;;  %v6286_v49 = vsel %vm10410_vm10, %v8183_v41, %v6285_v46 }
 0x3ec   : > { %v12412_v15 = vpop.f32.mrb[93].mxu1  ;;  %v8200_v48 = vcombine.low %v6286_v49, %v6289_v58 }
 0x3ed   : > { %v12418_v14 = vpop.f32.mrb[94].mxu1 }
 0x3ee   : > { %v12424_v8 = vpop.f32.mrb[95].mxu1 }
 0x3f0   : > { %8933 = vmatmul.mubr.msk.bf16.gmra.mrb[16].mxu0 %vm676_vm1, %v8196_v60  ;;  %v13265_v60 = vld [vmem:[#allocation24_spill] sm:$0xff] }
 0x3f1   : > { %8936 = vmatprep.mubr.msk.bf16.mxu0 %vm676_vm1, %v8197_v34 }
 0x3f8   : > { %8937 = vmatmul.mubr.msk.bf16.gmra.mrb[20].mxu0 %vm676_vm1, %v8198_v9 }
 0x3f9   : > { %8940 = vmatprep.mubr.msk.bf16.mxu0 %vm676_vm1, %v8199_v43 }
 0x400   : > { %8941 = vmatmul.mubr.msk.bf16.gmra.mrb[24].mxu0 %vm676_vm1, %v8200_v48 }
 0x401   : > { %8944 = vmatprep.mubr.msk.bf16.mxu0 %vm676_vm1, %v8201_v53 }
 0x408   : > { %8945 = vmatmul.mubr.msk.bf16.gmra.mrb[28].mxu0 %vm676_vm1, %v8202_v37 }
 0x4a3   : > { %v8918_v27 = vpop.f32.mrb[0].mxu0 }
 0x4a4   : > { %v9018_v21 = vadd.f32 %v8918_v27, %v13264_v24  ;;  %v6439_v16 = vpop.f32.mrb[1].mxu0  ;;  %v13273_v24 = vld [vmem:[#allocation20_spill] sm:$0xff] }
 0x4a5   : > { %v9019_v56 = vadd.f32 %v6439_v16, %v13265_v60  ;;  %v8919_v34 = vpop.f32.mrb[2].mxu0 }
 0x4a6   : > { %v12485_v32 = vadd.f32 %v9018_v21, %v12480_v55  ;;  %v9020_v13 = vadd.f32 %v8919_v34, %v13266_v54  ;;  %v6442_v51 = vpop.f32.mrb[3].mxu0  ;;  %v13274_v54 = vld [vmem:[#allocation47_spill] sm:$0xff] }
 0x4a7   : > { %v12489_v40 = vadd.f32 %v9019_v56, %v12480_v55  ;;  %v9021_v46 = vadd.f32 %v6442_v51, %v13267_v18 }
 0x4a8   : > { %v8222_v30 = vmul.f32 -1.442695, %v12485_v32  ;;  %v12494_v12 = vadd.f32 %v9020_v13, %v12480_v55 }
 0x4a9   : > { %v8220_v1 = vmul.f32 -1.442695, %v12489_v40  ;;  %v12498_v62 = vadd.f32 %v9021_v46, %v12480_v55 }
 0x4aa   : > { %9663 = vpow2.f32 %v8222_v30  ;;  %v8223_v39 = vmul.f32 -1.442695, %v12494_v12 }
 0x4ab   : > { %9665 = vpow2.f32 %v8220_v1  ;;  %v8221_v38 = vmul.f32 -1.442695, %v12498_v62  ;;  %v8922_v9 = vpop.f32.mrb[4].mxu0  ;;  %v13275_v1 = vld [vmem:[#allocation48_spill] sm:$0xff] }
 0x4ac   : > { %9667 = vpow2.f32 %v8223_v39  ;;  %v9022_v43 = vadd.f32 %v8922_v9, %v13268_v33  ;;  %v6455_v47 = vpop.f32.mrb[5].mxu0 }
 0x4ad   : > { %9669 = vpow2.f32 %v8221_v38  ;;  %v9023_v10 = vadd.f32 %v6455_v47, %v13269_v61  ;;  %v8923_v45 = vpop.f32.mrb[6].mxu0 }
 0x4ae   : > { %v12505_v36 = vadd.f32 %v9022_v43, %v12480_v55  ;;  %v9024_v41 = vadd.f32 %v8923_v45, %v13270_v35  ;;  %v6458_v58 = vpop.f32.mrb[7].mxu0 }
 0x4af   : > { %v12509_v44 = vadd.f32 %v9023_v10, %v12480_v55  ;;  %v9025_v11 = vadd.f32 %v6458_v58, %v13271_v7 }
 0x4b0   : > { %v8226_v49 = vmul.f32 -1.442695, %v12505_v36  ;;  %v12514_v29 = vadd.f32 %v9024_v41, %v12480_v55  ;;  %v13276_v41 = vld [vmem:[#allocation49_spill] sm:$0xff] }
 0x4b1   : > { %v8224_v63 = vmul.f32 -1.442695, %v12509_v44  ;;  %v12518_v31 = vadd.f32 %v9025_v11, %v12480_v55 }
 0x4b2   : > { %9671 = vpow2.f32 %v8226_v49  ;;  %v8227_v48 = vmul.f32 -1.442695, %v12514_v29 }
 0x4b3   : > { %9673 = vpow2.f32 %v8224_v63  ;;  %v8225_v25 = vmul.f32 -1.442695, %v12518_v31  ;;  %v8926_v53 = vpop.f32.mrb[8].mxu0  ;;  %v13277_v63 = vld [vmem:[#allocation50_spill] sm:$0xff] }
 0x4b4   : > { %v9664_v26 = vpop.eup %9663  ;;  %9675 = vpow2.f32 %v8227_v48  ;;  %v9026_v37 = vadd.f32 %v8926_v53, %v13272_v28  ;;  %v6471_v42 = vpop.f32.mrb[9].mxu0 }
 0x4b5   : > { %v9666_v2 = vpop.eup %9665  ;;  %v6735_v27 = vadd.f32 1.0, %v9664_v26  ;;  %9677 = vpow2.f32 %v8225_v25  ;;  %v9027_v21 = vadd.f32 %v6471_v42, %v13273_v24  ;;  %v8927_v16 = vpop.f32.mrb[10].mxu0 }
 0x4b6   : > { %v9668_v60 = vpop.eup %9667  ;;  %v6733_v56 = vadd.f32 1.0, %v9666_v2  ;;  %v12525_v34 = vadd.f32 %v9026_v37, %v12480_v55  ;;  %v9028_v13 = vadd.f32 %v8927_v16, %v13274_v54  ;;  %v6474_v51 = vpop.f32.mrb[11].mxu0  ;;  %v13278_v37 = vld [vmem:[#allocation51_spill] sm:$0xff]  ;;  %v13279_v16 = vld [vmem:[#allocation52_spill] sm:$0xff] }
 0x4b7   : > { %v9670_v18 = vpop.eup %9669  ;;  %9679 = vrcp.f32 %v6735_v27  ;;  %v6736_v46 = vadd.f32 1.0, %v9668_v60  ;;  %v12529_v30 = vadd.f32 %v9027_v21, %v12480_v55  ;;  %v9029_v39 = vadd.f32 %v6474_v51, %v13275_v1 }
 0x4b8   : > { %9681 = vrcp.f32 %v6733_v56  ;;  %v6734_v38 = vadd.f32 1.0, %v9670_v18  ;;  %v8230_v9 = vmul.f32 -1.442695, %v12525_v34  ;;  %v12534_v33 = vadd.f32 %v9028_v13, %v12480_v55 }
 0x4b9   : > { %9683 = vrcp.f32 %v6736_v46  ;;  %v8228_v43 = vmul.f32 -1.442695, %v12529_v30  ;;  %v12538_v47 = vadd.f32 %v9029_v39, %v12480_v55 }
 0x4ba   : > { %9685 = vrcp.f32 %v6734_v38  ;;  %v8231_v61 = vmul.f32 -1.442695, %v12534_v33 }
 0x4bb   : > { %9687 = vpow2.f32 %v8230_v9  ;;  %v8229_v10 = vmul.f32 -1.442695, %v12538_v47  ;;  %v8930_v45 = vpop.f32.mrb[12].mxu0 }
 0x4bc   : > { %v9672_v35 = vpop.eup %9671  ;;  %9689 = vpow2.f32 %v8228_v43  ;;  %v9030_v58 = vadd.f32 %v8930_v45, %v13276_v41  ;;  %v6487_v7 = vpop.f32.mrb[13].mxu0 }
 0x4bd   : > { %v9674_v11 = vpop.eup %9673  ;;  %v6739_v49 = vadd.f32 1.0, %v9672_v35  ;;  %9691 = vpow2.f32 %v8231_v61  ;;  %v9031_v48 = vadd.f32 %v6487_v7, %v13277_v63  ;;  %v8931_v25 = vpop.f32.mrb[14].mxu0 }
 0x4be   : > { %v9676_v53 = vpop.eup %9675  ;;  %v6737_v26 = vadd.f32 1.0, %v9674_v11  ;;  %9693 = vpow2.f32 %v8229_v10  ;;  %v12545_v28 = vadd.f32 %v9030_v58, %v12480_v55  ;;  %v9032_v42 = vadd.f32 %v8931_v25, %v13278_v37  ;;  %v6490_v2 = vpop.f32.mrb[15].mxu0 }
 0x4bf   : > { %v9678_v27 = vpop.eup %9677  ;;  %9695 = vrcp.f32 %v6739_v49  ;;  %v6740_v24 = vadd.f32 1.0, %v9676_v53  ;;  %v12549_v21 = vadd.f32 %v9031_v48, %v12480_v55  ;;  %v9033_v60 = vadd.f32 %v6490_v2, %v13279_v16 }
 0x4c0   : > { %9697 = vrcp.f32 %v6737_v26  ;;  %v6738_v56 = vadd.f32 1.0, %v9678_v27  ;;  %v8234_v54 = vmul.f32 -1.442695, %v12545_v28  ;;  %v12554_v13 = vadd.f32 %v9032_v42, %v12480_v55 }
 0x4c1   : > { %v9680_v51 = vpop.eup %9679  ;;  %9699 = vrcp.f32 %v6740_v24  ;;  %v8232_v18 = vmul.f32 -1.442695, %v12549_v21  ;;  %v12558_v46 = vadd.f32 %v9033_v60, %v12480_v55 }
 0x4c2   : > { %v9682_v1 = vpop.eup %9681  ;;  %9701 = vrcp.f32 %v6738_v56  ;;  %v8235_v39 = vmul.f32 -1.442695, %v12554_v13  ;;  %v6831_v10 = vmul.f32 %v9680_v51, %v12485_v32 }
 0x4c3   : > { %v9684_v38 = vpop.eup %9683  ;;  %9703 = vpow2.f32 %v8234_v54  ;;  %v8233_v9 = vmul.f32 -1.442695, %v12558_v46  ;;  %v8934_v43 = vpop.f32.mrb[16].mxu0  ;;  %v6829_v7 = vmul.f32 %v9682_v1, %v12489_v40 }
 0x4c4   : > { %v9686_v61 = vpop.eup %9685  ;;  %v6832_v45 = vmul.f32 %v9684_v38, %v12494_v12  ;;  %9705 = vpow2.f32 %v8232_v18  ;;  %v9034_v35 = vadd.f32 %v8934_v43, %v12337_v52  ;;  %v6503_v41 = vpop.f32.mrb[17].mxu0 }
 0x4c5   : > { %v9688_v58 = vpop.eup %9687  ;;  %v6830_v11 = vmul.f32 %v9686_v61, %v12498_v62  ;;  %9707 = vpow2.f32 %v8235_v39  ;;  %v9035_v49 = vadd.f32 %v6503_v41, %v12340_v20  ;;  %v8935_v63 = vpop.f32.mrb[18].mxu0 }
 0x4c6   : > { %v9690_v48 = vpop.eup %9689  ;;  %v6862_v25 = vpack.c.bf16 %v6832_v45, %v6831_v10  ;;  %v6743_v53 = vadd.f32 1.0, %v9688_v58  ;;  %9709 = vpow2.f32 %v8233_v9  ;;  %v12569_v32 = vadd.f32 %v9034_v35, %v12480_v55  ;;  %v6506_v12 = vpop.f32.mrb[19].mxu0 }
 0x4c7   : > { %v9692_v26 = vpop.eup %9691  ;;  %v6861_v52 = vpack.c.bf16 %v6830_v11, %v6829_v7  ;;  %v6741_v37 = vadd.f32 1.0, %v9690_v48  ;;  %v12572_v42 = vadd.f32 %v9035_v49, %v12480_v55  ;;  %v9036_v40 = vadd.f32 %v8935_v63, %v12346_v50 }
 0x4c8   : > { %v9694_v62 = vpop.eup %9693  ;;  %9711 = vrcp.f32 %v6743_v53  ;;  %v6744_v20 = vadd.f32 1.0, %v9692_v26  ;;  %v8238_v2 = vmul.f32 -1.442695, %v12569_v32  ;;  %v9037_v27 = vadd.f32 %v6506_v12, %v12352_v0 }
 0x4c9   : > { %v9696_v24 = vpop.eup %9695  ;;  %9713 = vrcp.f32 %v6741_v37  ;;  %v6742_v16 = vadd.f32 1.0, %v9694_v62  ;;  %v8236_v60 = vmul.f32 -1.442695, %v12572_v42  ;;  %v12579_v56 = vadd.f32 %v9036_v40, %v12480_v55  ;;  %8950 = vmatprep.mubr.msk.bf16.mxu1 %vm676_vm1, %v6861_v52 }
 0x4ca   : > { %v9698_v54 = vpop.eup %9697  ;;  %9715 = vrcp.f32 %v6744_v20  ;;  %v12583_v50 = vadd.f32 %v9037_v27, %v12480_v55  ;;  %8951 = vmatmul.mubr.msk.bf16.vlgmr.msra.gmra.mrb[96].mxu1 %vm676_vm1, %v6862_v25  ;;  %v6835_v0 = vmul.f32 %v9696_v24, %v12505_v36 }
 0x4cb   : > { %v9700_v51 = vpop.eup %9699  ;;  %9717 = vrcp.f32 %v6742_v16  ;;  %v8239_v18 = vmul.f32 -1.442695, %v12579_v56  ;;  %8983 = vmatpush3.bf16.msra.mxu1 %v12475_v22  ;;  %v8938_v1 = vpop.f32.mrb[20].mxu0  ;;  %v6833_v45 = vmul.f32 %v9698_v54, %v12509_v44 }
 0x4cc   : > { %v9702_v39 = vpop.eup %9701  ;;  %v6836_v38 = vmul.f32 %v9700_v51, %v12514_v29  ;;  %9719 = vpow2.f32 %v8238_v2  ;;  %v8237_v9 = vmul.f32 -1.442695, %v12583_v50  ;;  %v9038_v43 = vadd.f32 %v8938_v1, %v12361_v5  ;;  %v6519_v61 = vpop.f32.mrb[21].mxu0 }
 0x4cd   : > { %v9704_v10 = vpop.eup %9703  ;;  %v6834_v36 = vmul.f32 %v9702_v39, %v12518_v31  ;;  %9721 = vpow2.f32 %v8236_v60  ;;  %v9039_v35 = vadd.f32 %v6519_v61, %v12364_v6  ;;  %v8939_v41 = vpop.f32.mrb[22].mxu0 }
 0x4ce   : > { %v9706_v22 = vpop.eup %9705  ;;  %v6864_v58 = vpack.c.bf16 %v6836_v38, %v6835_v0  ;;  %v6747_v7 = vadd.f32 1.0, %v9704_v10  ;;  %9723 = vpow2.f32 %v8239_v18  ;;  %v12596_v29 = vadd.f32 %v9038_v43, %v12480_v55  ;;  %v6522_v11 = vpop.f32.mrb[23].mxu0 }
 0x4cf   : > { %v9708_v49 = vpop.eup %9707  ;;  %v6863_v5 = vpack.c.bf16 %v6834_v36, %v6833_v45  ;;  %v6745_v63 = vadd.f32 1.0, %v9706_v22  ;;  %9725 = vpow2.f32 %v8237_v9  ;;  %v12599_v44 = vadd.f32 %v9039_v35, %v12480_v55 }
 0x4d0   : > { %v9710_v31 = vpop.eup %9709  ;;  %9727 = vrcp.f32 %v6747_v7  ;;  %v6748_v48 = vadd.f32 1.0, %v9708_v49  ;;  %v8242_v6 = vmul.f32 -1.442695, %v12596_v29  ;;  %v9040_v25 = vadd.f32 %v8939_v41, %v12370_v23 }
 0x4d1   : > { %9729 = vrcp.f32 %v6745_v63  ;;  %v6746_v53 = vadd.f32 1.0, %v9710_v31  ;;  %v8240_v12 = vmul.f32 -1.442695, %v12599_v44  ;;  %v9041_v26 = vadd.f32 %v6522_v11, %v12376_v4  ;;  %8954 = vmatprep.mubr.msk.bf16.mxu1 %vm676_vm1, %v6863_v5 }
 0x4d2   : > { %v9712_v52 = vpop.eup %9711  ;;  %9731 = vrcp.f32 %v6748_v48  ;;  %v12607_v37 = vadd.f32 %v9040_v25, %v12480_v55  ;;  %8955 = vmatmul.mubr.msk.bf16.gmra.mrb[100].mxu1 %vm676_vm1, %v6864_v58 }
 0x4d3   : > { %v9714_v40 = vpop.eup %9713  ;;  %v6839_v62 = vmul.f32 %v9712_v52, %v12525_v34  ;;  %9733 = vrcp.f32 %v6746_v53  ;;  %v12612_v23 = vadd.f32 %v9041_v26, %v12480_v55  ;;  %v8942_v20 = vpop.f32.mrb[24].mxu0 }
 0x4d4   : > { %v9716_v2 = vpop.eup %9715  ;;  %v6837_v4 = vmul.f32 %v9714_v40, %v12529_v30  ;;  %9735 = vpow2.f32 %v8242_v6  ;;  %v8243_v27 = vmul.f32 -1.442695, %v12607_v37  ;;  %v9042_v24 = vadd.f32 %v8942_v20, %v12385_v57  ;;  %v6535_v16 = vpop.f32.mrb[25].mxu0 }
 0x4d5   : > { %v9718_v60 = vpop.eup %9717  ;;  %v6840_v54 = vmul.f32 %v9716_v2, %v12534_v33  ;;  %9737 = vpow2.f32 %v8240_v12  ;;  %v8241_v34 = vmul.f32 -1.442695, %v12612_v23  ;;  %v9043_v51 = vadd.f32 %v6535_v16, %v12388_v19  ;;  %v8943_v0 = vpop.f32.mrb[26].mxu0 }
 0x4d6   : > { %v9720_v18 = vpop.eup %9719  ;;  %v6838_v1 = vmul.f32 %v9718_v60, %v12538_v47  ;;  %9739 = vpow2.f32 %v8243_v27  ;;  %v12622_v30 = vadd.f32 %v9042_v24, %v12480_v55  ;;  %v9044_v39 = vadd.f32 %v8943_v0, %v12394_v59  ;;  %v6538_v57 = vpop.f32.mrb[27].mxu0 }
 0x4d7   : > { %v9722_v38 = vpop.eup %9721  ;;  %v6866_v9 = vpack.c.bf16 %v6840_v54, %v6839_v62  ;;  %v6751_v43 = vadd.f32 1.0, %v9720_v18  ;;  %9741 = vpow2.f32 %v8241_v34  ;;  %v12626_v33 = vadd.f32 %v9043_v51, %v12480_v55 }
 0x4d8   : > { %v9724_v61 = vpop.eup %9723  ;;  %v6865_v19 = vpack.c.bf16 %v6838_v1, %v6837_v4  ;;  %v6749_v10 = vadd.f32 1.0, %v9722_v38  ;;  %v12629_v45 = vadd.f32 %v9044_v39, %v12480_v55  ;;  %v8246_v35 = vmul.f32 -1.442695, %v12622_v30 }
 0x4d9   : > { %v9726_v47 = vpop.eup %9725  ;;  %9743 = vrcp.f32 %v6751_v43  ;;  %v6752_v36 = vadd.f32 1.0, %v9724_v61  ;;  %v9045_v59 = vadd.f32 %v6538_v57, %v12400_v3  ;;  %v8244_v58 = vmul.f32 -1.442695, %v12626_v33 }
 0x4da   : > { %v9728_v41 = vpop.eup %9727  ;;  %9745 = vrcp.f32 %v6749_v10  ;;  %v6750_v22 = vadd.f32 1.0, %v9726_v47  ;;  %8958 = vmatprep.mubr.msk.bf16.mxu1 %vm676_vm1, %v6865_v19  ;;  %v8247_v11 = vmul.f32 -1.442695, %v12629_v45 }
 0x4db   : > { %v9730_v7 = vpop.eup %9729  ;;  %9747 = vrcp.f32 %v6752_v36  ;;  %v12637_v49 = vadd.f32 %v9045_v59, %v12480_v55  ;;  %8959 = vmatmul.mubr.msk.bf16.gmra.mrb[104].mxu1 %vm676_vm1, %v6866_v9  ;;  %v8946_v5 = vpop.f32.mrb[28].mxu0  ;;  %v6843_v3 = vmul.f32 %v9728_v41, %v12545_v28 }
 0x4dc   : > { %v9732_v63 = vpop.eup %9731  ;;  %v6841_v31 = vmul.f32 %v9730_v7, %v12549_v21  ;;  %9749 = vrcp.f32 %v6750_v22  ;;  %v9046_v48 = vadd.f32 %v8946_v5, %v12409_v17  ;;  %v6551_v6 = vpop.f32.mrb[29].mxu0 }
 0x4dd   : > { %v9734_v25 = vpop.eup %9733  ;;  %v6844_v53 = vmul.f32 %v9732_v63, %v12554_v13  ;;  %9751 = vpow2.f32 %v8246_v35  ;;  %v8245_v12 = vmul.f32 -1.442695, %v12637_v49  ;;  %v9047_v26 = vadd.f32 %v6551_v6, %v12412_v15  ;;  %v8947_v52 = vpop.f32.mrb[30].mxu0 }
 0x4de   : > { %v9736_v40 = vpop.eup %9735  ;;  %v6842_v62 = vmul.f32 %v9734_v25, %v12558_v46  ;;  %9753 = vpow2.f32 %v8244_v58  ;;  %v12648_v28 = vadd.f32 %v9046_v48, %v12480_v55  ;;  %v9048_v21 = vadd.f32 %v8947_v52, %v12418_v14  ;;  %v6554_v17 = vpop.f32.mrb[31].mxu0 }
 0x4df   : > { %v9738_v20 = vpop.eup %9737  ;;  %v6868_v2 = vpack.c.bf16 %v6844_v53, %v6843_v3  ;;  %v6755_v4 = vadd.f32 1.0, %v9736_v40  ;;  %9755 = vpow2.f32 %v8247_v11  ;;  %v12652_v13 = vadd.f32 %v9047_v26, %v12480_v55 }
 0x4e0   : > { %v9740_v27 = vpop.eup %9739  ;;  %v6867_v15 = vpack.c.bf16 %v6842_v62, %v6841_v31  ;;  %v6753_v24 = vadd.f32 1.0, %v9738_v20  ;;  %9757 = vpow2.f32 %v8245_v12  ;;  %v8250_v60 = vmul.f32 -1.442695, %v12648_v28 }
 0x4e1   : > { %v9742_v16 = vpop.eup %9741  ;;  %9759 = vrcp.f32 %v6755_v4  ;;  %v6756_v46 = vadd.f32 1.0, %v9740_v27  ;;  %v12656_v54 = vadd.f32 %v9048_v21, %v12480_v55  ;;  %v8248_v34 = vmul.f32 -1.442695, %v12652_v13 }
 0x4e2   : > { %9761 = vrcp.f32 %v6753_v24  ;;  %v6754_v14 = vadd.f32 1.0, %v9742_v16  ;;  %v9049_v51 = vadd.f32 %v6554_v17, %v12424_v8  ;;  %8962 = vmatprep.mubr.msk.bf16.mxu1 %vm676_vm1, %v6867_v15 }
 0x4e3   : > { %v9744_v0 = vpop.eup %9743  ;;  %9763 = vrcp.f32 %v6756_v46  ;;  %v8251_v18 = vmul.f32 -1.442695, %v12656_v54  ;;  %8963 = vmatmul.mubr.msk.bf16.gmra.mrb[108].mxu1 %vm676_vm1, %v6868_v2 }
 0x4e4   : > { %v9746_v1 = vpop.eup %9745  ;;  %9765 = vrcp.f32 %v6754_v14  ;;  %v12664_v39 = vadd.f32 %v9049_v51, %v12480_v55  ;;  %v6847_v9 = vmul.f32 %v9744_v0, %v12569_v32  ;;  %v13281_v51 = vld [vmem:[#allocation3_spill] sm:$0xff] }
 0x4e5   : > { %v9748_v57 = vpop.eup %9747  ;;  %9767 = vpow2.f32 %v8250_v60  ;;  %v6845_v19 = vmul.f32 %v9746_v1, %v12572_v42  ;;  %v13285_v0 = vld [vmem:[#allocation7_spill] sm:$0xff]  ;;  %v13287_v1 = vld [vmem:[#allocation9_spill] sm:$0xff] }
 0x4e6   : > { %v9750_v38 = vpop.eup %9749  ;;  %v6848_v8 = vmul.f32 %v9748_v57, %v12579_v56  ;;  %9769 = vpow2.f32 %v8248_v34  ;;  %v8249_v43 = vmul.f32 -1.442695, %v12664_v39  ;;  %v13280_v34 = vld [vmem:[#allocation4_spill] sm:$0xff]  ;;  %v13289_v57 = vld [vmem:[#allocation11_spill] sm:$0xff] }
 0x4e7   : > { %v9752_v61 = vpop.eup %9751  ;;  %v6846_v10 = vmul.f32 %v9750_v38, %v12583_v50  ;;  %9771 = vpow2.f32 %v8251_v18  ;;  %v13286_v18 = vld [vmem:[#allocation10_spill] sm:$0xff] }
 0x4e8   : > { %v9754_v47 = vpop.eup %9753  ;;  %v6870_v36 = vpack.c.bf16 %v6848_v8, %v6847_v9  ;;  %v6759_v55 = vadd.f32 1.0, %v9752_v61  ;;  %9773 = vpow2.f32 %v8249_v43  ;;  %v13290_v38 = vld [vmem:[#allocation14_spill] sm:$0xff]  ;;  %v13291_v9 = vld [vmem:[#allocation13_spill] sm:$0xff]  ;;  %v13292_v8 = vld [vmem:[#allocation16_spill] sm:$0xff] }
 0x4e9   : > { %v9756_v35 = vpop.eup %9755  ;;  %v6869_v59 = vpack.c.bf16 %v6846_v10, %v6845_v19  ;;  %v6757_v41 = vadd.f32 1.0, %v9754_v47  ;;  %v13293_v43 = vld [vmem:[#allocation15_spill] sm:$0xff]  ;;  %v13294_v61 = vld [vmem:[#allocation18_spill] sm:$0xff]  ;;  %v13295_v19 = vld [vmem:[#allocation17_spill] sm:$0xff] }
 0x4ea   : > { %v9758_v22 = vpop.eup %9757  ;;  %9775 = vrcp.f32 %v6759_v55  ;;  %v6760_v32 = vadd.f32 1.0, %v9756_v35  ;;  %v12726_v10 = vld [vmem:[%s12977_s10] ss:$0 sm:$0xff] }
 0x4eb   : > { %v9760_v56 = vpop.eup %9759  ;;  %9777 = vrcp.f32 %v6757_v41  ;;  %v6758_v58 = vadd.f32 1.0, %v9758_v22  ;;  %8966 = vmatprep.mubr.msk.bf16.mxu1 %vm676_vm1, %v6869_v59 }
 0x4ec   : > { %v9762_v7 = vpop.eup %9761  ;;  %9779 = vrcp.f32 %v6760_v32  ;;  %8967 = vmatmul.mubr.msk.bf16.gmra.mrb[112].mxu1 %vm676_vm1, %v6870_v36  ;;  %v6851_v11 = vmul.f32 %v9760_v56, %v12596_v29 }
 0x4ed   : > { %v9764_v42 = vpop.eup %9763  ;;  %9781 = vrcp.f32 %v6758_v58  ;;  %v6849_v3 = vmul.f32 %v9762_v7, %v12599_v44 }
 0x4ee   : > { %v9766_v50 = vpop.eup %9765  ;;  %v6852_v5 = vmul.f32 %v9764_v42, %v12607_v37 }
 0x4ef   : > { %v9768_v63 = vpop.eup %9767  ;;  %v6850_v31 = vmul.f32 %v9766_v50, %v12612_v23 }
 0x4f0   : > { %v9770_v48 = vpop.eup %9769  ;;  %v6872_v6 = vpack.c.bf16 %v6852_v5, %v6851_v11  ;;  %v6763_v25 = vadd.f32 1.0, %v9768_v63 }
 0x4f1   : > { %v9772_v53 = vpop.eup %9771  ;;  %v6871_v12 = vpack.c.bf16 %v6850_v31, %v6849_v3  ;;  %v6761_v26 = vadd.f32 1.0, %v9770_v48 }
 0x4f2   : > { %v9774_v52 = vpop.eup %9773  ;;  %9783 = vrcp.f32 %v6763_v25  ;;  %v6764_v40 = vadd.f32 1.0, %v9772_v53 }
 0x4f3   : > { %9785 = vrcp.f32 %v6761_v26  ;;  %v6762_v62 = vadd.f32 1.0, %v9774_v52  ;;  %8970 = vmatprep.mubr.msk.bf16.mxu1 %vm676_vm1, %v6871_v12 }
 0x4f4   : > { %v9776_v29 = vpop.eup %9775  ;;  %9787 = vrcp.f32 %v6764_v40  ;;  %8971 = vmatmul.mubr.msk.bf16.gmra.mrb[116].mxu1 %vm676_vm1, %v6872_v6 }
 0x4f5   : > { %v9778_v44 = vpop.eup %9777  ;;  %9789 = vrcp.f32 %v6762_v62  ;;  %v6855_v21 = vmul.f32 %v9776_v29, %v12622_v30 }
 0x4f6   : > { %v9780_v37 = vpop.eup %9779  ;;  %v6853_v20 = vmul.f32 %v9778_v44, %v12626_v33 }
 0x4f7   : > { %v9782_v23 = vpop.eup %9781  ;;  %v6856_v17 = vmul.f32 %v9780_v37, %v12629_v45 }
 0x4f8   : > { %v6854_v2 = vmul.f32 %v9782_v23, %v12637_v49 }
 0x4f9   : > { %v6874_v4 = vpack.c.bf16 %v6856_v17, %v6855_v21 }
 0x4fa   : > { %v6873_v27 = vpack.c.bf16 %v6854_v2, %v6853_v20 }
 0x4fc   : > { %v9784_v15 = vpop.eup %9783  ;;  %8974 = vmatprep.mubr.msk.bf16.mxu1 %vm676_vm1, %v6873_v27 }
 0x4fd   : > { %v9786_v24 = vpop.eup %9785  ;;  %8975 = vmatmul.mubr.msk.bf16.gmra.mrb[120].mxu1 %vm676_vm1, %v6874_v4  ;;  %v6859_v60 = vmul.f32 %v9784_v15, %v12648_v28  ;;  %v13282_v28 = vld [vmem:[#allocation6_spill] sm:$0xff] }
 0x4fe   : > { %v9788_v16 = vpop.eup %9787  ;;  %v6857_v45 = vmul.f32 %v9786_v24, %v12652_v13  ;;  %v13284_v13 = vld [vmem:[#allocation8_spill] sm:$0xff] }
 0x4ff   : > { %v9790_v46 = vpop.eup %9789  ;;  %v6860_v30 = vmul.f32 %v9788_v16, %v12656_v54  ;;  %v13283_v54 = vld [vmem:[#allocation5_spill] sm:$0xff] }
 0x500   : > { %v6858_v33 = vmul.f32 %v9790_v46, %v12664_v39  ;;  %v13288_v39 = vld [vmem:[#allocation12_spill] sm:$0xff] }
 0x501   : > { %v6876_v14 = vpack.c.bf16 %v6860_v30, %v6859_v60 }
 0x502   : > { %v6875_v49 = vpack.c.bf16 %v6858_v33, %v6857_v45 }
 0x504   : > { %8978 = vmatprep.mubr.msk.bf16.mxu1 %vm676_vm1, %v6875_v49 }
 0x505   : > { %8979 = vmatmul.mubr.msk.bf16.gmra.mrb[124].mxu1 %vm676_vm1, %v6876_v14 }
 0x506   : > { %8984 = vmatprep.mubr.msk.bf16.mxu1 %vm7090_vm0, %v13280_v34 }
 0x50d   : > { %8985 = vmatmul.mubr.msk.bf16.vlgmr.msra.gmra.mrb[96].mxu1 %vm7090_vm0, %v13281_v51 }
 0x50e   : > { %8988 = vmatprep.mubr.msk.bf16.mxu1 %vm7090_vm0, %v13282_v28 }
 0x515   : > { %8989 = vmatmul.mubr.msk.bf16.gmra.mrb[100].mxu1 %vm7090_vm0, %v13283_v54 }
 0x516   : > { %8992 = vmatprep.mubr.msk.bf16.mxu1 %vm7090_vm0, %v13284_v13 }
 0x51d   : > { %8993 = vmatmul.mubr.msk.bf16.gmra.mrb[104].mxu1 %vm7090_vm0, %v13285_v0 }
 0x51e   : > { %8996 = vmatprep.mubr.msk.bf16.mxu1 %vm7090_vm0, %v13286_v18 }
 0x525   : > { %8997 = vmatmul.mubr.msk.bf16.gmra.mrb[108].mxu1 %vm7090_vm0, %v13287_v1 }
 0x526   : > { %9000 = vmatprep.mubr.msk.bf16.mxu1 %vm7090_vm0, %v13288_v39 }
 0x52d   : > { %9001 = vmatmul.mubr.msk.bf16.gmra.mrb[112].mxu1 %vm7090_vm0, %v13289_v57 }
 0x52e   : > { %9004 = vmatprep.mubr.msk.bf16.mxu1 %vm7090_vm0, %v13290_v38 }
 0x535   : > { %9005 = vmatmul.mubr.msk.bf16.gmra.mrb[116].mxu1 %vm7090_vm0, %v13291_v9 }
 0x536   : > { %9008 = vmatprep.mubr.msk.bf16.mxu1 %vm7090_vm0, %v13292_v8 }
 0x53d   : > { %9009 = vmatmul.mubr.msk.bf16.gmra.mrb[120].mxu1 %vm7090_vm0, %v13293_v43 }
 0x53e   : > { %9012 = vmatprep.mubr.msk.bf16.mxu1 %vm7090_vm0, %v13294_v61 }
 0x545   : > { %9013 = vmatmul.mubr.msk.bf16.gmra.mrb[124].mxu1 %vm7090_vm0, %v13295_v19 }
 0x5e0   : > { %v8986_v47 = vpop.f32.mrb[96].mxu1 }
 0x5e1   : > { %v12729_v36 = vadd.f32 %v8986_v47, %v12726_v10  ;;  %v7160_v55 = vpop.f32.mrb[97].mxu1 }
 0x5e2   : > { %v12732_v35 = vadd.f32 %v12726_v10, %v7160_v55  ;;  %v8987_v59 = vpop.f32.mrb[98].mxu1 }
 0x5e3   : > { %v8287_v41 = vmul.f32 -1.442695, %v12729_v36  ;;  %v12736_v22 = vadd.f32 %v8987_v59, %v12726_v10  ;;  %v7163_v32 = vpop.f32.mrb[99].mxu1 }
 0x5e4   : > { %v8285_v56 = vmul.f32 -1.442695, %v12732_v35  ;;  %v12740_v58 = vadd.f32 %v12726_v10, %v7163_v32 }
 0x5e5   : > { %9791 = vpow2.f32 %v8287_v41  ;;  %v8288_v7 = vmul.f32 -1.442695, %v12736_v22 }
 0x5e6   : > { %9793 = vpow2.f32 %v8285_v56  ;;  %v8286_v42 = vmul.f32 -1.442695, %v12740_v58 }
 0x5e7   : > { %9795 = vpow2.f32 %v8288_v7 }
 0x5e8   : > { %9797 = vpow2.f32 %v8286_v42  ;;  %v8990_v50 = vpop.f32.mrb[100].mxu1 }
 0x5e9   : > { %v12745_v11 = vadd.f32 %v8990_v50, %v12726_v10  ;;  %v7176_v5 = vpop.f32.mrb[101].mxu1 }
 0x5ea   : > { %v12748_v63 = vadd.f32 %v12726_v10, %v7176_v5  ;;  %v8991_v3 = vpop.f32.mrb[102].mxu1 }
 0x5eb   : > { %v8291_v31 = vmul.f32 -1.442695, %v12745_v11  ;;  %v12752_v48 = vadd.f32 %v8991_v3, %v12726_v10  ;;  %v7179_v6 = vpop.f32.mrb[103].mxu1 }
 0x5ec   : > { %v8289_v25 = vmul.f32 -1.442695, %v12748_v63  ;;  %v12756_v53 = vadd.f32 %v12726_v10, %v7179_v6 }
 0x5ed   : > { %9799 = vpow2.f32 %v8291_v31  ;;  %v8292_v12 = vmul.f32 -1.442695, %v12752_v48 }
 0x5ee   : > { %9801 = vpow2.f32 %v8289_v25  ;;  %v8290_v26 = vmul.f32 -1.442695, %v12756_v53 }
 0x5ef   : > { %v9792_v52 = vpop.eup %9791  ;;  %9803 = vpow2.f32 %v8292_v12 }
 0x5f0   : > { %v9794_v40 = vpop.eup %9793  ;;  %v7424_v62 = vadd.f32 1.0, %v9792_v52  ;;  %9805 = vpow2.f32 %v8290_v26  ;;  %v8994_v29 = vpop.f32.mrb[104].mxu1 }
 0x5f1   : > { %v9796_v44 = vpop.eup %9795  ;;  %v7422_v37 = vadd.f32 1.0, %v9794_v40  ;;  %v12761_v23 = vadd.f32 %v8994_v29, %v12726_v10  ;;  %v7192_v21 = vpop.f32.mrb[105].mxu1 }
 0x5f2   : > { %v9798_v17 = vpop.eup %9797  ;;  %9807 = vrcp.f32 %v7424_v62  ;;  %v7425_v20 = vadd.f32 1.0, %v9796_v44  ;;  %v12764_v2 = vadd.f32 %v12726_v10, %v7192_v21  ;;  %v8995_v4 = vpop.f32.mrb[106].mxu1 }
 0x5f3   : > { %9809 = vrcp.f32 %v7422_v37  ;;  %v7423_v27 = vadd.f32 1.0, %v9798_v17  ;;  %v8295_v15 = vmul.f32 -1.442695, %v12761_v23  ;;  %v12768_v24 = vadd.f32 %v8995_v4, %v12726_v10  ;;  %v7195_v16 = vpop.f32.mrb[107].mxu1 }
 0x5f4   : > { %9811 = vrcp.f32 %v7425_v20  ;;  %v8293_v46 = vmul.f32 -1.442695, %v12764_v2  ;;  %v12772_v60 = vadd.f32 %v12726_v10, %v7195_v16 }
 0x5f5   : > { %9813 = vrcp.f32 %v7423_v27  ;;  %v8296_v30 = vmul.f32 -1.442695, %v12768_v24 }
 0x5f6   : > { %9815 = vpow2.f32 %v8295_v15  ;;  %v8294_v45 = vmul.f32 -1.442695, %v12772_v60 }
 0x5f7   : > { %v9800_v33 = vpop.eup %9799  ;;  %9817 = vpow2.f32 %v8293_v46 }
 0x5f8   : > { %v9802_v14 = vpop.eup %9801  ;;  %v7428_v49 = vadd.f32 1.0, %v9800_v33  ;;  %9819 = vpow2.f32 %v8296_v30  ;;  %v8998_v34 = vpop.f32.mrb[108].mxu1 }
 0x5f9   : > { %v9804_v51 = vpop.eup %9803  ;;  %v7426_v28 = vadd.f32 1.0, %v9802_v14  ;;  %9821 = vpow2.f32 %v8294_v45  ;;  %v12778_v54 = vadd.f32 %v8998_v34, %v12726_v10  ;;  %v7208_v13 = vpop.f32.mrb[109].mxu1 }
 0x5fa   : > { %v9806_v0 = vpop.eup %9805  ;;  %9823 = vrcp.f32 %v7428_v49  ;;  %v7429_v18 = vadd.f32 1.0, %v9804_v51  ;;  %v12781_v1 = vadd.f32 %v12726_v10, %v7208_v13  ;;  %v8999_v39 = vpop.f32.mrb[110].mxu1 }
 0x5fb   : > { %9825 = vrcp.f32 %v7426_v28  ;;  %v7427_v57 = vadd.f32 1.0, %v9806_v0  ;;  %v8299_v38 = vmul.f32 -1.442695, %v12778_v54  ;;  %v12785_v9 = vadd.f32 %v8999_v39, %v12726_v10  ;;  %v7211_v8 = vpop.f32.mrb[111].mxu1 }
 0x5fc   : > { %v9808_v43 = vpop.eup %9807  ;;  %9827 = vrcp.f32 %v7429_v18  ;;  %v8297_v61 = vmul.f32 -1.442695, %v12781_v1  ;;  %v12794_v19 = vadd.f32 %v12726_v10, %v7211_v8 }
 0x5fd   : > { %v9810_v47 = vpop.eup %9809  ;;  %v7520_v55 = vmul.f32 %v9808_v43, %v12729_v36  ;;  %9829 = vrcp.f32 %v7427_v57  ;;  %v8300_v59 = vmul.f32 -1.442695, %v12785_v9 }
 0x5fe   : > { %v9812_v41 = vpop.eup %9811  ;;  %v7518_v32 = vmul.f32 %v9810_v47, %v12732_v35  ;;  %9831 = vpow2.f32 %v8299_v38  ;;  %v8298_v56 = vmul.f32 -1.442695, %v12794_v19 }
 0x5ff   : > { %v9814_v7 = vpop.eup %9813  ;;  %7552 = vst.msk [vmem:[%s12790_s1 + $0x10] sm:$0xff] %vm7090_vm0, %v7520_v55  ;;  %v7521_v42 = vmul.f32 %v9812_v41, %v12736_v22  ;;  %9833 = vpow2.f32 %v8297_v61 }
 0x600   : > { %v9816_v50 = vpop.eup %9815  ;;  %7550 = vst.msk [vmem:[%s12790_s1] sm:$0xff] %vm7090_vm0, %v7518_v32  ;;  %v7519_v36 = vmul.f32 %v9814_v7, %v12740_v58  ;;  %9835 = vpow2.f32 %v8300_v59  ;;  %v9002_v5 = vpop.f32.mrb[112].mxu1 }
 0x601   : > { %v9818_v3 = vpop.eup %9817  ;;  %7553 = vst.msk [vmem:[%s12790_s1 + $0x18] sm:$0xff] %vm7090_vm0, %v7521_v42  ;;  %v7432_v35 = vadd.f32 1.0, %v9816_v50  ;;  %9837 = vpow2.f32 %v8298_v56  ;;  %v12809_v31 = vadd.f32 %v9002_v5, %v12726_v10  ;;  %v7224_v6 = vpop.f32.mrb[113].mxu1 }
 0x602   : > { %v9820_v25 = vpop.eup %9819  ;;  %7551 = vst.msk [vmem:[%s12790_s1 + $0x8] sm:$0xff] %vm7090_vm0, %v7519_v36  ;;  %v7430_v22 = vadd.f32 1.0, %v9818_v3  ;;  %v12814_v12 = vadd.f32 %v12726_v10, %v7224_v6  ;;  %v9003_v26 = vpop.f32.mrb[114].mxu1 }
 0x603   : > { %v9822_v58 = vpop.eup %9821  ;;  %9839 = vrcp.f32 %v7432_v35  ;;  %v7433_v52 = vadd.f32 1.0, %v9820_v25  ;;  %v8303_v40 = vmul.f32 -1.442695, %v12809_v31  ;;  %v12818_v62 = vadd.f32 %v9003_v26, %v12726_v10  ;;  %v7227_v29 = vpop.f32.mrb[115].mxu1 }
 0x604   : > { %v9824_v44 = vpop.eup %9823  ;;  %9841 = vrcp.f32 %v7430_v22  ;;  %v7431_v37 = vadd.f32 1.0, %v9822_v58  ;;  %v8301_v21 = vmul.f32 -1.442695, %v12814_v12  ;;  %v12822_v17 = vadd.f32 %v12726_v10, %v7227_v29 }
 0x605   : > { %v9826_v20 = vpop.eup %9825  ;;  %v7524_v4 = vmul.f32 %v9824_v44, %v12745_v11  ;;  %9843 = vrcp.f32 %v7433_v52  ;;  %v8304_v27 = vmul.f32 -1.442695, %v12818_v62 }
 0x606   : > { %v9828_v15 = vpop.eup %9827  ;;  %v7522_v16 = vmul.f32 %v9826_v20, %v12748_v63  ;;  %9845 = vrcp.f32 %v7431_v37  ;;  %v8302_v46 = vmul.f32 -1.442695, %v12822_v17 }
 0x607   : > { %v9830_v30 = vpop.eup %9829  ;;  %7556 = vst.msk [vmem:[%s12790_s1 + $0x30] sm:$0xff] %vm7090_vm0, %v7524_v4  ;;  %v7525_v45 = vmul.f32 %v9828_v15, %v12752_v48  ;;  %9847 = vpow2.f32 %v8303_v40 }
 0x608   : > { %v9832_v33 = vpop.eup %9831  ;;  %7554 = vst.msk [vmem:[%s12790_s1 + $0x20] sm:$0xff] %vm7090_vm0, %v7522_v16  ;;  %v7523_v11 = vmul.f32 %v9830_v30, %v12756_v53  ;;  %9849 = vpow2.f32 %v8301_v21  ;;  %v9006_v14 = vpop.f32.mrb[116].mxu1 }
 0x609   : > { %v9834_v49 = vpop.eup %9833  ;;  %7557 = vst.msk [vmem:[%s12790_s1 + $0x38] sm:$0xff] %vm7090_vm0, %v7525_v45  ;;  %v7436_v63 = vadd.f32 1.0, %v9832_v33  ;;  %9851 = vpow2.f32 %v8304_v27  ;;  %v12837_v34 = vadd.f32 %v9006_v14, %v12726_v10  ;;  %v7240_v51 = vpop.f32.mrb[117].mxu1 }
 0x60a   : > { %v9836_v28 = vpop.eup %9835  ;;  %7555 = vst.msk [vmem:[%s12790_s1 + $0x28] sm:$0xff] %vm7090_vm0, %v7523_v11  ;;  %v7434_v48 = vadd.f32 1.0, %v9834_v49  ;;  %9853 = vpow2.f32 %v8302_v46  ;;  %v12842_v13 = vadd.f32 %v12726_v10, %v7240_v51  ;;  %v9007_v53 = vpop.f32.mrb[118].mxu1 }
 0x60b   : > { %v9838_v0 = vpop.eup %9837  ;;  %9855 = vrcp.f32 %v7436_v63  ;;  %v7437_v18 = vadd.f32 1.0, %v9836_v28  ;;  %v8307_v39 = vmul.f32 -1.442695, %v12837_v34  ;;  %v12846_v57 = vadd.f32 %v9007_v53, %v12726_v10  ;;  %v7243_v38 = vpop.f32.mrb[119].mxu1 }
 0x60c   : > { %9857 = vrcp.f32 %v7434_v48  ;;  %v7435_v8 = vadd.f32 1.0, %v9838_v0  ;;  %v8305_v43 = vmul.f32 -1.442695, %v12842_v13  ;;  %v12850_v61 = vadd.f32 %v12726_v10, %v7243_v38 }
 0x60d   : > { %v9840_v47 = vpop.eup %9839  ;;  %9859 = vrcp.f32 %v7437_v18  ;;  %v8308_v55 = vmul.f32 -1.442695, %v12846_v57 }
 0x60e   : > { %v9842_v59 = vpop.eup %9841  ;;  %v7528_v41 = vmul.f32 %v9840_v47, %v12761_v23  ;;  %9861 = vrcp.f32 %v7435_v8  ;;  %v8306_v32 = vmul.f32 -1.442695, %v12850_v61 }
 0x60f   : > { %v9844_v56 = vpop.eup %9843  ;;  %v7526_v7 = vmul.f32 %v9842_v59, %v12764_v2  ;;  %9863 = vpow2.f32 %v8307_v39 }
 0x610   : > { %v9846_v42 = vpop.eup %9845  ;;  %7560 = vst.msk [vmem:[%s12790_s1 + $0x50] sm:$0xff] %vm7090_vm0, %v7528_v41  ;;  %v7529_v50 = vmul.f32 %v9844_v56, %v12768_v24  ;;  %9865 = vpow2.f32 %v8305_v43  ;;  %v9010_v36 = vpop.f32.mrb[120].mxu1 }
 0x611   : > { %v9848_v5 = vpop.eup %9847  ;;  %7558 = vst.msk [vmem:[%s12790_s1 + $0x40] sm:$0xff] %vm7090_vm0, %v7526_v7  ;;  %v7527_v23 = vmul.f32 %v9846_v42, %v12772_v60  ;;  %9867 = vpow2.f32 %v8308_v55  ;;  %v12863_v3 = vadd.f32 %v9010_v36, %v12726_v10  ;;  %v7256_v35 = vpop.f32.mrb[121].mxu1 }
 0x612   : > { %v9850_v2 = vpop.eup %9849  ;;  %7561 = vst.msk [vmem:[%s12790_s1 + $0x58] sm:$0xff] %vm7090_vm0, %v7529_v50  ;;  %v7440_v6 = vadd.f32 1.0, %v9848_v5  ;;  %9869 = vpow2.f32 %v8306_v32  ;;  %v12868_v24 = vadd.f32 %v12726_v10, %v7256_v35  ;;  %v9011_v25 = vpop.f32.mrb[122].mxu1 }
 0x613   : > { %v9852_v22 = vpop.eup %9851  ;;  %7559 = vst.msk [vmem:[%s12790_s1 + $0x48] sm:$0xff] %vm7090_vm0, %v7527_v23  ;;  %v7438_v26 = vadd.f32 1.0, %v9850_v2  ;;  %v12873_v60 = vadd.f32 %v9011_v25, %v12726_v10  ;;  %v7259_v58 = vpop.f32.mrb[123].mxu1  ;;  %v8311_v29 = vmul.f32 -1.442695, %v12863_v3 }
 0x614   : > { %v9854_v52 = vpop.eup %9853  ;;  %9871 = vrcp.f32 %v7440_v6  ;;  %v7441_v40 = vadd.f32 1.0, %v9852_v22  ;;  %v12877_v44 = vadd.f32 %v12726_v10, %v7259_v58  ;;  %v8309_v20 = vmul.f32 -1.442695, %v12868_v24 }
 0x615   : > { %v9856_v37 = vpop.eup %9855  ;;  %9873 = vrcp.f32 %v7438_v26  ;;  %v7439_v21 = vadd.f32 1.0, %v9854_v52  ;;  %v8312_v15 = vmul.f32 -1.442695, %v12873_v60 }
 0x616   : > { %v9858_v4 = vpop.eup %9857  ;;  %v7532_v27 = vmul.f32 %v9856_v37, %v12778_v54  ;;  %9875 = vrcp.f32 %v7441_v40  ;;  %v8310_v30 = vmul.f32 -1.442695, %v12877_v44 }
 0x617   : > { %v9860_v16 = vpop.eup %9859  ;;  %v7530_v46 = vmul.f32 %v9858_v4, %v12781_v1  ;;  %9877 = vrcp.f32 %v7439_v21 }
 0x618   : > { %v9862_v45 = vpop.eup %9861  ;;  %7564 = vst.msk [vmem:[%s12790_s1 + $0x70] sm:$0xff] %vm7090_vm0, %v7532_v27  ;;  %v7533_v33 = vmul.f32 %v9860_v16, %v12785_v9  ;;  %9879 = vpow2.f32 %v8311_v29  ;;  %v9014_v11 = vpop.f32.mrb[124].mxu1 }
 0x619   : > { %v9864_v14 = vpop.eup %9863  ;;  %7562 = vst.msk [vmem:[%s12790_s1 + $0x60] sm:$0xff] %vm7090_vm0, %v7530_v46  ;;  %v7531_v54 = vmul.f32 %v9862_v45, %v12794_v19  ;;  %9881 = vpow2.f32 %v8309_v20  ;;  %v12891_v49 = vadd.f32 %v9014_v11, %v12726_v10  ;;  %v7272_v1 = vpop.f32.mrb[125].mxu1 }
 0x61a   : > { %v9866_v63 = vpop.eup %9865  ;;  %7565 = vst.msk [vmem:[%s12790_s1 + $0x78] sm:$0xff] %vm7090_vm0, %v7533_v33  ;;  %v7444_v51 = vadd.f32 1.0, %v9864_v14  ;;  %9883 = vpow2.f32 %v8312_v15  ;;  %v12896_v9 = vadd.f32 %v12726_v10, %v7272_v1  ;;  %v9015_v28 = vpop.f32.mrb[126].mxu1 }
 0x61b   : > { %v9868_v48 = vpop.eup %9867  ;;  %7563 = vst.msk [vmem:[%s12790_s1 + $0x68] sm:$0xff] %vm7090_vm0, %v7531_v54  ;;  %v7442_v53 = vadd.f32 1.0, %v9866_v63  ;;  %9885 = vpow2.f32 %v8310_v30  ;;  %v12901_v19 = vadd.f32 %v9015_v28, %v12726_v10  ;;  %v7275_v0 = vpop.f32.mrb[127].mxu1  ;;  %v8315_v38 = vmul.f32 -1.442695, %v12891_v49 }
 0x61c   : > { %v9870_v18 = vpop.eup %9869  ;;  %9887 = vrcp.f32 %v7444_v51  ;;  %v7445_v39 = vadd.f32 1.0, %v9868_v48  ;;  %v12905_v8 = vadd.f32 %v12726_v10, %v7275_v0  ;;  %v8313_v47 = vmul.f32 -1.442695, %v12896_v9 }
 0x61d   : > { %9889 = vrcp.f32 %v7442_v53  ;;  %v7443_v43 = vadd.f32 1.0, %v9870_v18  ;;  %v8316_v59 = vmul.f32 -1.442695, %v12901_v19 }
 0x61e   : > { %v9872_v55 = vpop.eup %9871  ;;  %9891 = vrcp.f32 %v7445_v39  ;;  %v8314_v56 = vmul.f32 -1.442695, %v12905_v8 }
 0x61f   : > { %v9874_v41 = vpop.eup %9873  ;;  %v7536_v32 = vmul.f32 %v9872_v55, %v12809_v31  ;;  %9893 = vrcp.f32 %v7443_v43 }
 0x620   : > { %v9876_v7 = vpop.eup %9875  ;;  %v7534_v10 = vmul.f32 %v9874_v41, %v12814_v12  ;;  %9895 = vpow2.f32 %v8315_v38 }
 0x621   : > { %v9878_v42 = vpop.eup %9877  ;;  %7568 = vst.msk [vmem:[%s12790_s1 + $0x90] sm:$0xff] %vm7090_vm0, %v7536_v32  ;;  %v7537_v50 = vmul.f32 %v9876_v7, %v12818_v62  ;;  %9897 = vpow2.f32 %v8313_v47 }
 0x622   : > { %v9880_v36 = vpop.eup %9879  ;;  %7566 = vst.msk [vmem:[%s12790_s1 + $0x80] sm:$0xff] %vm7090_vm0, %v7534_v10  ;;  %v7535_v5 = vmul.f32 %v9878_v42, %v12822_v17  ;;  %9899 = vpow2.f32 %v8316_v59 }
 0x623   : > { %v9882_v31 = vpop.eup %9881  ;;  %7569 = vst.msk [vmem:[%s12790_s1 + $0x98] sm:$0xff] %vm7090_vm0, %v7537_v50  ;;  %v7448_v23 = vadd.f32 1.0, %v9880_v36  ;;  %9901 = vpow2.f32 %v8314_v56 }
 0x624   : > { %v9884_v35 = vpop.eup %9883  ;;  %7567 = vst.msk [vmem:[%s12790_s1 + $0x88] sm:$0xff] %vm7090_vm0, %v7535_v5  ;;  %v7446_v12 = vadd.f32 1.0, %v9882_v31 }
 0x625   : > { %v9886_v2 = vpop.eup %9885  ;;  %9903 = vrcp.f32 %v7448_v23  ;;  %v7449_v62 = vadd.f32 1.0, %v9884_v35 }
 0x626   : > { %v9888_v6 = vpop.eup %9887  ;;  %9905 = vrcp.f32 %v7446_v12  ;;  %v7447_v25 = vadd.f32 1.0, %v9886_v2 }
 0x627   : > { %v9890_v17 = vpop.eup %9889  ;;  %v7540_v22 = vmul.f32 %v9888_v6, %v12837_v34  ;;  %9907 = vrcp.f32 %v7449_v62 }
 0x628   : > { %v9892_v26 = vpop.eup %9891  ;;  %v7538_v58 = vmul.f32 %v9890_v17, %v12842_v13  ;;  %9909 = vrcp.f32 %v7447_v25 }
 0x629   : > { %v9894_v52 = vpop.eup %9893  ;;  %7572 = vst.msk [vmem:[%s12790_s1 + $0xb0] sm:$0xff] %vm7090_vm0, %v7540_v22  ;;  %v7541_v40 = vmul.f32 %v9892_v26, %v12846_v57 }
 0x62a   : > { %v9896_v29 = vpop.eup %9895  ;;  %7570 = vst.msk [vmem:[%s12790_s1 + $0xa0] sm:$0xff] %vm7090_vm0, %v7538_v58  ;;  %v7539_v37 = vmul.f32 %v9894_v52, %v12850_v61 }
 0x62b   : > { %v9898_v21 = vpop.eup %9897  ;;  %7573 = vst.msk [vmem:[%s12790_s1 + $0xb8] sm:$0xff] %vm7090_vm0, %v7541_v40  ;;  %v7452_v20 = vadd.f32 1.0, %v9896_v29 }
 0x62c   : > { %v9900_v34 = vpop.eup %9899  ;;  %7571 = vst.msk [vmem:[%s12790_s1 + $0xa8] sm:$0xff] %vm7090_vm0, %v7539_v37  ;;  %v7450_v13 = vadd.f32 1.0, %v9898_v21 }
 0x62d   : > { %v9902_v4 = vpop.eup %9901  ;;  %9911 = vrcp.f32 %v7452_v20  ;;  %v7453_v27 = vadd.f32 1.0, %v9900_v34 }
 0x62e   : > { %9913 = vrcp.f32 %v7450_v13  ;;  %v7451_v57 = vadd.f32 1.0, %v9902_v4 }
 0x62f   : > { %v9904_v15 = vpop.eup %9903  ;;  %9915 = vrcp.f32 %v7453_v27 }
 0x630   : > { %v9906_v61 = vpop.eup %9905  ;;  %v7544_v16 = vmul.f32 %v9904_v15, %v12863_v3  ;;  %9917 = vrcp.f32 %v7451_v57 }
 0x631   : > { %v9908_v46 = vpop.eup %9907  ;;  %v7542_v30 = vmul.f32 %v9906_v61, %v12868_v24 }
 0x632   : > { %v9910_v45 = vpop.eup %9909  ;;  %7576 = vst.msk [vmem:[%s12790_s1 + $0xd0] sm:$0xff] %vm7090_vm0, %v7544_v16  ;;  %v7545_v33 = vmul.f32 %v9908_v46, %v12873_v60 }
 0x633   : > { %7574 = vst.msk [vmem:[%s12790_s1 + $0xc0] sm:$0xff] %vm7090_vm0, %v7542_v30  ;;  %v7543_v11 = vmul.f32 %v9910_v45, %v12877_v44 }
 0x634   : > { %7577 = vst.msk [vmem:[%s12790_s1 + $0xd8] sm:$0xff] %vm7090_vm0, %v7545_v33 }
 0x635   : > { %7575 = vst.msk [vmem:[%s12790_s1 + $0xc8] sm:$0xff] %vm7090_vm0, %v7543_v11 }
 0x637   : > { %v9912_v3 = vpop.eup %9911 }
 0x638   : > { %v9914_v14 = vpop.eup %9913  ;;  %v7548_v24 = vmul.f32 %v9912_v3, %v12891_v49 }
 0x639   : > { %v9916_v54 = vpop.eup %9915  ;;  %v7546_v1 = vmul.f32 %v9914_v14, %v12896_v9 }
 0x63a   : > { %v9918_v63 = vpop.eup %9917  ;;  %7580 = vst.msk [vmem:[%s12790_s1 + $0xf0] sm:$0xff] %vm7090_vm0, %v7548_v24  ;;  %v7549_v60 = vmul.f32 %v9916_v54, %v12901_v19 }
 0x63b   : > { %7578 = vst.msk [vmem:[%s12790_s1 + $0xe0] sm:$0xff] %vm7090_vm0, %v7546_v1  ;;  %v7547_v44 = vmul.f32 %v9918_v63, %v12905_v8 }
 0x63c   : > { %7581 = vst.msk [vmem:[%s12790_s1 + $0xf8] sm:$0xff] %vm7090_vm0, %v7549_v60 }
 0x63d   : > { %7579 = vst.msk [vmem:[%s12790_s1 + $0xe8] sm:$0xff] %vm7090_vm0, %v7547_v44 }
 0x63e PF: > { %s21_s17 = sadd.s32 1, %s9979_s17   ;;  %s13296_s15 = smov %s9975_s16 }
 0x63f   : > { %p18_p5 = scmp.ge.s32.totalorder %s21_s17, 4   ;;  %s13297_s16 = smov %s13299_s18 }
 0x641   :  { %20 = sbr.rel (!%p18_p5) target bundleno = 2 (0x2), region = 115 }

</bundles_post_ra>
